<compile_context>
chip_gen: v5e
topology: v5e:2x2
jax: 0.10.0
libtpu: 0.0.40
codegen_flags: <defaults>
</compile_context>

<pallas_src>
import functools

import jax
import jax.numpy as jnp
from jax.experimental import pallas as pl
from jax.experimental.pallas import tpu as pltpu

# ---- model configuration (synthetic single-stage PVTv2-like encoder) ----
IN_CH = 3            # RGB frame
PATCH = 4            # patch-embed conv kernel / stride
D = 128              # embedding dim (fills the 128-lane vreg)
HEADS = 2
HD = D // HEADS      # head dim = 64
MLP = 4 * D          # MLP hidden dim = 512
K = IN_CH * PATCH * PATCH  # im2col feature size = 48
KP = 64              # im2col feature size zero-padded for lane/MXU alignment

# ---- packed w128 slab row offsets (all multiples of 16 -> bf16 tile aligned)
# w128 slab (rows, D) bf16: [w_pe_pad | w_q | w_k | w_v | w_proj | w_fc2 | w_head^T]
R_W_PE = 0
R_W_Q = KP                         # 64
R_W_K = R_W_Q + D                  # 192
R_W_V = R_W_K + D                  # 320
R_W_PROJ = R_W_V + D               # 448
R_W_FC2 = R_W_PROJ + D             # 576
R_W_HEAD = R_W_FC2 + MLP           # 1088
# w512 slab (rows, MLP) bf16: [w_fc1 | b_fc1]
# vecs slab (16, D) f32 row indices:
(V_B_PE, V_LN1_G, V_LN1_B, V_B_Q, V_B_K, V_B_V, V_B_PROJ,
 V_LN2_G, V_LN2_B, V_B_FC2, V_B_HEAD) = range(11)


def _layernorm(x, g, b, eps=1e-5):
    mu = jnp.mean(x, axis=-1, keepdims=True)
    var = jnp.mean((x - mu) ** 2, axis=-1, keepdims=True)
    return (x - mu) * jax.lax.rsqrt(var + eps) * g + b


def backbone_kernel(patches_ref, w128_ref, w512_ref, vecs_ref, out_ref,
                    *, n_tok, gelu_bf16):
    # patches_ref block: (1, M, KP) bf16 -> (M, KP); M = (batch-per-step) * n_tok
    m_rows = patches_ref.shape[1]
    bt = m_rows // n_tok
    patches = patches_ref[0]

    # --- patch embed: Conv2d(3, D, 4, stride=4) as im2col matmul (K padded) ---
    x = jnp.dot(patches, w128_ref[R_W_PE:R_W_PE + KP, :],
                preferred_element_type=jnp.float32) + vecs_ref[V_B_PE, :]   # (M, D) f32

    # --- transformer block: pre-LN MHSA + residual ---
    # Fused full-width QKV projections (3 dense (M,128)x(128,128) matmuls);
    # heads are taken as static 64-lane halves afterwards.
    h1 = _layernorm(x, vecs_ref[V_LN1_G, :], vecs_ref[V_LN1_B, :]).astype(jnp.bfloat16)
    # 1/sqrt(HD) is baked into w_q/b_q at pack time.
    q = (jnp.dot(h1, w128_ref[R_W_Q:R_W_Q + D, :],
                 preferred_element_type=jnp.float32)
         + vecs_ref[V_B_Q, :]).astype(jnp.bfloat16)
    k = (jnp.dot(h1, w128_ref[R_W_K:R_W_K + D, :],
                 preferred_element_type=jnp.float32)
         + vecs_ref[V_B_K, :]).astype(jnp.bfloat16)
    v = (jnp.dot(h1, w128_ref[R_W_V:R_W_V + D, :],
                 preferred_element_type=jnp.float32)
         + vecs_ref[V_B_V, :]).astype(jnp.bfloat16)

    o_heads = []
    for hh in range(HEADS):                       # static unroll over heads
        lo, hi = hh * HD, (hh + 1) * HD
        q3 = q[:, lo:hi].reshape(bt, n_tok, HD)
        k3 = k[:, lo:hi].reshape(bt, n_tok, HD)
        v3 = v[:, lo:hi].reshape(bt, n_tok, HD)
        # attention is per batch element: batched dot over (bt, N, HD)
        s = jax.lax.dot_general(q3, k3, (((2,), (2,)), ((0,), (0,))),
                                preferred_element_type=jnp.float32)        # (bt, N, N)
        s = s - jnp.max(s, axis=-1, keepdims=True)
        p = jnp.exp(s)
        p = p * pl.reciprocal(jnp.sum(p, axis=-1, keepdims=True), approx=True)
        o = jax.lax.dot_general(p.astype(jnp.bfloat16), v3,
                                (((2,), (1,)), ((0,), (0,))),
                                preferred_element_type=jnp.float32)        # (bt, N, HD)
        o_heads.append(o.reshape(m_rows, HD))
    o = jnp.concatenate(o_heads, axis=-1).astype(jnp.bfloat16)             # (M, D)
    x = x + jnp.dot(o, w128_ref[R_W_PROJ:R_W_PROJ + D, :],
                    preferred_element_type=jnp.float32) + vecs_ref[V_B_PROJ, :]

    # --- MLP + residual ---
    h2 = _layernorm(x, vecs_ref[V_LN2_G, :], vecs_ref[V_LN2_B, :]).astype(jnp.bfloat16)
    m = jnp.dot(h2, w512_ref[0:D, :],
                preferred_element_type=jnp.float32) + w512_ref[D, :]        # (M, MLP) f32
    if gelu_bf16:
        # v6e/v7x: bf16-capable EUP -> run the transcendental in bf16
        m = jax.nn.gelu(m.astype(jnp.bfloat16), approximate=True)
    else:
        # v5e (no bf16 EUP/VPU): keep the GELU in f32, cast after
        m = jax.nn.gelu(m, approximate=True).astype(jnp.bfloat16)
    x = x + jnp.dot(m, w128_ref[R_W_FC2:R_W_FC2 + MLP, :],
                    preferred_element_type=jnp.float32) + vecs_ref[V_B_FC2, :]

    # --- segmentation head: Linear(D -> 1) per token, computed as a lane-dense
    #     (1, D) x (M, D)^T -> (1, M) row so the store is not masked ---
    w_head = w128_ref[R_W_HEAD:R_W_HEAD + 1, :]                             # (1, D)
    seg = jax.lax.dot_general(w_head, x.astype(jnp.bfloat16),
                              (((1,), (1,)), ((), ())),
                              preferred_element_type=jnp.float32)           # (1, M)
    out_ref[0] = seg + vecs_ref[V_B_HEAD:V_B_HEAD + 1, 0:1]


def _device_kind():
    try:
        return jax.devices()[0].device_kind.lower()
    except Exception:
        return ""


def _num_grid_steps(batch, n_tok):
    """v7x has 2 TensorCores -> split into a parallel grid of 2, but only when
    the per-core row count stays a lane-dense multiple of 128 (otherwise the
    output block is lane-masked and both cores redundantly DMA the weight
    slabs). v5e/v6e have one TC -> fully fuse the batch into one grid step."""
    kind = _device_kind()
    if "v7" in kind and batch % 2 == 0 and batch >= 2:
        per_core_rows = (batch // 2) * n_tok
        if per_core_rows >= 128 and per_core_rows % 128 == 0:
            return 2
    return 1


def _vmem_limit_bytes(m_rows, n_tok, packed):
    """Rough live-VMEM upper bound; raise the scoped limit only when the toy
    defaults (16 MiB on v5e) would be exceeded. Stays under v7x's 64 MiB."""
    weights = sum(int(a.size) * a.dtype.itemsize for a in packed)
    bt = max(m_rows // n_tok, 1)
    acts = m_rows * (6 * D + 2 * MLP) * 4            # x/h/q/k/v/o + MLP act (f32-equiv)
    scores = bt * n_tok * n_tok * 4 * 2              # scores + probs (f32)
    streams = 2 * (m_rows * KP * 2 + m_rows * 4)     # double-buffered patches + out
    est = weights + acts + scores + streams
    if est <= 16 * 1024 * 1024:
        return None
    return min(int(est * 1.25), 60 * 1024 * 1024)


def image_model_forward(frame, packed):
    """frame: (B, C, H, W) float32 NCHW. Returns seg logits (B, 1, H, W)."""
    w128, w512, vecs = packed
    B, C, H, W = frame.shape
    assert C == IN_CH and H % PATCH == 0 and W % PATCH == 0
    Hp, Wp = H // PATCH, W // PATCH
    N = Hp * Wp

    steps = _num_grid_steps(B, N)
    Bt = B // steps
    M = Bt * N                       # fused tokens per grid step

    # im2col glue: NCHW -> (steps, M, KP) bf16 tokens (zero-padded 48->64),
    # matching Conv2d weight layout (D, C, 4, 4) flattened to (C*4*4, D).
    patches = frame.reshape(B, C, Hp, PATCH, Wp, PATCH)
    patches = patches.transpose(0, 2, 4, 1, 3, 5).reshape(steps, M, K)
    patches = jnp.pad(patches, ((0, 0), (0, 0), (0, KP - K))).astype(jnp.bfloat16)

    kind = _device_kind()
    gelu_bf16 = ("v6" in kind) or ("v7" in kind)
    kernel = functools.partial(backbone_kernel, n_tok=N, gelu_bf16=gelu_bf16)

    vmem_limit = _vmem_limit_bytes(M, N, packed)
    cp_kwargs = dict(dimension_semantics=("parallel",))
    if vmem_limit is not None:
        cp_kwargs["vmem_limit_bytes"] = vmem_limit

    out = pl.pallas_call(
        kernel,
        out_shape=jax.ShapeDtypeStruct((steps, 1, M), jnp.float32),
        grid_spec=pltpu.PrefetchScalarGridSpec(
            num_scalar_prefetch=0,
            grid=(steps,),
            in_specs=[
                pl.BlockSpec((1, M, KP), lambda s: (s, 0, 0)),
                # weight slabs: whole-array VMEM residents (constant across the
                # grid -> no double-buffering, single prologue DMA)
                pl.BlockSpec(memory_space=pltpu.MemorySpace.VMEM),
                pl.BlockSpec(memory_space=pltpu.MemorySpace.VMEM),
                pl.BlockSpec(memory_space=pltpu.MemorySpace.VMEM),
            ],
            out_specs=pl.BlockSpec((1, 1, M), lambda s: (s, 0, 0)),
        ),
        compiler_params=pltpu.CompilerParams(**cp_kwargs),
    )(patches, w128, w512, vecs)

    seg_low = out.reshape(B, 1, Hp, Wp)
    # decoder-style upsample back to input resolution (glue, not hot path)
    seg = jax.image.resize(seg_low, (B, 1, H, W), method="bilinear")
    return seg


def init_params(key):
    ks = jax.random.split(key, 12)

    def dense(k, fan_in, shape):
        return jax.random.normal(k, shape, jnp.float32) / jnp.sqrt(float(fan_in))

    def bias(k, shape):
        return 0.02 * jax.random.normal(k, shape, jnp.float32)

    return {
        "w_pe":   dense(ks[0], K, (K, D)),
        "b_pe":   bias(ks[1], (D,)),
        "ln1_g":  jnp.ones((D,), jnp.float32),
        "ln1_b":  jnp.zeros((D,), jnp.float32),
        "w_q":    dense(ks[2], D, (D, D)),
        "w_k":    dense(ks[3], D, (D, D)),
        "w_v":    dense(ks[4], D, (D, D)),
        "b_q":    bias(ks[5], (D,)),
        "b_k":    bias(ks[6], (D,)),
        "b_v":    bias(ks[7], (D,)),
        "w_proj": dense(ks[8], D, (D, D)),
        "b_proj": jnp.zeros((D,), jnp.float32),
        "ln2_g":  jnp.ones((D,), jnp.float32),
        "ln2_b":  jnp.zeros((D,), jnp.float32),
        "w_fc1":  dense(ks[9], D, (D, MLP)),
        "b_fc1":  jnp.zeros((MLP,), jnp.float32),
        "w_fc2":  dense(ks[10], MLP, (MLP, D)),
        "b_fc2":  jnp.zeros((D,), jnp.float32),
        "w_head": dense(ks[11], D, (D, 1)),
        "b_head": jnp.zeros((), jnp.float32),
    }


def _pad_rows(a, mult=8):
    pad = (-a.shape[0]) % mult
    return jnp.pad(a, ((0, pad), (0, 0))) if pad else a


def pack_params(p):
    """Pack the 17 logical params into 3 slabs (DMA-stream reduction):
       w128 (rows, D)  bf16 — all 128-lane weight matrices (full-width QKV),
       w512 (rows, MLP) bf16 — fc1 weight + bias,
       vecs (16, D)     f32 — biases / LN params / head bias."""
    scale = 1.0 / (HD ** 0.5)

    # w128: zero-padded w_pe | scaled w_q | w_k | w_v | w_proj | w_fc2 | w_head^T
    w_pe_p = jnp.pad(p["w_pe"], ((0, KP - K), (0, 0)))
    rows = [w_pe_p, p["w_q"] * scale, p["w_k"], p["w_v"],
            p["w_proj"], p["w_fc2"], p["w_head"].T]
    w128 = _pad_rows(jnp.concatenate(rows, axis=0)).astype(jnp.bfloat16)

    # w512: w_fc1 | b_fc1 row
    w512 = _pad_rows(jnp.concatenate([p["w_fc1"], p["b_fc1"][None, :]],
                                     axis=0)).astype(jnp.bfloat16)

    # vecs: f32 bias/LN slab (attention scale baked into b_q)
    vecs = jnp.stack([
        p["b_pe"], p["ln1_g"], p["ln1_b"],
        p["b_q"] * scale, p["b_k"], p["b_v"], p["b_proj"],
        p["ln2_g"], p["ln2_b"], p["b_fc2"],
        jnp.full((D,), p["b_head"], jnp.float32),
    ], axis=0)
    vecs = _pad_rows(vecs)

    return w128, w512, vecs


if __name__ == "__main__":
    key = jax.random.PRNGKey(0)
    k_frame, k_params = jax.random.split(key)

    # small example consistent with the module: batch=2, RGB frame 32x32
    frame = jax.random.normal(k_frame, (2, IN_CH, 32, 32), jnp.float32)
    params = init_params(k_params)
    packed = pack_params(params)

    seg = image_model_forward(frame, packed)
    seg = jax.block_until_ready(seg)

    assert seg.shape == (2, 1, 32, 32), seg.shape
    assert bool(jnp.all(jnp.isfinite(seg)))
    print("KERNEL_OK")
</pallas_src>

<mosaic_0001>
module attributes {stable_mosaic.version = 11 : i64} {
  func.func @backbone_kernel(%arg0: i32, %arg1: memref<1x128x64xbf16, #tpu.memory_space<vmem>>, %arg2: memref<1096x128xbf16, #tpu.memory_space<vmem>>, %arg3: memref<136x512xbf16, #tpu.memory_space<vmem>>, %arg4: memref<16x128xf32, #tpu.memory_space<vmem>>, %arg5: memref<1x1x128xf32, #tpu.memory_space<vmem>>) attributes {dimension_semantics = [#tpu.dimension_semantics<parallel>], iteration_bounds = array<i64: 1>, scalar_prefetch = 0 : i64, scratch_operands = 0 : i64, tpu.core_type = #tpu.core_type<tc>, window_params = [{transform_indices = @transform_0, window_bounds = array<i64: 1, 128, 64>}, {pipeline_mode = #tpu.pipeline_mode<synchronous>, transform_indices = @transform_1, window_bounds = array<i64: 1096, 128>}, {pipeline_mode = #tpu.pipeline_mode<synchronous>, transform_indices = @transform_2, window_bounds = array<i64: 136, 512>}, {pipeline_mode = #tpu.pipeline_mode<synchronous>, transform_indices = @transform_3, window_bounds = array<i64: 16, 128>}, {transform_indices = @transform_4, window_bounds = array<i64: 1, 1, 128>}]} {
    %c0 = arith.constant 0 : index
    %c0_0 = arith.constant 0 : index
    %c0_1 = arith.constant 0 : index
    %0 = vector.load %arg1[%c0, %c0_0, %c0_1] : memref<1x128x64xbf16, #tpu.memory_space<vmem>>, vector<1x128x64xbf16>
    %1 = vector.shape_cast %0 : vector<1x128x64xbf16> to vector<128x64xbf16>
    %c0_2 = arith.constant 0 : index
    %c0_3 = arith.constant 0 : index
    %2 = vector.load %arg2[%c0_2, %c0_3] : memref<1096x128xbf16, #tpu.memory_space<vmem>>, vector<64x128xbf16>
    %cst = arith.constant dense<0.000000e+00> : vector<128x128xf32>
    %3 = tpu.matmul %1, %2, %cst {dimension_numbers = #tpu.dot_dimension_numbers<[1], [0], [0], [1], [0, 0, 1, 1], [], []>} : vector<128x64xbf16>, vector<64x128xbf16>, vector<128x128xf32> -> vector<128x128xf32>
    %c0_4 = arith.constant 0 : index
    %c0_5 = arith.constant 0 : index
    %4 = vector.load %arg4[%c0_4, %c0_5] : memref<16x128xf32, #tpu.memory_space<vmem>>, vector<1x128xf32>
    %5 = vector.shape_cast %4 : vector<1x128xf32> to vector<128xf32>
    %6 = vector.shape_cast %5 : vector<128xf32> to vector<1x128xf32>
    %7 = vector.broadcast %6 : vector<1x128xf32> to vector<128x128xf32>
    %8 = arith.addf %3, %7 : vector<128x128xf32>
    %c1 = arith.constant 1 : index
    %c0_6 = arith.constant 0 : index
    %9 = vector.load %arg4[%c1, %c0_6] : memref<16x128xf32, #tpu.memory_space<vmem>>, vector<1x128xf32>
    %10 = vector.shape_cast %9 : vector<1x128xf32> to vector<128xf32>
    %c2 = arith.constant 2 : index
    %c0_7 = arith.constant 0 : index
    %11 = vector.load %arg4[%c2, %c0_7] : memref<16x128xf32, #tpu.memory_space<vmem>>, vector<1x128xf32>
    %12 = vector.shape_cast %11 : vector<1x128xf32> to vector<128xf32>
    %cst_8 = arith.constant dense<0.000000e+00> : vector<128xf32>
    %13 = vector.multi_reduction <add>, %8, %cst_8 [1] : vector<128x128xf32> to vector<128xf32>
    %14 = vector.shape_cast %13 : vector<128xf32> to vector<128x1xf32>
    %cst_9 = arith.constant 1.280000e+02 : f32
    %15 = vector.broadcast %cst_9 : f32 to vector<128x1xf32>
    %16 = arith.divf %14, %15 : vector<128x1xf32>
    %17 = vector.broadcast %16 : vector<128x1xf32> to vector<128x128xf32>
    %18 = arith.subf %8, %17 : vector<128x128xf32>
    %19 = arith.mulf %18, %18 : vector<128x128xf32>
    %cst_10 = arith.constant dense<0.000000e+00> : vector<128xf32>
    %20 = vector.multi_reduction <add>, %19, %cst_10 [1] : vector<128x128xf32> to vector<128xf32>
    %21 = vector.shape_cast %20 : vector<128xf32> to vector<128x1xf32>
    %cst_11 = arith.constant 1.280000e+02 : f32
    %22 = vector.broadcast %cst_11 : f32 to vector<128x1xf32>
    %23 = arith.divf %21, %22 : vector<128x1xf32>
    %24 = vector.broadcast %16 : vector<128x1xf32> to vector<128x128xf32>
    %25 = arith.subf %8, %24 : vector<128x128xf32>
    %cst_12 = arith.constant 9.99999974E-6 : f32
    %26 = vector.broadcast %cst_12 : f32 to vector<128x1xf32>
    %27 = arith.addf %23, %26 : vector<128x1xf32>
    %28 = math.rsqrt %27 : vector<128x1xf32>
    %29 = vector.broadcast %28 : vector<128x1xf32> to vector<128x128xf32>
    %30 = arith.mulf %25, %29 : vector<128x128xf32>
    %31 = vector.shape_cast %10 : vector<128xf32> to vector<1x128xf32>
    %32 = vector.broadcast %31 : vector<1x128xf32> to vector<128x128xf32>
    %33 = arith.mulf %30, %32 : vector<128x128xf32>
    %34 = vector.shape_cast %12 : vector<128xf32> to vector<1x128xf32>
    %35 = vector.broadcast %34 : vector<1x128xf32> to vector<128x128xf32>
    %36 = arith.addf %33, %35 : vector<128x128xf32>
    %37 = arith.truncf %36 : vector<128x128xf32> to vector<128x128xbf16>
    %c64 = arith.constant 64 : index
    %c0_13 = arith.constant 0 : index
    %38 = vector.load %arg2[%c64, %c0_13] : memref<1096x128xbf16, #tpu.memory_space<vmem>>, vector<128x128xbf16>
    %cst_14 = arith.constant dense<0.000000e+00> : vector<128x128xf32>
    %39 = tpu.matmul %37, %38, %cst_14 {dimension_numbers = #tpu.dot_dimension_numbers<[1], [0], [0], [1], [0, 0, 1, 1], [], []>} : vector<128x128xbf16>, vector<128x128xbf16>, vector<128x128xf32> -> vector<128x128xf32>
    %c3 = arith.constant 3 : index
    %c0_15 = arith.constant 0 : index
    %40 = vector.load %arg4[%c3, %c0_15] : memref<16x128xf32, #tpu.memory_space<vmem>>, vector<1x128xf32>
    %41 = vector.shape_cast %40 : vector<1x128xf32> to vector<128xf32>
    %42 = vector.shape_cast %41 : vector<128xf32> to vector<1x128xf32>
    %43 = vector.broadcast %42 : vector<1x128xf32> to vector<128x128xf32>
    %44 = arith.addf %39, %43 : vector<128x128xf32>
    %45 = arith.truncf %44 : vector<128x128xf32> to vector<128x128xbf16>
    %c192 = arith.constant 192 : index
    %c0_16 = arith.constant 0 : index
    %46 = vector.load %arg2[%c192, %c0_16] : memref<1096x128xbf16, #tpu.memory_space<vmem>>, vector<128x128xbf16>
    %cst_17 = arith.constant dense<0.000000e+00> : vector<128x128xf32>
    %47 = tpu.matmul %37, %46, %cst_17 {dimension_numbers = #tpu.dot_dimension_numbers<[1], [0], [0], [1], [0, 0, 1, 1], [], []>} : vector<128x128xbf16>, vector<128x128xbf16>, vector<128x128xf32> -> vector<128x128xf32>
    %c4 = arith.constant 4 : index
    %c0_18 = arith.constant 0 : index
    %48 = vector.load %arg4[%c4, %c0_18] : memref<16x128xf32, #tpu.memory_space<vmem>>, vector<1x128xf32>
    %49 = vector.shape_cast %48 : vector<1x128xf32> to vector<128xf32>
    %50 = vector.shape_cast %49 : vector<128xf32> to vector<1x128xf32>
    %51 = vector.broadcast %50 : vector<1x128xf32> to vector<128x128xf32>
    %52 = arith.addf %47, %51 : vector<128x128xf32>
    %53 = arith.truncf %52 : vector<128x128xf32> to vector<128x128xbf16>
    %c320 = arith.constant 320 : index
    %c0_19 = arith.constant 0 : index
    %54 = vector.load %arg2[%c320, %c0_19] : memref<1096x128xbf16, #tpu.memory_space<vmem>>, vector<128x128xbf16>
    %cst_20 = arith.constant dense<0.000000e+00> : vector<128x128xf32>
    %55 = tpu.matmul %37, %54, %cst_20 {dimension_numbers = #tpu.dot_dimension_numbers<[1], [0], [0], [1], [0, 0, 1, 1], [], []>} : vector<128x128xbf16>, vector<128x128xbf16>, vector<128x128xf32> -> vector<128x128xf32>
    %c5 = arith.constant 5 : index
    %c0_21 = arith.constant 0 : index
    %56 = vector.load %arg4[%c5, %c0_21] : memref<16x128xf32, #tpu.memory_space<vmem>>, vector<1x128xf32>
    %57 = vector.shape_cast %56 : vector<1x128xf32> to vector<128xf32>
    %58 = vector.shape_cast %57 : vector<128xf32> to vector<1x128xf32>
    %59 = vector.broadcast %58 : vector<1x128xf32> to vector<128x128xf32>
    %60 = arith.addf %55, %59 : vector<128x128xf32>
    %61 = arith.truncf %60 : vector<128x128xf32> to vector<128x128xbf16>
    %62 = vector.extract_strided_slice %45 {offsets = [0, 0], sizes = [128, 64], strides = [1, 1]} : vector<128x128xbf16> to vector<128x64xbf16>
    %63 = vector.shape_cast %62 : vector<128x64xbf16> to vector<2x64x64xbf16>
    %64 = vector.extract_strided_slice %53 {offsets = [0, 0], sizes = [128, 64], strides = [1, 1]} : vector<128x128xbf16> to vector<128x64xbf16>
    %65 = vector.shape_cast %64 : vector<128x64xbf16> to vector<2x64x64xbf16>
    %66 = vector.extract_strided_slice %61 {offsets = [0, 0], sizes = [128, 64], strides = [1, 1]} : vector<128x128xbf16> to vector<128x64xbf16>
    %67 = vector.shape_cast %66 : vector<128x64xbf16> to vector<2x64x64xbf16>
    %cst_22 = arith.constant dense<0.000000e+00> : vector<2x64x64xf32>
    %68 = tpu.matmul %63, %65, %cst_22 {dimension_numbers = #tpu.dot_dimension_numbers<[2], [2], [1], [1], [0, 0, 0, 1, 1, 1], [0], [0]>} : vector<2x64x64xbf16>, vector<2x64x64xbf16>, vector<2x64x64xf32> -> vector<2x64x64xf32>
    %cst_23 = arith.constant dense<0xFF800000> : vector<2x64xf32>
    %69 = vector.multi_reduction <maximumf>, %68, %cst_23 [2] : vector<2x64x64xf32> to vector<2x64xf32>
    %70 = vector.shape_cast %69 : vector<2x64xf32> to vector<2x64x1xf32>
    %71 = vector.broadcast %70 : vector<2x64x1xf32> to vector<2x64x64xf32>
    %72 = arith.subf %68, %71 : vector<2x64x64xf32>
    %73 = math.exp %72 : vector<2x64x64xf32>
    %cst_24 = arith.constant dense<0.000000e+00> : vector<2x64xf32>
    %74 = vector.multi_reduction <add>, %73, %cst_24 [2] : vector<2x64x64xf32> to vector<2x64xf32>
    %75 = vector.shape_cast %74 : vector<2x64xf32> to vector<2x64x1xf32>
    %76 = tpu.reciprocal %75 {approx = true} : vector<2x64x1xf32> -> vector<2x64x1xf32>
    %77 = vector.broadcast %76 : vector<2x64x1xf32> to vector<2x64x64xf32>
    %78 = arith.mulf %73, %77 : vector<2x64x64xf32>
    %79 = arith.truncf %78 : vector<2x64x64xf32> to vector<2x64x64xbf16>
    %cst_25 = arith.constant dense<0.000000e+00> : vector<2x64x64xf32>
    %80 = tpu.matmul %79, %67, %cst_25 {dimension_numbers = #tpu.dot_dimension_numbers<[2], [1], [1], [2], [0, 0, 0, 1, 1, 2], [0], [0]>} : vector<2x64x64xbf16>, vector<2x64x64xbf16>, vector<2x64x64xf32> -> vector<2x64x64xf32>
    %81 = vector.shape_cast %80 : vector<2x64x64xf32> to vector<128x64xf32>
    %82 = vector.extract_strided_slice %45 {offsets = [0, 64], sizes = [128, 64], strides = [1, 1]} : vector<128x128xbf16> to vector<128x64xbf16>
    %83 = vector.shape_cast %82 : vector<128x64xbf16> to vector<2x64x64xbf16>
    %84 = vector.extract_strided_slice %53 {offsets = [0, 64], sizes = [128, 64], strides = [1, 1]} : vector<128x128xbf16> to vector<128x64xbf16>
    %85 = vector.shape_cast %84 : vector<128x64xbf16> to vector<2x64x64xbf16>
    %86 = vector.extract_strided_slice %61 {offsets = [0, 64], sizes = [128, 64], strides = [1, 1]} : vector<128x128xbf16> to vector<128x64xbf16>
    %87 = vector.shape_cast %86 : vector<128x64xbf16> to vector<2x64x64xbf16>
    %cst_26 = arith.constant dense<0.000000e+00> : vector<2x64x64xf32>
    %88 = tpu.matmul %83, %85, %cst_26 {dimension_numbers = #tpu.dot_dimension_numbers<[2], [2], [1], [1], [0, 0, 0, 1, 1, 1], [0], [0]>} : vector<2x64x64xbf16>, vector<2x64x64xbf16>, vector<2x64x64xf32> -> vector<2x64x64xf32>
    %cst_27 = arith.constant dense<0xFF800000> : vector<2x64xf32>
    %89 = vector.multi_reduction <maximumf>, %88, %cst_27 [2] : vector<2x64x64xf32> to vector<2x64xf32>
    %90 = vector.shape_cast %89 : vector<2x64xf32> to vector<2x64x1xf32>
    %91 = vector.broadcast %90 : vector<2x64x1xf32> to vector<2x64x64xf32>
    %92 = arith.subf %88, %91 : vector<2x64x64xf32>
    %93 = math.exp %92 : vector<2x64x64xf32>
    %cst_28 = arith.constant dense<0.000000e+00> : vector<2x64xf32>
    %94 = vector.multi_reduction <add>, %93, %cst_28 [2] : vector<2x64x64xf32> to vector<2x64xf32>
    %95 = vector.shape_cast %94 : vector<2x64xf32> to vector<2x64x1xf32>
    %96 = tpu.reciprocal %95 {approx = true} : vector<2x64x1xf32> -> vector<2x64x1xf32>
    %97 = vector.broadcast %96 : vector<2x64x1xf32> to vector<2x64x64xf32>
    %98 = arith.mulf %93, %97 : vector<2x64x64xf32>
    %99 = arith.truncf %98 : vector<2x64x64xf32> to vector<2x64x64xbf16>
    %cst_29 = arith.constant dense<0.000000e+00> : vector<2x64x64xf32>
    %100 = tpu.matmul %99, %87, %cst_29 {dimension_numbers = #tpu.dot_dimension_numbers<[2], [1], [1], [2], [0, 0, 0, 1, 1, 2], [0], [0]>} : vector<2x64x64xbf16>, vector<2x64x64xbf16>, vector<2x64x64xf32> -> vector<2x64x64xf32>
    %101 = vector.shape_cast %100 : vector<2x64x64xf32> to vector<128x64xf32>
    %102 = tpu.concatenate %81, %101 in 1 : vector<128x64xf32>, vector<128x64xf32> -> vector<128x128xf32>
    %103 = arith.truncf %102 : vector<128x128xf32> to vector<128x128xbf16>
    %c448 = arith.constant 448 : index
    %c0_30 = arith.constant 0 : index
    %104 = vector.load %arg2[%c448, %c0_30] : memref<1096x128xbf16, #tpu.memory_space<vmem>>, vector<128x128xbf16>
    %cst_31 = arith.constant dense<0.000000e+00> : vector<128x128xf32>
    %105 = tpu.matmul %103, %104, %cst_31 {dimension_numbers = #tpu.dot_dimension_numbers<[1], [0], [0], [1], [0, 0, 1, 1], [], []>} : vector<128x128xbf16>, vector<128x128xbf16>, vector<128x128xf32> -> vector<128x128xf32>
    %106 = arith.addf %8, %105 : vector<128x128xf32>
    %c6 = arith.constant 6 : index
    %c0_32 = arith.constant 0 : index
    %107 = vector.load %arg4[%c6, %c0_32] : memref<16x128xf32, #tpu.memory_space<vmem>>, vector<1x128xf32>
    %108 = vector.shape_cast %107 : vector<1x128xf32> to vector<128xf32>
    %109 = vector.shape_cast %108 : vector<128xf32> to vector<1x128xf32>
    %110 = vector.broadcast %109 : vector<1x128xf32> to vector<128x128xf32>
    %111 = arith.addf %106, %110 : vector<128x128xf32>
    %c7 = arith.constant 7 : index
    %c0_33 = arith.constant 0 : index
    %112 = vector.load %arg4[%c7, %c0_33] : memref<16x128xf32, #tpu.memory_space<vmem>>, vector<1x128xf32>
    %113 = vector.shape_cast %112 : vector<1x128xf32> to vector<128xf32>
    %c8 = arith.constant 8 : index
    %c0_34 = arith.constant 0 : index
    %114 = vector.load %arg4[%c8, %c0_34] : memref<16x128xf32, #tpu.memory_space<vmem>>, vector<1x128xf32>
    %115 = vector.shape_cast %114 : vector<1x128xf32> to vector<128xf32>
    %cst_35 = arith.constant dense<0.000000e+00> : vector<128xf32>
    %116 = vector.multi_reduction <add>, %111, %cst_35 [1] : vector<128x128xf32> to vector<128xf32>
    %117 = vector.shape_cast %116 : vector<128xf32> to vector<128x1xf32>
    %cst_36 = arith.constant 1.280000e+02 : f32
    %118 = vector.broadcast %cst_36 : f32 to vector<128x1xf32>
    %119 = arith.divf %117, %118 : vector<128x1xf32>
    %120 = vector.broadcast %119 : vector<128x1xf32> to vector<128x128xf32>
    %121 = arith.subf %111, %120 : vector<128x128xf32>
    %122 = arith.mulf %121, %121 : vector<128x128xf32>
    %cst_37 = arith.constant dense<0.000000e+00> : vector<128xf32>
    %123 = vector.multi_reduction <add>, %122, %cst_37 [1] : vector<128x128xf32> to vector<128xf32>
    %124 = vector.shape_cast %123 : vector<128xf32> to vector<128x1xf32>
    %cst_38 = arith.constant 1.280000e+02 : f32
    %125 = vector.broadcast %cst_38 : f32 to vector<128x1xf32>
    %126 = arith.divf %124, %125 : vector<128x1xf32>
    %127 = vector.broadcast %119 : vector<128x1xf32> to vector<128x128xf32>
    %128 = arith.subf %111, %127 : vector<128x128xf32>
    %cst_39 = arith.constant 9.99999974E-6 : f32
    %129 = vector.broadcast %cst_39 : f32 to vector<128x1xf32>
    %130 = arith.addf %126, %129 : vector<128x1xf32>
    %131 = math.rsqrt %130 : vector<128x1xf32>
    %132 = vector.broadcast %131 : vector<128x1xf32> to vector<128x128xf32>
    %133 = arith.mulf %128, %132 : vector<128x128xf32>
    %134 = vector.shape_cast %113 : vector<128xf32> to vector<1x128xf32>
    %135 = vector.broadcast %134 : vector<1x128xf32> to vector<128x128xf32>
    %136 = arith.mulf %133, %135 : vector<128x128xf32>
    %137 = vector.shape_cast %115 : vector<128xf32> to vector<1x128xf32>
    %138 = vector.broadcast %137 : vector<1x128xf32> to vector<128x128xf32>
    %139 = arith.addf %136, %138 : vector<128x128xf32>
    %140 = arith.truncf %139 : vector<128x128xf32> to vector<128x128xbf16>
    %c0_40 = arith.constant 0 : index
    %c0_41 = arith.constant 0 : index
    %141 = vector.load %arg3[%c0_40, %c0_41] : memref<136x512xbf16, #tpu.memory_space<vmem>>, vector<128x512xbf16>
    %cst_42 = arith.constant dense<0.000000e+00> : vector<128x512xf32>
    %142 = tpu.matmul %140, %141, %cst_42 {dimension_numbers = #tpu.dot_dimension_numbers<[1], [0], [0], [1], [0, 0, 1, 1], [], []>} : vector<128x128xbf16>, vector<128x512xbf16>, vector<128x512xf32> -> vector<128x512xf32>
    %c128 = arith.constant 128 : index
    %c0_43 = arith.constant 0 : index
    %143 = vector.load %arg3[%c128, %c0_43] : memref<136x512xbf16, #tpu.memory_space<vmem>>, vector<1x512xbf16>
    %144 = vector.shape_cast %143 : vector<1x512xbf16> to vector<512xbf16>
    %145 = arith.extf %144 : vector<512xbf16> to vector<512xf32>
    %146 = vector.shape_cast %145 : vector<512xf32> to vector<1x512xf32>
    %147 = vector.broadcast %146 : vector<1x512xf32> to vector<128x512xf32>
    %148 = arith.addf %142, %147 : vector<128x512xf32>
    %149 = arith.mulf %148, %148 : vector<128x512xf32>
    %150 = arith.mulf %148, %149 : vector<128x512xf32>
    %cst_44 = arith.constant 4.471500e-02 : f32
    %151 = vector.broadcast %cst_44 : f32 to vector<128x512xf32>
    %152 = arith.mulf %151, %150 : vector<128x512xf32>
    %153 = arith.addf %148, %152 : vector<128x512xf32>
    %cst_45 = arith.constant 0.797884583 : f32
    %154 = vector.broadcast %cst_45 : f32 to vector<128x512xf32>
    %155 = arith.mulf %154, %153 : vector<128x512xf32>
    %156 = math.tanh %155 : vector<128x512xf32>
    %cst_46 = arith.constant 1.000000e+00 : f32
    %157 = vector.broadcast %cst_46 : f32 to vector<128x512xf32>
    %158 = arith.addf %157, %156 : vector<128x512xf32>
    %cst_47 = arith.constant 5.000000e-01 : f32
    %159 = vector.broadcast %cst_47 : f32 to vector<128x512xf32>
    %160 = arith.mulf %159, %158 : vector<128x512xf32>
    %161 = arith.mulf %148, %160 : vector<128x512xf32>
    %162 = arith.truncf %161 : vector<128x512xf32> to vector<128x512xbf16>
    %c576 = arith.constant 576 : index
    %c0_48 = arith.constant 0 : index
    %163 = vector.load %arg2[%c576, %c0_48] : memref<1096x128xbf16, #tpu.memory_space<vmem>>, vector<512x128xbf16>
    %cst_49 = arith.constant dense<0.000000e+00> : vector<128x128xf32>
    %164 = tpu.matmul %162, %163, %cst_49 {dimension_numbers = #tpu.dot_dimension_numbers<[1], [0], [0], [1], [0, 0, 1, 1], [], []>} : vector<128x512xbf16>, vector<512x128xbf16>, vector<128x128xf32> -> vector<128x128xf32>
    %165 = arith.addf %111, %164 : vector<128x128xf32>
    %c9 = arith.constant 9 : index
    %c0_50 = arith.constant 0 : index
    %166 = vector.load %arg4[%c9, %c0_50] : memref<16x128xf32, #tpu.memory_space<vmem>>, vector<1x128xf32>
    %167 = vector.shape_cast %166 : vector<1x128xf32> to vector<128xf32>
    %168 = vector.shape_cast %167 : vector<128xf32> to vector<1x128xf32>
    %169 = vector.broadcast %168 : vector<1x128xf32> to vector<128x128xf32>
    %170 = arith.addf %165, %169 : vector<128x128xf32>
    %c1088 = arith.constant 1088 : index
    %c0_51 = arith.constant 0 : index
    %171 = vector.load %arg2[%c1088, %c0_51] : memref<1096x128xbf16, #tpu.memory_space<vmem>>, vector<1x128xbf16>
    %172 = arith.truncf %170 : vector<128x128xf32> to vector<128x128xbf16>
    %cst_52 = arith.constant dense<0.000000e+00> : vector<1x128xf32>
    %173 = tpu.matmul %171, %172, %cst_52 {dimension_numbers = #tpu.dot_dimension_numbers<[1], [1], [0], [0], [0, 0, 1, 0], [], []>} : vector<1x128xbf16>, vector<128x128xbf16>, vector<1x128xf32> -> vector<1x128xf32>
    %c10 = arith.constant 10 : index
    %c0_53 = arith.constant 0 : index
    %174 = vector.load %arg4[%c10, %c0_53] : memref<16x128xf32, #tpu.memory_space<vmem>>, vector<1x1xf32>
    %175 = vector.broadcast %174 : vector<1x1xf32> to vector<1x128xf32>
    %176 = arith.addf %173, %175 : vector<1x128xf32>
    %c0_54 = arith.constant 0 : index
    %c0_55 = arith.constant 0 : index
    %c0_56 = arith.constant 0 : index
    %177 = vector.load %arg5[%c0_54, %c0_55, %c0_56] : memref<1x1x128xf32, #tpu.memory_space<vmem>>, vector<1x1x128xf32>
    %178 = vector.shape_cast %177 : vector<1x1x128xf32> to vector<1x128xf32>
    %179 = vector.shape_cast %176 : vector<1x128xf32> to vector<1x1x128xf32>
    tpu.vector_store %arg5[%c0_54, %c0_55, %c0_56], %179 {strides = array<i32>} : memref<1x1x128xf32, #tpu.memory_space<vmem>>, vector<1x1x128xf32>,
    return
  }
  func.func @transform_0(%arg0: i32) -> (i32, i32, i32) {
    %c0_i32 = arith.constant 0 : i32
    %c0_i32_0 = arith.constant 0 : i32
    %c0_i32_1 = arith.constant 0 : i32
    return %arg0, %c0_i32, %c0_i32_0 : i32, i32, i32
  }
  func.func @transform_1(%arg0: i32) -> (i32, i32) {
    %c0_i32 = arith.constant 0 : i32
    %c0_i32_0 = arith.constant 0 : i32
    %c0_i32_1 = arith.constant 0 : i32
    return %c0_i32, %c0_i32_0 : i32, i32
  }
  func.func @transform_2(%arg0: i32) -> (i32, i32) {
    %c0_i32 = arith.constant 0 : i32
    %c0_i32_0 = arith.constant 0 : i32
    %c0_i32_1 = arith.constant 0 : i32
    return %c0_i32, %c0_i32_0 : i32, i32
  }
  func.func @transform_3(%arg0: i32) -> (i32, i32) {
    %c0_i32 = arith.constant 0 : i32
    %c0_i32_0 = arith.constant 0 : i32
    %c0_i32_1 = arith.constant 0 : i32
    return %c0_i32, %c0_i32_0 : i32, i32
  }
  func.func @transform_4(%arg0: i32) -> (i32, i32, i32) {
    %c0_i32 = arith.constant 0 : i32
    %c0_i32_0 = arith.constant 0 : i32
    %c0_i32_1 = arith.constant 0 : i32
    return %arg0, %c0_i32, %c0_i32_0 : i32, i32, i32
  }
}

</mosaic_0001>

<bundles_post_ra>
// kernel: tpu_custom_call.1
= control target key start
LH: loop header
LB: loop body
LE: loop exit
PB: predicated region body
PF: predicated region fallthrough
CT: control target
= control target key end

     0   :  { %9 = vsyncpa [#allocation3], 0  ;;  %s7147_s0 = inlined_call_operand.vmem [shape: bf16[1,128,64], index: 0, kind: input, shape index: {}]   ;;  %s7148_s1 = inlined_call_operand.hbm [shape: bf16[1096,128], index: 1, kind: input, shape index: {}]   ;;  %s7149_s2 = inlined_call_operand.hbm [shape: bf16[136,512], index: 2, kind: input, shape index: {}]   ;;  %s7150_s3 = inlined_call_operand.vmem [shape: f32[16,128], index: 3, kind: input, shape index: {}]   ;;  %s7151_s4 = inlined_call_operand.hbm [shape: f32[1,1,128], index: 4, kind: output, shape index: {}]  }
   0x1   :  { %10 = vsyncpa [#allocation6], 0 }
   0x2   :  { %11 = vsyncpa [#allocation4], 0  ;;  %s18_s17 = sshll.u32 %s7148_s1, 4  ;;  %s5192_s18 = smov [#allocation2]   ;;  %s19_s17 = int_to_ptr.hbm [resolvable:$true] %s18_s17 }
   0x3   :  { %s20_s19 = sshll.u32 %s5192_s18, 4  ;;  %s31_s22 = sshll.u32 %s7149_s2, 4  ;;  %s21_s19 = int_to_ptr.vmem [resolvable:$true] %s20_s19  ;;  %s32_s22 = int_to_ptr.hbm [resolvable:$true] %s31_s22 }
   0x4   :  { %s5193_s23 = smov 64   ;;  %s5194_s24 = smov 4  }
   0x5   :  { %26 = dma.hbm_to_vmem [thread:$0]  %s19_s17, 8768, %s21_s19, [#allocation3], %s5193_s23, %s5193_s23, %s5194_s24  }
   0x6   :  { %s5195_s25 = smov [#allocation5]   ;;  %s5196_s27 = smov 256  }
   0x7   :  { %s33_s26 = sshll.u32 %s5195_s25, 4  ;;  %s5197_s28 = smov 16   ;;  %s34_s26 = int_to_ptr.vmem [resolvable:$true] %s33_s26 }
   0x8   :  { %39 = dma.hbm_to_vmem [thread:$0]  %s32_s22, 4352, %s34_s26, [#allocation6], %s5196_s27, %s5196_s27, %s5197_s28  }
   0x9   :  { %5186 = dma.done.wait [#allocation3], 8768  }
   0xa   :  { %5187 = vsyncadd [#allocation3], 4294958528 }
   0xb   :  { %5188 = dma.done.wait [#allocation6], 4352  }
   0xc   :  { %5189 = vsyncadd [#allocation6], 4294962944  ;;  %v4624_v0 = vld [vmem:[#allocation2 + $0x18] sm:$0xff]  ;;  %v4623_v1 = vld [vmem:[#allocation2 + $0x10] sm:$0xff]  ;;  %vm141_vm0 = vcmask 523264   ;;  %v5198_v27 = vmov 128.0  }
   0xd   :  { %170 = vmatpush.bf16.msra.mxu0 %v4624_v0  ;;  %4721 = vmatpush.bf16.msra.mxu2 %v4624_v0  ;;  %v4622_v2 = vld [vmem:[#allocation2 + $0x8] sm:$0xff]  ;;  %v4621_v3 = vld [vmem:[#allocation2] sm:$0xff]  ;;  %v4616_v5 = vld [vmem:[%s7147_s0 + $0x18] sm:$0xff]  ;;  %4790 = vrcp.f32 %v5198_v27  ;;  %s4130_s17 = sshll.u32 %s7151_s4, 4  ;;  %s4131_s17 = int_to_ptr.hbm [resolvable:$true] %s4130_s17 }
   0xe   :  { %4722 = vmatpush.bf16.msra.mxu3 %v4624_v0  ;;  %v4613_v4 = vld [vmem:[%s7147_s0] sm:$0xff]  ;;  %v4614_v6 = vld [vmem:[%s7147_s0 + $0x8] sm:$0xff]  ;;  %v4615_v8 = vld [vmem:[%s7147_s0 + $0x10] sm:$0xff] }
   0xf   :  { %v4617_v7 = vld [vmem:[%s7147_s0 + $0x20] sm:$0xff]  ;;  %v4618_v9 = vld [vmem:[%s7147_s0 + $0x28] sm:$0xff]  ;;  %v4619_v13 = vld [vmem:[%s7147_s0 + $0x30] sm:$0xff] }
  0x10   :  { %v5261_v10 = vld [vmem:[%s7150_s3] ss:$0 sm:$0xff]  ;;  %v4620_v18 = vld [vmem:[%s7147_s0 + $0x38] sm:$0xff]  ;;  %v4647_v27 = vld [vmem:[#allocation2 + $0xd0] sm:$0xff] }
  0x11   :  { %171 = vmatpush.bf16.msra.mxu0 %v4623_v1  ;;  %4723 = vmatpush.bf16.msra.mxu2 %v4623_v1 }
  0x12   :  { %4724 = vmatpush.bf16.msra.mxu3 %v4623_v1 }
  0x13   :  { %v4791_v28 = vpop.eup %4790 }
  0x14   :  { %v250_v29 = vmul.f32 128.0, %v4791_v28  ;;  %vm254_vm1 = vweird.f32 %v4791_v28 }
  0x15   :  { %172 = vmatpush.bf16.msra.mxu0 %v4622_v2  ;;  %4725 = vmatpush.bf16.msra.mxu2 %v4622_v2 }
  0x16   :  { %4726 = vmatpush.bf16.msra.mxu3 %v4622_v2  ;;  %v251_v30 = vsub.f32 1.0, %v250_v29  ;;  %v4638_v29 = vld [vmem:[#allocation2 + $0x88] sm:$0xff] }
  0x18   :  { %v252_v31 = vmul.f32 %v4791_v28, %v251_v30  ;;  %v4646_v30 = vld [vmem:[#allocation2 + $0xc8] sm:$0xff] }
  0x19   :  { %173 = vmatpush.bf16.msra.mxu0 %v4621_v3  ;;  %4727 = vmatpush.bf16.msra.mxu2 %v4621_v3 }
  0x1a   :  { %4728 = vmatpush.bf16.msra.mxu3 %v4621_v3  ;;  %v253_v32 = vadd.f32 %v4791_v28, %v252_v31  ;;  %v4629_v31 = vld [vmem:[#allocation2 + $0x40] sm:$0xff] }
  0x1c   :  { %4189 = vmatmul.msk.bf16.vlgmr.msra.gmra.mxu0 %vm141_vm0, %v4613_v4  ;;  %4192 = vmatmul.msk.bf16.vlgmr.msra.gmra.mxu2 %vm141_vm0, %v4616_v5  ;;  %v5299_v33 = vsel %vm254_vm1, %v4791_v28, %v253_v32  ;;  %v4630_v28 = vld [vmem:[#allocation2 + $0x48] sm:$0xff]  ;;  %v4637_v32 = vld [vmem:[#allocation2 + $0x80] sm:$0xff] }
  0x1d   :  { %4194 = vmatmul.msk.bf16.vlgmr.msra.gmra.mxu3 %vm141_vm0, %v4618_v9 }
  0x2c   :  { %4190 = vmatmul.msk.bf16.gmra.mxu0 %vm141_vm0, %v4614_v6  ;;  %4193 = vmatmul.msk.bf16.gmra.mxu2 %vm141_vm0, %v4617_v7 }
  0x2d   :  { %4195 = vmatmul.msk.bf16.gmra.mxu3 %vm141_vm0, %v4619_v13 }
  0x3c   :  { %4191 = vmatmul.msk.bf16.gmra.mxu0 %vm141_vm0, %v4615_v8 }
  0x3d   :  { %4196 = vmatmul.msk.bf16.gmra.mxu3 %vm141_vm0, %v4620_v18  ;;  %v4632_v18 = vld [vmem:[#allocation2 + $0x58] sm:$0xff] }
  0x3e   :  { %652 = vmatpush.bf16.msra.mxu1 %v4632_v18 }
  0x99   :  { %v175_v11 = vpop.f32.mrf.mxu0 }
  0x9a   :  { %v5264_v12 = vadd.f32 %v5261_v10, %v175_v11 }
  0x9c   :  { %217 = vadd.xlane.f32.xlu0 %v5264_v12 }
  0x9f   :  { %v190_v25 = vpop.f32.mrf.mxu2 }
  0xa0   :  { %v5296_v26 = vadd.f32 %v5261_v10, %v190_v25  ;;  %v200_v51 = vpop.f32.mrf.mxu3  ;;  %v4639_v25 = vld [vmem:[#allocation2 + $0x90] sm:$0xff] }
  0xa1   :  { %v177_v14 = vpop.f32.mrf.mxu0  ;;  %v5339_v60 = vadd.f32 %v5261_v10, %v200_v51  ;;  %v4625_v51 = vld [vmem:[#allocation2 + $0x20] sm:$0xff] }
  0xa2   :  { %v5272_v15 = vadd.f32 %v5261_v10, %v177_v14 }
  0xa4   :  { %219 = vadd.xlane.f32.xlu0 %v5272_v15 }
  0xa7   :  { %v192_v38 = vpop.f32.mrf.mxu2 }
  0xa8   :  { %v5312_v42 = vadd.f32 %v5261_v10, %v192_v38  ;;  %v202_v59 = vpop.f32.mrf.mxu3  ;;  %v4644_v38 = vld [vmem:[#allocation2 + $0xb8] sm:$0xff] }
  0xa9   :  { %v180_v16 = vpop.f32.mrf.mxu0  ;;  %v5349_v1 = vadd.f32 %v5261_v10, %v202_v59 }
  0xaa   :  { %v5276_v17 = vadd.f32 %v5261_v10, %v180_v16 }
  0xac   :  { %221 = vadd.xlane.f32.xlu1 %v5276_v17 }
  0xaf   :  { %v195_v44 = vpop.f32.mrf.mxu2 }
  0xb0   :  { %v5319_v47 = vadd.f32 %v5261_v10, %v195_v44  ;;  %v205_v3 = vpop.f32.mrf.mxu3  ;;  %v4626_v44 = vld [vmem:[#allocation2 + $0x28] sm:$0xff] }
  0xb1   :  { %v182_v19 = vpop.f32.mrf.mxu0  ;;  %v5359_v7 = vadd.f32 %v5261_v10, %v205_v3 }
  0xb2   :  { %v5284_v20 = vadd.f32 %v5261_v10, %v182_v19  ;;  %v4640_v19 = vld [vmem:[#allocation2 + $0x98] sm:$0xff] }
  0xb3   :  { %7175 = vst [vmem:[#allocation11_spill] sm:$0xff] %v5359_v7  ;;  %783 = vmatpush.bf16.msrb.mxu2 %v4640_v19 }
  0xb4   :  { %223 = vadd.xlane.f32.xlu1 %v5284_v20 }
  0xb7   :  { %v197_v53 = vpop.f32.mrf.mxu2  ;;  %784 = vmatpush.bf16.msrb.mxu2 %v4639_v25 }
  0xb8   :  { %v5332_v55 = vadd.f32 %v5261_v10, %v197_v53  ;;  %v207_v11 = vpop.f32.mrf.mxu3  ;;  %v4641_v53 = vld [vmem:[#allocation2 + $0xa0] sm:$0xff] }
  0xb9   :  { %v185_v21 = vpop.f32.mrf.mxu0  ;;  %v5368_v13 = vadd.f32 %v5261_v10, %v207_v11 }
  0xba   :  { %v5288_v22 = vadd.f32 %v5261_v10, %v185_v21  ;;  %v4648_v21 = vld [vmem:[#allocation2 + $0xd8] sm:$0xff] }
  0xbb   :  { %7176 = vst [vmem:[#allocation12_spill] sm:$0xff] %v5368_v13  ;;  %914 = vmatpush.bf16.msrb.mxu3 %v4648_v21  ;;  %785 = vmatpush.bf16.msrb.mxu2 %v4638_v29 }
  0xbc   :  { %225 = vadd.xlane.f32.xlu2 %v5288_v22 }
  0xbf   :  { %915 = vmatpush.bf16.msrb.mxu3 %v4647_v27  ;;  %786 = vmatpush.bf16.msrb.mxu2 %v4637_v32 }
  0xc0   :  { %v210_v14 = vpop.f32.mrf.mxu3 }
  0xc1   :  { %v187_v23 = vpop.f32.mrf.mxu0  ;;  %v5372_v16 = vadd.f32 %v5261_v10, %v210_v14 }
  0xc2   :  { %v5292_v24 = vadd.f32 %v5261_v10, %v187_v23  ;;  %v4631_v23 = vld [vmem:[#allocation2 + $0x50] sm:$0xff] }
  0xc3   :  { %7177 = vst [vmem:[#allocation13_spill] sm:$0xff] %v5372_v16  ;;  %653 = vmatpush.bf16.msra.mxu1 %v4631_v23  ;;  %916 = vmatpush.bf16.msrb.mxu3 %v4646_v30 }
  0xc4   :  { %227 = vadd.xlane.f32.xlu2 %v5292_v24 }
  0xc7   :  { %654 = vmatpush.bf16.msra.mxu1 %v4630_v28 }
  0xcb   :  { %655 = vmatpush.bf16.msra.mxu1 %v4629_v31 }
  0xcc   :  { %229 = vadd.xlane.f32.xlu2 %v5296_v26 }
 0x10f   :  { %v218_v34 = vpop.xlane.xlu0 %217 }
 0x110   :  { %v256_v35 = vmul.f32 %v5299_v33, %v218_v34  ;;  %v4645_v34 = vld [vmem:[#allocation2 + $0xc0] sm:$0xff] }
 0x111   :  { %917 = vmatpush.bf16.msrb.mxu3 %v4645_v34 }
 0x112   :  { %v5303_v36 = vsub.f32 %v5264_v12, %v256_v35  ;;  %v4628_v35 = vld [vmem:[#allocation2 + $0x38] sm:$0xff] }
 0x113   :  { %656 = vmatpush.bf16.msra.mxu1 %v4628_v35 }
 0x114   :  { %v288_v37 = vmul.f32 %v5303_v36, %v5303_v36 }
 0x115   :  { %918 = vmatpush.bf16.msrb.mxu3 %v4644_v38 }
 0x116   :  { %304 = vadd.xlane.f32.xlu0 %v288_v37  ;;  %v4636_v37 = vld [vmem:[#allocation2 + $0x78] sm:$0xff] }
 0x117   :  { %v220_v39 = vpop.xlane.xlu0 %219  ;;  %787 = vmatpush.bf16.msrb.mxu2 %v4636_v37 }
 0x118   :  { %v257_v40 = vmul.f32 %v5299_v33, %v220_v39  ;;  %v4627_v39 = vld [vmem:[#allocation2 + $0x30] sm:$0xff] }
 0x119   :  { %657 = vmatpush.bf16.msra.mxu1 %v4627_v39 }
 0x11a   :  { %v5309_v41 = vsub.f32 %v5272_v15, %v257_v40  ;;  %v4635_v40 = vld [vmem:[#allocation2 + $0x70] sm:$0xff] }
 0x11b   :  { %788 = vmatpush.bf16.msrb.mxu2 %v4635_v40 }
 0x11c   :  { %v289_v43 = vmul.f32 %v5309_v41, %v5309_v41 }
 0x11d   :  { %658 = vmatpush.bf16.msra.mxu1 %v4626_v44 }
 0x11e   :  { %231 = vadd.xlane.f32.xlu0 %v5312_v42  ;;  %306 = vadd.xlane.f32.xlu1 %v289_v43  ;;  %v4643_v43 = vld [vmem:[#allocation2 + $0xb0] sm:$0xff] }
 0x11f   :  { %v222_v45 = vpop.xlane.xlu1 %221  ;;  %919 = vmatpush.bf16.msrb.mxu3 %v4643_v43  ;;  %v212_v43 = vpop.f32.mrf.mxu3 }
 0x120   :  { %v258_v46 = vmul.f32 %v5299_v33, %v222_v45  ;;  %v4634_v45 = vld [vmem:[#allocation2 + $0x68] sm:$0xff] }
 0x121   :  { %789 = vmatpush.bf16.msrb.mxu2 %v4634_v45  ;;  %659 = vmatpush.bf16.msra.mxu1 %v4625_v51 }
 0x122   :  { %v5322_v48 = vsub.f32 %v5276_v17, %v258_v46  ;;  %v4642_v46 = vld [vmem:[#allocation2 + $0xa8] sm:$0xff] }
 0x123   :  { %920 = vmatpush.bf16.msrb.mxu3 %v4642_v46 }
 0x124   :  { %v290_v49 = vmul.f32 %v5322_v48, %v5322_v48 }
 0x126   :  { %233 = vadd.xlane.f32.xlu0 %v5319_v47  ;;  %308 = vadd.xlane.f32.xlu1 %v290_v49 }
 0x127   :  { %v224_v50 = vpop.xlane.xlu1 %223  ;;  %921 = vmatpush.bf16.msrb.mxu3 %v4641_v53  ;;  %v5402_v53 = vadd.f32 %v5261_v10, %v212_v43 }
 0x128   :  { %v259_v52 = vmul.f32 %v5299_v33, %v224_v50 }
 0x129   :  { %7178 = vst [vmem:[#allocation14_spill] sm:$0xff] %v5402_v53 }
 0x12a   :  { %v5329_v54 = vsub.f32 %v5284_v20, %v259_v52  ;;  %v4633_v52 = vld [vmem:[#allocation2 + $0x60] sm:$0xff] }
 0x12b   :  { %790 = vmatpush.bf16.msrb.mxu2 %v4633_v52 }
 0x12c   :  { %v291_v56 = vmul.f32 %v5329_v54, %v5329_v54 }
 0x12e   :  { %310 = vadd.xlane.f32.xlu2 %v291_v56  ;;  %235 = vadd.xlane.f32.xlu1 %v5332_v55 }
 0x12f   :  { %v226_v57 = vpop.xlane.xlu2 %225 }
 0x130   :  { %v260_v58 = vmul.f32 %v5299_v33, %v226_v57 }
 0x132   :  { %v5342_v61 = vsub.f32 %v5288_v22, %v260_v58 }
 0x134   :  { %v292_v62 = vmul.f32 %v5342_v61, %v5342_v61 }
 0x136   :  { %312 = vadd.xlane.f32.xlu2 %v292_v62  ;;  %237 = vadd.xlane.f32.xlu1 %v5339_v60 }
 0x137   :  { %v228_v63 = vpop.xlane.xlu2 %227 }
 0x138   :  { %v261_v0 = vmul.f32 %v5299_v33, %v228_v63 }
 0x13a   :  { %v5352_v2 = vsub.f32 %v5292_v24, %v261_v0 }
 0x13c   :  { %v293_v4 = vmul.f32 %v5352_v2, %v5352_v2 }
 0x13e   :  { %239 = vadd.xlane.f32.xlu2 %v5349_v1  ;;  %314 = vadd.xlane.f32.xlu0 %v293_v4 }
 0x13f   :  { %v230_v5 = vpop.xlane.xlu2 %229 }
 0x140   :  { %v262_v6 = vmul.f32 %v5299_v33, %v230_v5 }
 0x142   :  { %v5362_v8 = vsub.f32 %v5296_v26, %v262_v6 }
 0x144   :  { %v294_v9 = vmul.f32 %v5362_v8, %v5362_v8 }
 0x146   :  { %241 = vadd.xlane.f32.xlu2 %v5359_v7  ;;  %316 = vadd.xlane.f32.xlu0 %v294_v9 }
 0x14e   :  { %243 = vadd.xlane.f32.xlu0 %v5368_v13 }
 0x156   :  { %245 = vadd.xlane.f32.xlu0 %v5372_v16 }
 0x189   :  { %v305_v49 = vpop.xlane.xlu0 %304 }
 0x18a   :  { %v336_v50 = vmul.f32 %v305_v49, %v5299_v33 }
 0x18c   :  { %v352_v56 = vadd.f32 1e-05, %v336_v50  ;;  %v5399_v50 = vld [vmem:[%s7150_s3 + $0x1] ss:$0 sm:$0xff] }
 0x18e   :  { %4792 = vrsqrt.f32 %v352_v56  ;;  %vm374_vm3 = vweird.f32 %v352_v56 }
 0x191   :  { %v307_v57 = vpop.xlane.xlu1 %306  ;;  %v232_v58 = vpop.xlane.xlu0 %231 }
 0x192   :  { %v337_v59 = vmul.f32 %v307_v57, %v5299_v33  ;;  %v263_v62 = vmul.f32 %v5299_v33, %v232_v58 }
 0x194   :  { %v4793_v63 = vpop.eup %4792  ;;  %v353_v0 = vadd.f32 1e-05, %v337_v59  ;;  %v5379_v3 = vsub.f32 %v5312_v42, %v263_v62  ;;  %v5412_v62 = vld [vmem:[%s7150_s3 + $0x2] ss:$0 sm:$0xff] }
 0x195   :  { %v369_v4 = vmul.f32 %v4793_v63, %v352_v56  ;;  %vm375_vm2 = vweird.f32 %v4793_v63 }
 0x196   :  { %4794 = vrsqrt.f32 %v353_v0  ;;  %v295_v5 = vmul.f32 %v5379_v3, %v5379_v3  ;;  %vm376_vm4 = vmor %vm374_vm3, %vm375_vm2  ;;  %vm384_vm6 = vweird.f32 %v353_v0 }
 0x197   :  { %v370_v6 = vmul.f32 %v4793_v63, %v369_v4 }
 0x198   :  { %318 = vadd.xlane.f32.xlu1 %v295_v5 }
 0x199   :  { %v371_v9 = vmul.f32 0.5, %v370_v6  ;;  %v309_v11 = vpop.xlane.xlu1 %308  ;;  %v234_v14 = vpop.xlane.xlu0 %233 }
 0x19a   :  { %v338_v18 = vmul.f32 %v309_v11, %v5299_v33  ;;  %v264_v19 = vmul.f32 %v5299_v33, %v234_v14 }
 0x19b   :  { %v372_v21 = vsub.f32 1.5, %v371_v9 }
 0x19c   :  { %v4795_v23 = vpop.eup %4794  ;;  %v354_v25 = vadd.f32 1e-05, %v338_v18  ;;  %v5386_v27 = vsub.f32 %v5319_v47, %v264_v19 }
 0x19d   :  { %v373_v28 = vmul.f32 %v4793_v63, %v372_v21  ;;  %v379_v29 = vmul.f32 %v4795_v23, %v353_v0  ;;  %vm385_vm5 = vweird.f32 %v4795_v23 }
 0x19e   :  { %4796 = vrsqrt.f32 %v354_v25  ;;  %v296_v30 = vmul.f32 %v5386_v27, %v5386_v27  ;;  %vm386_vm7 = vmor %vm384_vm6, %vm385_vm5  ;;  %vm394_vm9 = vweird.f32 %v354_v25 }
 0x19f   :  { %v380_v31 = vmul.f32 %v4795_v23, %v379_v29  ;;  %v377_v32 = vsel %vm376_vm4, %v4793_v63, %v373_v28 }
 0x1a0   :  { %320 = vadd.xlane.f32.xlu1 %v296_v30  ;;  %v528_v49 = vmul.f32 %v377_v32, %v5303_v36 }
 0x1a1   :  { %v381_v34 = vmul.f32 0.5, %v380_v31  ;;  %v311_v35 = vpop.xlane.xlu2 %310  ;;  %v236_v37 = vpop.xlane.xlu1 %235 }
 0x1a2   :  { %v339_v38 = vmul.f32 %v311_v35, %v5299_v33  ;;  %v265_v39 = vmul.f32 %v5299_v33, %v236_v37  ;;  %v545_v59 = vmul.f32 %v5399_v50, %v528_v49 }
 0x1a3   :  { %v382_v40 = vsub.f32 1.5, %v381_v34 }
 0x1a4   :  { %v4797_v44 = vpop.eup %4796  ;;  %v355_v45 = vadd.f32 1e-05, %v339_v38  ;;  %v5393_v46 = vsub.f32 %v5332_v55, %v265_v39  ;;  %v562_v18 = vadd.f32 %v5412_v62, %v545_v59 }
 0x1a5   :  { %v383_v51 = vmul.f32 %v4795_v23, %v382_v40  ;;  %v389_v52 = vmul.f32 %v4797_v44, %v354_v25  ;;  %vm395_vm8 = vweird.f32 %v4797_v44 }
 0x1a6   :  { %4798 = vrsqrt.f32 %v355_v45  ;;  %v297_v56 = vmul.f32 %v5393_v46, %v5393_v46  ;;  %vm5424_vm10 = vmor %vm394_vm9, %vm395_vm8  ;;  %vm404_vm12 = vweird.f32 %v355_v45 }
 0x1a7   :  { %v387_v57 = vsel %vm386_vm7, %v4795_v23, %v383_v51  ;;  %v390_v58 = vmul.f32 %v4797_v44, %v389_v52 }
 0x1a8   :  { %322 = vadd.xlane.f32.xlu2 %v297_v56  ;;  %247 = vadd.xlane.f32.xlu1 %v5402_v53  ;;  %v529_v36 = vmul.f32 %v387_v57, %v5309_v41 }
 0x1a9   :  { %v391_v10 = vmul.f32 0.5, %v390_v58  ;;  %v313_v63 = vpop.xlane.xlu2 %312  ;;  %v238_v0 = vpop.xlane.xlu1 %237 }
 0x1aa   :  { %v340_v4 = vmul.f32 %v313_v63, %v5299_v33  ;;  %v266_v5 = vmul.f32 %v5299_v33, %v238_v0  ;;  %v546_v6 = vmul.f32 %v5399_v50, %v529_v36 }
 0x1ab   :  { %v392_v9 = vsub.f32 1.5, %v391_v10 }
 0x1ac   :  { %v4799_v11 = vpop.eup %4798  ;;  %v356_v14 = vadd.f32 1e-05, %v340_v4  ;;  %v5418_v41 = vsub.f32 %v5339_v60, %v266_v5  ;;  %v563_v19 = vadd.f32 %v5412_v62, %v546_v6 }
 0x1ad   :  { %v393_v21 = vmul.f32 %v4797_v44, %v392_v9  ;;  %v399_v23 = vmul.f32 %v4799_v11, %v355_v45  ;;  %vm405_vm11 = vweird.f32 %v4799_v11 }
 0x1ae   :  { %4800 = vrsqrt.f32 %v356_v14  ;;  %v298_v28 = vmul.f32 %v5418_v41, %v5418_v41  ;;  %v578_v29 = vpack.c.bf16 %v563_v19, %v562_v18  ;;  %vm406_vm13 = vmor %vm404_vm12, %vm405_vm11  ;;  %vm414_vm15 = vweird.f32 %v356_v14 }
 0x1af   :  { %v400_v30 = vmul.f32 %v4799_v11, %v399_v23  ;;  %v397_v32 = vsel %vm5424_vm10, %v4797_v44, %v393_v21 }
 0x1b0   :  { %324 = vadd.xlane.f32.xlu2 %v298_v28  ;;  %660 = vmatmul.bf16.vlgmr.msra.gmra.mxu1 %v578_v29  ;;  %v530_v51 = vmul.f32 %v397_v32, %v5322_v48 }
 0x1b1   :  { %v401_v34 = vmul.f32 0.5, %v400_v30  ;;  %791 = vmatmul.bf16.vlgmr.msrb.gmra.mxu2 %v578_v29  ;;  %922 = vmatmul.bf16.vlgmr.msrb.gmra.mxu3 %v578_v29  ;;  %v240_v35 = vpop.xlane.xlu2 %239  ;;  %v315_v37 = vpop.xlane.xlu0 %314 }
 0x1b2   :  { %v267_v38 = vmul.f32 %v5299_v33, %v240_v35  ;;  %v341_v39 = vmul.f32 %v315_v37, %v5299_v33  ;;  %v547_v59 = vmul.f32 %v5399_v50, %v530_v51 }
 0x1b3   :  { %v402_v25 = vsub.f32 1.5, %v401_v34 }
 0x1b4   :  { %v4801_v40 = vpop.eup %4800  ;;  %v5433_v43 = vsub.f32 %v5349_v1, %v267_v38  ;;  %v357_v49 = vadd.f32 1e-05, %v341_v39  ;;  %v564_v9 = vadd.f32 %v5412_v62, %v547_v59 }
 0x1b5   :  { %v403_v52 = vmul.f32 %v4799_v11, %v402_v25  ;;  %v409_v44 = vmul.f32 %v4801_v40, %v356_v14  ;;  %vm415_vm14 = vweird.f32 %v4801_v40 }
 0x1b6   :  { %4802 = vrsqrt.f32 %v357_v49  ;;  %v299_v56 = vmul.f32 %v5433_v43, %v5433_v43  ;;  %vm416_vm1 = vmor %vm414_vm15, %vm415_vm14  ;;  %vm424_vm3 = vweird.f32 %v357_v49 }
 0x1b7   :  { %v407_v57 = vsel %vm406_vm13, %v4799_v11, %v403_v52  ;;  %v410_v58 = vmul.f32 %v4801_v40, %v409_v44 }
 0x1b8   :  { %326 = vadd.xlane.f32.xlu0 %v299_v56  ;;  %v531_v36 = vmul.f32 %v407_v57, %v5329_v54 }
 0x1b9   :  { %v411_v10 = vmul.f32 0.5, %v410_v58  ;;  %v242_v63 = vpop.xlane.xlu2 %241  ;;  %v317_v0 = vpop.xlane.xlu0 %316 }
 0x1ba   :  { %v268_v48 = vmul.f32 %v5299_v33, %v242_v63  ;;  %v548_v45 = vmul.f32 %v5399_v50, %v531_v36 }
 0x1bb   :  { %v412_v4 = vsub.f32 1.5, %v411_v10 }
 0x1bc   :  { %v4803_v5 = vpop.eup %4802  ;;  %v5443_v6 = vsub.f32 %v5359_v7, %v268_v48  ;;  %v565_v11 = vadd.f32 %v5412_v62, %v548_v45 }
 0x1bd   :  { %v413_v18 = vmul.f32 %v4801_v40, %v412_v4  ;;  %v419_v54 = vmul.f32 %v4803_v5, %v357_v49  ;;  %vm425_vm2 = vweird.f32 %v4803_v5 }
 0x1be   :  { %v579_v19 = vpack.c.bf16 %v565_v11, %v564_v9  ;;  %v300_v21 = vmul.f32 %v5443_v6, %v5443_v6  ;;  %vm426_vm4 = vmor %vm424_vm3, %vm425_vm2 }
 0x1bf   :  { %v420_v23 = vmul.f32 %v4803_v5, %v419_v54  ;;  %v417_v28 = vsel %vm416_vm1, %v4801_v40, %v413_v18 }
 0x1c0   :  { %665 = vmatmul.bf16.gmra.mxu1 %v579_v19  ;;  %328 = vadd.xlane.f32.xlu1 %v300_v21  ;;  %v532_v34 = vmul.f32 %v417_v28, %v5342_v61 }
 0x1c1   :  { %v421_v29 = vmul.f32 0.5, %v420_v23  ;;  %796 = vmatmul.bf16.gmra.mxu2 %v579_v19  ;;  %927 = vmatmul.bf16.gmra.mxu3 %v579_v19  ;;  %v244_v30 = vpop.xlane.xlu0 %243 }
 0x1c2   :  { %v269_v31 = vmul.f32 %v5299_v33, %v244_v30  ;;  %v549_v25 = vmul.f32 %v5399_v50, %v532_v34 }
 0x1c3   :  { %v422_v32 = vsub.f32 1.5, %v421_v29 }
 0x1c4   :  { %v5452_v35 = vsub.f32 %v5368_v13, %v269_v31  ;;  %v566_v49 = vadd.f32 %v5412_v62, %v549_v25 }
 0x1c5   :  { %v423_v37 = vmul.f32 %v4803_v5, %v422_v32 }
 0x1c6   :  { %v301_v14 = vmul.f32 %v5452_v35, %v5452_v35 }
 0x1c7   :  { %v427_v38 = vsel %vm426_vm4, %v4803_v5, %v423_v37 }
 0x1c8   :  { %330 = vadd.xlane.f32.xlu2 %v301_v14  ;;  %v533_v39 = vmul.f32 %v427_v38, %v5352_v2  ;;  %v342_v2 = vmul.f32 %v317_v0, %v5299_v33 }
 0x1c9   :  { %v246_v40 = vpop.xlane.xlu0 %245 }
 0x1ca   :  { %v270_v51 = vmul.f32 %v5299_v33, %v246_v40  ;;  %v550_v61 = vmul.f32 %v5399_v50, %v533_v39  ;;  %v358_v58 = vadd.f32 1e-05, %v342_v2 }
 0x1cc   :  { %v5461_v52 = vsub.f32 %v5372_v16, %v270_v51  ;;  %v567_v44 = vadd.f32 %v5412_v62, %v550_v61  ;;  %4804 = vrsqrt.f32 %v358_v58  ;;  %vm434_vm6 = vweird.f32 %v358_v58 }
 0x1ce   :  { %v580_v56 = vpack.c.bf16 %v567_v44, %v566_v49  ;;  %v302_v57 = vmul.f32 %v5461_v52, %v5461_v52 }
 0x1d0   :  { %670 = vmatmul.bf16.gmra.mxu1 %v580_v56  ;;  %332 = vadd.xlane.f32.xlu0 %v302_v57 }
 0x1d1   :  { %801 = vmatmul.bf16.gmra.mxu2 %v580_v56  ;;  %932 = vmatmul.bf16.gmra.mxu3 %v580_v56 }
 0x1d2   :  { %v4805_v36 = vpop.eup %4804 }
 0x1d3   :  { %v429_v59 = vmul.f32 %v4805_v36, %v358_v58  ;;  %vm435_vm5 = vweird.f32 %v4805_v36 }
 0x1d4   :  { %vm436_vm7 = vmor %vm434_vm6, %vm435_vm5 }
 0x1d5   :  { %v430_v10 = vmul.f32 %v4805_v36, %v429_v59 }
 0x1d7   :  { %v431_v4 = vmul.f32 0.5, %v430_v10 }
 0x1d9   :  { %v432_v5 = vsub.f32 1.5, %v431_v4 }
 0x1db   :  { %v433_v19 = vmul.f32 %v4805_v36, %v432_v5 }
 0x1dd   :  { %v437_v23 = vsel %vm436_vm7, %v4805_v36, %v433_v19 }
 0x1de   :  { %v534_v14 = vmul.f32 %v437_v23, %v5362_v8 }
 0x1e0   :  { %v551_v56 = vmul.f32 %v5399_v50, %v534_v14 }
 0x20b   :  { %v319_v63 = vpop.xlane.xlu1 %318 }
 0x20c   :  { %v343_v48 = vmul.f32 %v319_v63, %v5299_v33  ;;  %v568_v63 = vadd.f32 %v5412_v62, %v551_v56 }
 0x20e   :  { %v359_v45 = vadd.f32 1e-05, %v343_v48 }
 0x210   :  { %4806 = vrsqrt.f32 %v359_v45  ;;  %vm444_vm9 = vweird.f32 %v359_v45 }
 0x213   :  { %v321_v9 = vpop.xlane.xlu1 %320 }
 0x214   :  { %v344_v11 = vmul.f32 %v321_v9, %v5299_v33 }
 0x216   :  { %v4807_v18 = vpop.eup %4806  ;;  %v360_v54 = vadd.f32 1e-05, %v344_v11 }
 0x217   :  { %v439_v0 = vmul.f32 %v4807_v18, %v359_v45  ;;  %vm445_vm8 = vweird.f32 %v4807_v18 }
 0x218   :  { %4808 = vrsqrt.f32 %v360_v54  ;;  %vm446_vm10 = vmor %vm444_vm9, %vm445_vm8  ;;  %vm454_vm12 = vweird.f32 %v360_v54 }
 0x219   :  { %v440_v21 = vmul.f32 %v4807_v18, %v439_v0 }
 0x21b   :  { %v441_v28 = vmul.f32 0.5, %v440_v21  ;;  %v323_v29 = vpop.xlane.xlu2 %322  ;;  %v248_v30 = vpop.xlane.xlu1 %247 }
 0x21c   :  { %v345_v31 = vmul.f32 %v323_v29, %v5299_v33  ;;  %v271_v32 = vmul.f32 %v5299_v33, %v248_v30 }
 0x21d   :  { %v442_v34 = vsub.f32 1.5, %v441_v28 }
 0x21e   :  { %v4809_v37 = vpop.eup %4808  ;;  %v361_v38 = vadd.f32 1e-05, %v345_v31  ;;  %v5474_v39 = vsub.f32 %v5402_v53, %v271_v32 }
 0x21f   :  { %v443_v25 = vmul.f32 %v4807_v18, %v442_v34  ;;  %v449_v40 = vmul.f32 %v4809_v37, %v360_v54  ;;  %vm455_vm11 = vweird.f32 %v4809_v37 }
 0x220   :  { %4810 = vrsqrt.f32 %v361_v38  ;;  %v303_v51 = vmul.f32 %v5474_v39, %v5474_v39  ;;  %vm456_vm13 = vmor %vm454_vm12, %vm455_vm11  ;;  %vm464_vm15 = vweird.f32 %v361_v38 }
 0x221   :  { %v447_v61 = vsel %vm446_vm10, %v4807_v18, %v443_v25  ;;  %v450_v49 = vmul.f32 %v4809_v37, %v449_v40 }
 0x222   :  { %v535_v44 = vmul.f32 %v447_v61, %v5379_v3  ;;  %334 = vadd.xlane.f32.xlu1 %v303_v51 }
 0x223   :  { %v451_v8 = vmul.f32 0.5, %v450_v49  ;;  %v325_v57 = vpop.xlane.xlu2 %324 }
 0x224   :  { %v346_v2 = vmul.f32 %v325_v57, %v5299_v33  ;;  %v552_v58 = vmul.f32 %v5399_v50, %v535_v44 }
 0x225   :  { %v452_v36 = vsub.f32 1.5, %v451_v8 }
 0x226   :  { %v4811_v59 = vpop.eup %4810  ;;  %v362_v10 = vadd.f32 1e-05, %v346_v2  ;;  %v569_v48 = vadd.f32 %v5412_v62, %v552_v58 }
 0x227   :  { %v459_v45 = vmul.f32 %v4811_v59, %v361_v38  ;;  %v453_v4 = vmul.f32 %v4809_v37, %v452_v36  ;;  %vm465_vm14 = vweird.f32 %v4811_v59 }
 0x228   :  { %4812 = vrsqrt.f32 %v362_v10  ;;  %v581_v3 = vpack.c.bf16 %v569_v48, %v568_v63  ;;  %vm466_vm1 = vmor %vm464_vm15, %vm465_vm14  ;;  %vm474_vm3 = vweird.f32 %v362_v10 }
 0x229   :  { %v460_v5 = vmul.f32 %v4811_v59, %v459_v45  ;;  %v457_v18 = vsel %vm456_vm13, %v4809_v37, %v453_v4 }
 0x22a   :  { %675 = vmatmul.bf16.gmra.mxu1 %v581_v3  ;;  %806 = vmatmul.bf16.gmra.mxu2 %v581_v3  ;;  %v536_v29 = vmul.f32 %v457_v18, %v5386_v27 }
 0x22b   :  { %v461_v9 = vmul.f32 0.5, %v460_v5  ;;  %937 = vmatmul.bf16.gmra.mxu3 %v581_v3  ;;  %v327_v11 = vpop.xlane.xlu0 %326 }
 0x22c   :  { %v347_v19 = vmul.f32 %v327_v11, %v5299_v33  ;;  %v553_v25 = vmul.f32 %v5399_v50, %v536_v29 }
 0x22d   :  { %v462_v0 = vsub.f32 1.5, %v461_v9  ;;  %v5485_v21 = vpop.f32.mrf.mxu1 }
 0x22e   :  { %v4813_v23 = vpop.eup %4812  ;;  %v363_v28 = vadd.f32 1e-05, %v347_v19 }
 0x22f   :  { %v463_v30 = vmul.f32 %v4811_v59, %v462_v0  ;;  %v469_v54 = vmul.f32 %v4813_v23, %v362_v10  ;;  %vm475_vm2 = vweird.f32 %v4813_v23 }
 0x230   :  { %4814 = vrsqrt.f32 %v363_v28  ;;  %vm476_vm4 = vmor %vm474_vm3, %vm475_vm2  ;;  %vm484_vm6 = vweird.f32 %v363_v28 }
 0x231   :  { %v467_v31 = vsel %vm466_vm1, %v4811_v59, %v463_v30  ;;  %v470_v32 = vmul.f32 %v4813_v23, %v469_v54 }
 0x232   :  { %v537_v34 = vmul.f32 %v467_v31, %v5393_v46  ;;  %v570_v46 = vadd.f32 %v5412_v62, %v553_v25 }
 0x233   :  { %v471_v37 = vmul.f32 0.5, %v470_v32  ;;  %v329_v14 = vpop.xlane.xlu1 %328 }
 0x234   :  { %v5490_v40 = vpop.f32.mrf.mxu2  ;;  %v348_v51 = vmul.f32 %v329_v14, %v5299_v33  ;;  %v554_v61 = vmul.f32 %v5399_v50, %v537_v34 }
 0x235   :  { %v472_v27 = vsub.f32 1.5, %v471_v37  ;;  %v5494_v49 = vpop.f32.mrf.mxu1 }
 0x236   :  { %v4815_v38 = vpop.eup %4814  ;;  %v364_v44 = vadd.f32 1e-05, %v348_v51  ;;  %v571_v56 = vadd.f32 %v5412_v62, %v554_v61 }
 0x237   :  { %v479_v8 = vmul.f32 %v4815_v38, %v363_v28  ;;  %v473_v57 = vmul.f32 %v4813_v23, %v472_v27  ;;  %vm485_vm5 = vweird.f32 %v4815_v38  ;;  %v5513_v28 = vld [vmem:[%s7150_s3 + $0x4] ss:$0 sm:$0xff] }
 0x238   :  { %4816 = vrsqrt.f32 %v364_v44  ;;  %v582_v58 = vpack.c.bf16 %v571_v56, %v570_v46  ;;  %vm486_vm7 = vmor %vm484_vm6, %vm485_vm5  ;;  %vm494_vm9 = vweird.f32 %v364_v44 }
 0x239   :  { %v480_v2 = vmul.f32 %v4815_v38, %v479_v8  ;;  %v477_v63 = vsel %vm476_vm4, %v4813_v23, %v473_v57 }
 0x23a   :  { %680 = vmatmul.bf16.gmra.mxu1 %v582_v58  ;;  %811 = vmatmul.bf16.gmra.mxu2 %v582_v58  ;;  %v538_v11 = vmul.f32 %v477_v63, %v5418_v41  ;;  %v5522_v63 = vld [vmem:[%s7150_s3 + $0x3] ss:$0 sm:$0xff] }
 0x23b   :  { %v481_v36 = vmul.f32 0.5, %v480_v2  ;;  %v331_v59 = vpop.xlane.xlu2 %330  ;;  %942 = vmatmul.bf16.gmra.mxu3 %v582_v58 }
 0x23c   :  { %v5498_v48 = vpop.f32.mrf.mxu2  ;;  %v349_v45 = vmul.f32 %v331_v59, %v5299_v33  ;;  %v555_v30 = vmul.f32 %v5399_v50, %v538_v11 }
 0x23d   :  { %v482_v4 = vsub.f32 1.5, %v481_v36  ;;  %v5501_v3 = vpop.f32.mrf.mxu1 }
 0x23e   :  { %v4817_v5 = vpop.eup %4816  ;;  %v365_v9 = vadd.f32 1e-05, %v349_v45  ;;  %v572_v25 = vadd.f32 %v5412_v62, %v555_v30 }
 0x23f   :  { %v483_v10 = vmul.f32 %v4815_v38, %v482_v4  ;;  %v489_v18 = vmul.f32 %v4817_v5, %v364_v44  ;;  %vm495_vm8 = vweird.f32 %v4817_v5 }
 0x240   :  { %4818 = vrsqrt.f32 %v365_v9  ;;  %vm496_vm10 = vmor %vm494_vm9, %vm495_vm8  ;;  %vm504_vm12 = vweird.f32 %v365_v9 }
 0x241   :  { %v487_v19 = vsel %vm486_vm7, %v4815_v38, %v483_v10  ;;  %v490_v0 = vmul.f32 %v4817_v5, %v489_v18 }
 0x242   :  { %v539_v23 = vmul.f32 %v487_v19, %v5433_v43 }
 0x243   :  { %v491_v29 = vmul.f32 0.5, %v490_v0 }
 0x244   :  { %v797_v54 = vpop.f32.mrf.mxu2  ;;  %v556_v31 = vmul.f32 %v5399_v50, %v539_v23 }
 0x245   :  { %v492_v32 = vsub.f32 1.5, %v491_v29  ;;  %v5507_v34 = vpop.f32.mrf.mxu1  ;;  %v798_v61 = vadd.f32 %v5513_v28, %v797_v54 }
 0x246   :  { %v4819_v37 = vpop.eup %4818  ;;  %v573_v41 = vadd.f32 %v5412_v62, %v556_v31 }
 0x247   :  { %v493_v14 = vmul.f32 %v4817_v5, %v492_v32  ;;  %v499_v43 = vmul.f32 %v4819_v37, %v365_v9  ;;  %vm505_vm11 = vweird.f32 %v4819_v37  ;;  %v834_v57 = vpack.c.bf16 %v798_v61, %v798_v61 }
 0x248   :  { %v583_v27 = vpack.c.bf16 %v573_v41, %v572_v25  ;;  %vm506_vm13 = vmor %vm504_vm12, %vm505_vm11  ;;  %v664_v61 = vadd.f32 %v5522_v63, %v5494_v49  ;;  %v5553_v49 = vpop.f32.mrf.mxu3 }
 0x249   :  { %v500_v51 = vmul.f32 %v4819_v37, %v499_v43  ;;  %v497_v38 = vsel %vm496_vm10, %v4817_v5, %v493_v14  ;;  %v1009_v4 = vunpack.c.l.b16 %v834_v57 }
 0x24a   :  { %685 = vmatmul.bf16.gmra.mxu1 %v583_v27  ;;  %816 = vmatmul.bf16.gmra.mxu2 %v583_v27  ;;  %v540_v36 = vmul.f32 %v497_v38, %v5443_v6  ;;  %v662_v38 = vadd.f32 %v5522_v63, %v5485_v21 }
 0x24b   :  { %v501_v56 = vmul.f32 0.5, %v500_v51  ;;  %947 = vmatmul.bf16.gmra.mxu3 %v583_v27 }
 0x24c   :  { %v799_v8 = vpop.f32.mrf.mxu2  ;;  %v557_v18 = vmul.f32 %v5399_v50, %v540_v36 }
 0x24d   :  { %v502_v46 = vsub.f32 1.5, %v501_v56  ;;  %v800_v2 = vadd.f32 %v5513_v28, %v799_v8  ;;  %v671_v58 = vpop.f32.mrf.mxu1 }
 0x24e   :  { %v672_v10 = vadd.f32 %v5522_v63, %v671_v58  ;;  %v574_v30 = vadd.f32 %v5412_v62, %v557_v18 }
 0x24f   :  { %v503_v44 = vmul.f32 %v4819_v37, %v502_v46  ;;  %v835_v59 = vpack.c.bf16 %v800_v2, %v800_v2  ;;  %v702_v46 = vpack.c.bf16 %v664_v61, %v664_v61  ;;  %v701_v2 = vpack.c.bf16 %v662_v38, %v662_v38 }
 0x250   :  { %v705_v23 = vpack.c.bf16 %v672_v10, %v672_v10  ;;  %v5555_v21 = vpop.f32.mrf.mxu3 }
 0x251   :  { %v507_v45 = vsel %vm506_vm13, %v4819_v37, %v503_v44  ;;  %v1010_v5 = vunpack.c.l.b16 %v835_v59  ;;  %v988_v58 = vunpack.c.l.b16 %v702_v46  ;;  %v987_v36 = vunpack.c.l.b16 %v701_v2  ;;  %v333_v59 = vpop.xlane.xlu0 %332 }
 0x252   :  { %v541_v11 = vmul.f32 %v507_v45, %v5452_v35  ;;  %v991_v37 = vunpack.c.l.b16 %v705_v23  ;;  %v350_v45 = vmul.f32 %v333_v59, %v5299_v33 }
 0x253   :  { %v5527_v19 = vpack.c.b16 %v1010_v5, %v1009_v4  ;;  %v5549_v44 = vpack.c.b16 %v988_v58, %v987_v36 }
 0x254   :  { %v802_v6 = vpop.f32.mrf.mxu2  ;;  %v558_v9 = vmul.f32 %v5399_v50, %v541_v11  ;;  %v366_v4 = vadd.f32 1e-05, %v350_v45 }
 0x255   :  { %1537 = vrot.lane.b32.xlu1 %v5527_v19, %s5193_s23  ;;  %v673_v0 = vpop.f32.mrf.mxu1  ;;  %v803_v32 = vadd.f32 %v5513_v28, %v802_v6 }
 0x256   :  { %v674_v29 = vadd.f32 %v5522_v63, %v673_v0  ;;  %v575_v35 = vadd.f32 %v5412_v62, %v558_v9  ;;  %4820 = vrsqrt.f32 %v366_v4  ;;  %vm514_vm15 = vweird.f32 %v366_v4 }
 0x257   :  { %v836_v25 = vpack.c.bf16 %v803_v32, %v803_v32 }
 0x258   :  { %v706_v54 = vpack.c.bf16 %v674_v29, %v674_v29  ;;  %v584_v31 = vpack.c.bf16 %v575_v35, %v574_v30  ;;  %v5558_v5 = vpop.f32.mrf.mxu3 }
 0x259   :  { %v1011_v56 = vunpack.c.l.b16 %v836_v25 }
 0x25a   :  { %v992_v41 = vunpack.c.l.b16 %v706_v54  ;;  %690 = vmatmul.bf16.gmra.mxu1 %v584_v31  ;;  %821 = vmatmul.bf16.gmra.mxu2 %v584_v31 }
 0x25b   :  { %952 = vmatmul.bf16.gmra.mxu3 %v584_v31 }
 0x25c   :  { %v804_v14 = vpop.f32.mrf.mxu2  ;;  %v5536_v43 = vpack.c.b16 %v992_v41, %v991_v37  ;;  %v4821_v11 = vpop.eup %4820 }
 0x25d   :  { %v805_v51 = vadd.f32 %v5513_v28, %v804_v14  ;;  %v509_v10 = vmul.f32 %v4821_v11, %v366_v4  ;;  %vm515_vm14 = vweird.f32 %v4821_v11 }
 0x25e   :  { %1531 = vrot.lane.b32.xlu1 %v5536_v43, %s5193_s23  ;;  %vm516_vm1 = vmor %vm514_vm15, %vm515_vm14 }
 0x25f   :  { %v837_v27 = vpack.c.bf16 %v805_v51, %v805_v51  ;;  %v510_v6 = vmul.f32 %v4821_v11, %v509_v10 }
 0x260   :  { %v930_v18 = vpop.f32.mrf.mxu3 }
 0x261   :  { %v1012_v8 = vunpack.c.l.b16 %v837_v27  ;;  %v511_v29 = vmul.f32 0.5, %v510_v6 }
 0x263   :  { %v5545_v57 = vpack.c.b16 %v1012_v8, %v1011_v56  ;;  %v512_v35 = vsub.f32 1.5, %v511_v29 }
 0x265   :  { %1539 = vrot.lane.b32.xlu0 %v5545_v57, %s5193_s23  ;;  %v513_v31 = vmul.f32 %v4821_v11, %v512_v35 }
 0x267   :  { %v517_v41 = vsel %vm516_vm1, %v4821_v11, %v513_v31 }
 0x268   :  { %v933_v30 = vpop.f32.mrf.mxu3  ;;  %v542_v27 = vmul.f32 %v517_v41, %v5461_v52 }
 0x26a   :  { %v559_v2 = vmul.f32 %v5399_v50, %v542_v27 }
 0x26c   :  { %v576_v52 = vadd.f32 %v5412_v62, %v559_v2 }
 0x26d   :  { %1527 = vrot.lane.b32.xlu0 %v5549_v44, %s5193_s23 }
 0x270   :  { %v935_v25 = vpop.f32.mrf.mxu3 }
 0x295   :  { %v335_v9 = vpop.xlane.xlu1 %334 }
 0x296   :  { %v351_v0 = vmul.f32 %v335_v9, %v5299_v33 }
 0x298   :  { %v367_v23 = vadd.f32 1e-05, %v351_v0 }
 0x29a   :  { %4822 = vrsqrt.f32 %v367_v23  ;;  %vm524_vm3 = vweird.f32 %v367_v23 }
 0x2a0   :  { %v4823_v54 = vpop.eup %4822 }
 0x2a1   :  { %v519_v32 = vmul.f32 %v4823_v54, %v367_v23  ;;  %vm525_vm2 = vweird.f32 %v4823_v54 }
 0x2a2   :  { %vm526_vm4 = vmor %vm524_vm3, %vm525_vm2 }
 0x2a3   :  { %v520_v37 = vmul.f32 %v4823_v54, %v519_v32 }
 0x2a5   :  { %v521_v14 = vmul.f32 0.5, %v520_v37 }
 0x2a7   :  { %v522_v51 = vsub.f32 1.5, %v521_v14  ;;  %v676_v61 = vpop.f32.mrf.mxu1 }
 0x2a8   :  { %v677_v46 = vadd.f32 %v5522_v63, %v676_v61  ;;  %v795_v61 = vadd.f32 %v5513_v28, %v5498_v48 }
 0x2a9   :  { %v523_v38 = vmul.f32 %v4823_v54, %v522_v51 }
 0x2aa   :  { %v707_v4 = vpack.c.bf16 %v677_v46, %v677_v46  ;;  %v793_v46 = vadd.f32 %v5513_v28, %v5490_v40 }
 0x2ab   :  { %v527_v56 = vsel %vm526_vm4, %v4823_v54, %v523_v38 }
 0x2ac   :  { %v543_v8 = vmul.f32 %v527_v56, %v5474_v39  ;;  %v5572_v39 = vld [vmem:[%s7150_s3 + $0x5] ss:$0 sm:$0xff]  ;;  %v832_v40 = vpack.c.bf16 %v793_v46, %v793_v46 }
 0x2ad   :  { %v807_v58 = vpop.f32.mrf.mxu2  ;;  %v936_v35 = vadd.f32 %v5572_v39, %v935_v25  ;;  %v934_v41 = vadd.f32 %v5572_v39, %v933_v30  ;;  %v931_v25 = vadd.f32 %v5572_v39, %v930_v18 }
 0x2ae   :  { %v938_v36 = vpop.f32.mrf.mxu3  ;;  %v560_v59 = vmul.f32 %v5399_v50, %v543_v8  ;;  %v808_v6 = vadd.f32 %v5513_v28, %v807_v58  ;;  %v993_v50 = vunpack.c.l.b16 %v707_v4  ;;  %v929_v58 = vadd.f32 %v5572_v39, %v5558_v5 }
 0x2af   :  { %v678_v45 = vpop.f32.mrf.mxu1  ;;  %v939_v23 = vadd.f32 %v5572_v39, %v938_v36  ;;  %v968_v56 = vpack.c.bf16 %v936_v35, %v936_v35  ;;  %v967_v36 = vpack.c.bf16 %v934_v41, %v934_v41  ;;  %v926_v4 = vadd.f32 %v5572_v39, %v5555_v21 }
 0x2b0   :  { %v679_v11 = vadd.f32 %v5522_v63, %v678_v45  ;;  %v577_v10 = vadd.f32 %v5412_v62, %v560_v59  ;;  %v838_v62 = vpack.c.bf16 %v808_v6, %v808_v6  ;;  %v833_v45 = vpack.c.bf16 %v795_v61, %v795_v61 }
 0x2b1   :  { %v969_v14 = vpack.c.bf16 %v939_v23, %v939_v23  ;;  %v1390_v18 = vunpack.c.l.b16 %v968_v56  ;;  %v965_v23 = vpack.c.bf16 %v929_v58, %v929_v58  ;;  %v669_v35 = vadd.f32 %v5522_v63, %v5507_v34 }
 0x2b2   :  { %v708_v9 = vpack.c.bf16 %v679_v11, %v679_v11  ;;  %v585_v0 = vpack.c.bf16 %v577_v10, %v576_v52  ;;  %v1013_v2 = vunpack.c.l.b16 %v838_v62  ;;  %v966_v52 = vpack.c.bf16 %v931_v25, %v931_v25 }
 0x2b3   :  { %v1391_v59 = vunpack.c.l.b16 %v969_v14  ;;  %v1008_v21 = vunpack.c.l.b16 %v833_v45  ;;  %v1007_v14 = vunpack.c.l.b16 %v832_v40  ;;  %v1387_v61 = vunpack.c.l.b16 %v965_v23 }
 0x2b4   :  { %v994_v29 = vunpack.c.l.b16 %v708_v9  ;;  %695 = vmatmul.bf16.gmra.mxu1 %v585_v0  ;;  %826 = vmatmul.bf16.gmra.mxu2 %v585_v0  ;;  %v1388_v62 = vunpack.c.l.b16 %v966_v52  ;;  %v1038_v58 = vsel %vm141_vm0, %v5545_v57, 0  ;;  %v1035_v57 = vsel %vm141_vm0, %v5527_v19, 0 }
 0x2b5   :  { %957 = vmatmul.bf16.gmra.mxu3 %v585_v0  ;;  %v809_v54 = vpop.f32.mrf.mxu2  ;;  %v924_v0 = vadd.f32 %v5572_v39, %v5553_v49  ;;  %v667_v49 = vadd.f32 %v5522_v63, %v5501_v3  ;;  %v1015_v25 = vpack.c.b16 %v1008_v21, %v1007_v14 }
 0x2b6   :  { %v810_v31 = vadd.f32 %v5513_v28, %v809_v54  ;;  %v940_v32 = vpop.f32.mrf.mxu3  ;;  %v5578_v37 = vpack.c.b16 %v994_v29, %v993_v50  ;;  %v1389_v50 = vunpack.c.l.b16 %v967_v36  ;;  %v964_v29 = vpack.c.bf16 %v926_v4, %v926_v4 }
 0x2b7   :  { %v941_v51 = vadd.f32 %v5572_v39, %v940_v32  ;;  %v681_v38 = vpop.f32.mrf.mxu1  ;;  %v1394_v46 = vpack.c.b16 %v1388_v62, %v1387_v61 }
 0x2b8   :  { %v839_v27 = vpack.c.bf16 %v810_v31, %v810_v31  ;;  %1533 = vrot.lane.b32.xlu1 %v5578_v37, %s5193_s23  ;;  %v682_v6 = vadd.f32 %v5522_v63, %v681_v38  ;;  %v5606_v41 = vpack.c.b16 %v1390_v18, %v1389_v50  ;;  %v704_v38 = vpack.c.bf16 %v669_v35, %v669_v35 }
 0x2b9   :  { %v970_v8 = vpack.c.bf16 %v941_v51, %v941_v51  ;;  %v963_v51 = vpack.c.bf16 %v924_v0, %v924_v0  ;;  %v1386_v56 = vunpack.c.l.b16 %v964_v29 }
 0x2ba   :  { %v1014_v30 = vunpack.c.l.b16 %v839_v27  ;;  %v709_v31 = vpack.c.bf16 %v682_v6, %v682_v6 }
 0x2bb   :  { %v1392_v48 = vunpack.c.l.b16 %v970_v8  ;;  %v1385_v36 = vunpack.c.l.b16 %v963_v51 }
 0x2bc   :  { %v1018_v11 = vpack.c.b16 %v1014_v30, %v1013_v2  ;;  %v1080_v34 = vunpack.c.l.b16 %v709_v31  ;;  %v703_v2 = vpack.c.bf16 %v667_v49, %v667_v49 }
 0x2bd   :  { %v5593_v10 = vpack.c.b16 %v1392_v48, %v1391_v59  ;;  %v5596_v9 = vpop.f32.mrf.mxu2  ;;  %v990_v59 = vunpack.c.l.b16 %v704_v38  ;;  %v1393_v48 = vpack.c.b16 %v1386_v56, %v1385_v36 }
 0x2be   :  { %1541 = vrot.lane.b32.xlu2 %v1018_v11, %s5193_s23  ;;  %v1041_v5 = vsel %vm141_vm0, %v1018_v11, 0  ;;  %v989_v45 = vunpack.c.l.b16 %v703_v2 }
 0x2bf   :  { %1417 = vmatpush.bf16.msra.mxu2 %v5593_v10  ;;  %1047 = vmatpush.bf16.xpose.msrb.mxu0 %v1041_v5  ;;  %v683_v54 = vpop.f32.mrf.mxu1  ;;  %v1032_v5 = vsel %vm141_vm0, %v1015_v25, 0 }
 0x2c0   :  { %v684_v32 = vadd.f32 %v5522_v63, %v683_v54  ;;  %v996_v11 = vpack.c.b16 %v990_v59, %v989_v45 }
 0x2c2   :  { %v710_v27 = vpack.c.bf16 %v684_v32, %v684_v32 }
 0x2c3   :  { %1418 = vmatpush.bf16.msra.mxu2 %v5606_v41 }
 0x2c4   :  { %v1081_v8 = vunpack.c.l.b16 %v710_v27 }
 0x2c5   :  { %v814_v30 = vpop.f32.mrf.mxu2 }
 0x2c6   :  { %1535 = vrot.lane.b32.xlu2 %v1015_v25, %s5193_s23  ;;  %v5614_v3 = vpack.c.b16 %v1081_v8, %v1080_v34  ;;  %v813_v8 = vadd.f32 %v5513_v28, %v5596_v9 }
 0x2c7   :  { %1419 = vmatpush.bf16.msra.mxu2 %v1394_v46  ;;  %1048 = vmatpush.bf16.xpose.msrb.mxu0 %v1038_v58  ;;  %v686_v4 = vpop.f32.mrf.mxu1 }
 0x2c8   :  { %1596 = vrot.lane.b32.xlu1 %v5614_v3, %s5193_s23  ;;  %v687_v19 = vadd.f32 %v5522_v63, %v686_v4 }
 0x2ca   :  { %v711_v32 = vpack.c.bf16 %v687_v19, %v687_v19 }
 0x2cb   :  { %1420 = vmatpush.bf16.msra.mxu2 %v1393_v48 }
 0x2cc   :  { %v1082_v49 = vunpack.c.l.b16 %v711_v32 }
 0x2cd   :  { %v817_v52 = vpop.f32.mrf.mxu2 }
 0x2ce   :  { %1529 = vrot.lane.b32.xlu2 %v996_v11, %s5193_s23  ;;  %v818_v18 = vadd.f32 %v5513_v28, %v817_v52 }
 0x2cf   :  { %1049 = vmatpush.bf16.xpose.msrb.mxu0 %v1035_v57  ;;  %v688_v6 = vpop.f32.mrf.mxu1 }
 0x2d0   :  { %1879 = vrot.lane.b32.xlu1 %v1394_v46, %s5193_s23  ;;  %v842_v0 = vpack.c.bf16 %v818_v18, %v818_v18  ;;  %v689_v50 = vadd.f32 %v5522_v63, %v688_v6 }
 0x2d2   :  { %v1102_v29 = vunpack.c.l.b16 %v842_v0  ;;  %v712_v54 = vpack.c.bf16 %v689_v50, %v689_v50 }
 0x2d4   :  { %v1083_v14 = vunpack.c.l.b16 %v712_v54 }
 0x2d5   :  { %v819_v40 = vpop.f32.mrf.mxu2 }
 0x2d6   :  { %v820_v23 = vadd.f32 %v5513_v28, %v819_v40  ;;  %v5635_v27 = vpack.c.b16 %v1083_v14, %v1082_v49 }
 0x2d7   :  { %1050 = vmatpush.bf16.xpose.msrb.mxu0 %v1032_v5  ;;  %v691_v61 = vpop.f32.mrf.mxu1  ;;  %v5658_v5 = vpop.f32.mrf.mxu3 }
 0x2d8   :  { %v843_v21 = vpack.c.bf16 %v820_v23, %v820_v23  ;;  %1877 = vrot.lane.b32.xlu1 %v1393_v48, %s5193_s23  ;;  %v840_v48 = vpack.c.bf16 %v813_v8, %v813_v8  ;;  %v692_v9 = vadd.f32 %v5522_v63, %v691_v61  ;;  %v1540_v19 = vpop.permute.xlu0 %1539 }
 0x2da   :  { %v1103_v35 = vunpack.c.l.b16 %v843_v21  ;;  %v1100_v4 = vunpack.c.l.b16 %v840_v48  ;;  %v713_v18 = vpack.c.bf16 %v692_v9, %v692_v9 }
 0x2dc   :  { %v5628_v62 = vpack.c.b16 %v1103_v35, %v1102_v29  ;;  %v1084_v6 = vunpack.c.l.b16 %v713_v18  ;;  %v1562_v29 = vsel %vm141_vm0, %v1540_v19, 0 }
 0x2dd   :  { %v822_v31 = vpop.f32.mrf.mxu2 }
 0x2de   :  { %4293 = vmatmul.msk.bf16.vlgmr.msrb.gmra.mxu0 %vm141_vm0, %v5549_v44  ;;  %1606 = vrot.lane.b32.xlu0 %v5628_v62, %s5193_s23  ;;  %v823_v51 = vadd.f32 %v5513_v28, %v822_v31  ;;  %v815_v44 = vadd.f32 %v5513_v28, %v814_v30 }
 0x2df   :  { %v693_v59 = vpop.f32.mrf.mxu1 }
 0x2e0   :  { %v844_v25 = vpack.c.bf16 %v823_v51, %v823_v51  ;;  %v841_v58 = vpack.c.bf16 %v815_v44, %v815_v44  ;;  %v694_v45 = vadd.f32 %v5522_v63, %v693_v59  ;;  %v1528_v51 = vpop.permute.xlu0 %1527 }
 0x2e2   :  { %v1104_v46 = vunpack.c.l.b16 %v844_v25  ;;  %v1101_v30 = vunpack.c.l.b16 %v841_v58  ;;  %v714_v52 = vpack.c.bf16 %v694_v45, %v694_v45 }
 0x2e4   :  { %v5652_v57 = vpack.c.b16 %v1101_v30, %v1100_v4 }
 0x2e5   :  { %v824_v38 = vpop.f32.mrf.mxu2 }
 0x2e6   :  { %v825_v56 = vadd.f32 %v5513_v28, %v824_v38  ;;  %1598 = vrot.lane.b32.xlu0 %v5635_v27, %s5193_s23 }
 0x2e8   :  { %v845_v34 = vpack.c.bf16 %v825_v56, %v825_v56 }
 0x2ea   :  { %v1105_v2 = vunpack.c.l.b16 %v845_v34 }
 0x2ec   :  { %v5643_v36 = vpack.c.b16 %v1105_v2, %v1104_v46 }
 0x2ee   :  { %4294 = vmatmul.msk.bf16.gmra.mxu0 %vm141_vm0, %v996_v11  ;;  %1608 = vrot.lane.b32.xlu2 %v5643_v36, %s5193_s23  ;;  %v1085_v11 = vunpack.c.l.b16 %v714_v52 }
 0x2ef   :  { %1883 = vrot.lane.b32.xlu0 %v5593_v10, %s5193_s23  ;;  %v945_v10 = vpop.f32.mrf.mxu3 }
 0x2f0   :  { %v5656_v40 = vpack.c.b16 %v1085_v11, %v1084_v6 }
 0x2f6   :  { %1604 = vrot.lane.b32.xlu2 %v5652_v57, %s5193_s23 }
 0x2f7   :  { %v948_v0 = vpop.f32.mrf.mxu3 }
 0x2fe   :  { %4295 = vmatmul.msk.bf16.gmra.mxu0 %vm141_vm0, %v5536_v43  ;;  %1600 = vrot.lane.b32.xlu2 %v5656_v40, %s5193_s23  ;;  %v1538_v43 = vpop.permute.xlu1 %1537 }
 0x2ff   :  { %v950_v21 = vpop.f32.mrf.mxu3  ;;  %v1559_v54 = vsel %vm141_vm0, %v1538_v43, 0 }
 0x300   :  { %v951_v6 = vadd.f32 %v5572_v39, %v950_v21 }
 0x306   :  { %1881 = vrot.lane.b32.xlu2 %v5606_v41, %s5193_s23 }
 0x307   :  { %v953_v35 = vpop.f32.mrf.mxu3 }
 0x308   :  { %v954_v9 = vadd.f32 %v5572_v39, %v953_v35 }
 0x30a   :  { %v975_v43 = vpack.c.bf16 %v954_v9, %v954_v9 }
 0x30e   :  { %4296 = vmatmul.msk.bf16.gmra.mxu0 %vm141_vm0, %v5578_v37 }
 0x30f   :  { %v955_v31 = vpop.f32.mrf.mxu3 }
 0x310   :  { %v956_v58 = vadd.f32 %v5572_v39, %v955_v31  ;;  %v946_v31 = vadd.f32 %v5572_v39, %v945_v10 }
 0x312   :  { %v972_v10 = vpack.c.bf16 %v946_v31, %v946_v31 }
 0x318   :  { %v1542_v23 = vpop.permute.xlu2 %1541 }
 0x319   :  { %v1565_v50 = vsel %vm141_vm0, %v1542_v23, 0  ;;  %v976_v23 = vpack.c.bf16 %v956_v58, %v956_v58 }
 0x31a   :  { %1571 = vmatpush.bf16.xpose.msra.mxu0 %v1565_v50 }
 0x320   :  { %v1536_v41 = vpop.permute.xlu2 %1535 }
 0x321   :  { %v1556_v32 = vsel %vm141_vm0, %v1536_v41, 0 }
 0x322   :  { %1572 = vmatpush.bf16.xpose.msra.mxu0 %v1562_v29 }
 0x328   :  { %v1530_v52 = vpop.permute.xlu2 %1529 }
 0x32a   :  { %1573 = vmatpush.bf16.xpose.msra.mxu0 %v1559_v54 }
 0x331   :  { %v696_v37 = vpop.f32.mrf.mxu1 }
 0x332   :  { %1574 = vmatpush.bf16.xpose.msra.mxu0 %v1556_v32  ;;  %v697_v14 = vadd.f32 %v5522_v63, %v696_v37  ;;  %v974_v32 = vpack.c.bf16 %v951_v6, %v951_v6  ;;  %v1475_v37 = vunpack.c.l.b16 %v976_v23 }
 0x334   :  { %v715_v25 = vpack.c.bf16 %v697_v14, %v697_v14 }
 0x336   :  { %v1086_v46 = vunpack.c.l.b16 %v715_v25  ;;  %v1473_v25 = vunpack.c.l.b16 %v974_v32 }
 0x337   :  { %v827_v49 = vpop.f32.mrf.mxu2 }
 0x338   :  { %v958_v61 = vpop.f32.mrf.mxu3  ;;  %v828_v44 = vadd.f32 %v5513_v28, %v827_v49  ;;  %v1532_v49 = vpop.permute.xlu1 %1531 }
 0x339   :  { %v698_v38 = vpop.f32.mrf.mxu1  ;;  %4309 = vmatmul.msk.bf16.vlgmr.msra.gmra.mxu0 %vm141_vm0, %v1528_v51  ;;  %v959_v8 = vadd.f32 %v5572_v39, %v958_v61  ;;  %v944_v51 = vadd.f32 %v5572_v39, %v5658_v5  ;;  %v1131_v5 = vsel %vm141_vm0, %v5643_v36, 0 }
 0x33a   :  { %v699_v56 = vadd.f32 %v5522_v63, %v698_v38  ;;  %v846_v48 = vpack.c.bf16 %v828_v44, %v828_v44 }
 0x33b   :  { %v977_v63 = vpack.c.bf16 %v959_v8, %v959_v8  ;;  %v971_v44 = vpack.c.bf16 %v944_v51, %v944_v51  ;;  %v1471_v8 = vunpack.c.l.b16 %v972_v10 }
 0x33c   :  { %v716_v34 = vpack.c.bf16 %v699_v56, %v699_v56  ;;  %v1106_v19 = vunpack.c.l.b16 %v846_v48 }
 0x33d   :  { %v1476_v54 = vunpack.c.l.b16 %v977_v63 }
 0x33e   :  { %v1087_v2 = vunpack.c.l.b16 %v716_v34 }
 0x33f   :  { %v829_v59 = vpop.f32.mrf.mxu2 }
 0x340   :  { %v830_v30 = vadd.f32 %v5513_v28, %v829_v59  ;;  %v960_v45 = vpop.f32.mrf.mxu3  ;;  %v5679_v4 = vpack.c.b16 %v1087_v2, %v1086_v46  ;;  %v949_v28 = vadd.f32 %v5572_v39, %v948_v0  ;;  %v1474_v0 = vunpack.c.l.b16 %v975_v43 }
 0x341   :  { %v961_v18 = vadd.f32 %v5572_v39, %v960_v45  ;;  %v1534_v39 = vpop.permute.xlu1 %1533  ;;  %v1470_v2 = vunpack.c.l.b16 %v971_v44 }
 0x342   :  { %v847_v11 = vpack.c.bf16 %v830_v30, %v830_v30  ;;  %1602 = vrot.lane.b32.xlu2 %v5679_v4, %s5193_s23  ;;  %v973_v61 = vpack.c.bf16 %v949_v28, %v949_v28  ;;  %v5698_v56 = vpack.c.b16 %v1475_v37, %v1474_v0  ;;  %v1128_v30 = vsel %vm141_vm0, %v5628_v62, 0 }
 0x343   :  { %v978_v50 = vpack.c.bf16 %v961_v18, %v961_v18  ;;  %v5708_v48 = vpack.c.b16 %v1471_v8, %v1470_v2  ;;  %v1125_v18 = vsel %vm141_vm0, %v5652_v57, 0 }
 0x344   :  { %v1107_v29 = vunpack.c.l.b16 %v847_v11  ;;  %v1472_v34 = vunpack.c.l.b16 %v973_v61 }
 0x345   :  { %v1477_v41 = vunpack.c.l.b16 %v978_v50 }
 0x346   :  { %v1111_v35 = vpack.c.b16 %v1107_v29, %v1106_v19  ;;  %v5701_v46 = vpack.c.b16 %v1473_v25, %v1472_v34 }
 0x347   :  { %v5688_v14 = vpack.c.b16 %v1477_v41, %v1476_v54 }
 0x348   :  { %1610 = vrot.lane.b32.xlu0 %v1111_v35, %s5193_s23  ;;  %v1134_v21 = vsel %vm141_vm0, %v1111_v35, 0  ;;  %v5694_v38 = vpop.permute.xlu2 %1608 }
 0x349   :  { %1502 = vmatpush.bf16.msra.mxu3 %v5688_v14  ;;  %1140 = vmatpush.bf16.xpose.msrb.mxu1 %v1134_v21  ;;  %v1597_v45 = vpop.permute.xlu1 %1596  ;;  %v1631_v0 = vsel %vm141_vm0, %v5694_v38, 0 }
 0x34a   :  { %4310 = vmatmul.msk.bf16.gmra.mxu0 %vm141_vm0, %v1530_v52 }
 0x34d   :  { %1503 = vmatpush.bf16.msra.mxu3 %v5698_v56 }
 0x350   :  { %v5705_v58 = vpop.permute.xlu2 %1604  ;;  %v1607_v59 = vpop.permute.xlu0 %1606 }
 0x351   :  { %1504 = vmatpush.bf16.msra.mxu3 %v5701_v46  ;;  %1141 = vmatpush.bf16.xpose.msrb.mxu1 %v1131_v5  ;;  %v1880_v62 = vpop.permute.xlu1 %1879  ;;  %v1628_v25 = vsel %vm141_vm0, %v1607_v59, 0  ;;  %v1625_v44 = vsel %vm141_vm0, %v5705_v58, 0 }
 0x355   :  { %1505 = vmatpush.bf16.msra.mxu3 %v5708_v48 }
 0x358   :  { %v5713_v9 = vpop.permute.xlu0 %1598  ;;  %v5716_v36 = vpop.permute.xlu2 %1600 }
 0x359   :  { %1142 = vmatpush.bf16.xpose.msrb.mxu1 %v1128_v30  ;;  %v1878_v29 = vpop.permute.xlu1 %1877 }
 0x35a   :  { %4311 = vmatmul.msk.bf16.gmra.mxu0 %vm141_vm0, %v1532_v49 }
 0x35b   :  { %v5718_v52 = vpop.f32.mrf.mxu0 }
 0x35c   :  { %v1165_v63 = vsel %vm141_vm0, %v5718_v52, -inf }
 0x35d   :  { %1166 = vmax.xlane.f32.xlu1 %v1165_v63 }
 0x360   :  { %v1882_v23 = vpop.permute.xlu2 %1881 }
 0x361   :  { %v1884_v11 = vpop.permute.xlu0 %1883  ;;  %1143 = vmatpush.bf16.xpose.msrb.mxu1 %v1125_v18 }
 0x362   :  { %1905 = vmatpush.bf16.msrb.mxu2 %v1884_v11 }
 0x363   :  { %v1054_v6 = vpop.f32.mrf.mxu0 }
 0x364   :  { %v1168_v57 = vsel %vm141_vm0, %v1054_v6, -inf }
 0x366   :  { %1906 = vmatpush.bf16.msrb.mxu2 %v1882_v23 }
 0x368   :  { %4297 = vmatmul.msk.bf16.vlgmr.msrb.gmra.mxu1 %vm141_vm0, %v5614_v3 }
 0x36a   :  { %4312 = vmatmul.msk.bf16.gmra.mxu0 %vm141_vm0, %v1534_v39  ;;  %1907 = vmatpush.bf16.msrb.mxu2 %v1880_v62 }
 0x36b   :  { %v5727_v50 = vpop.f32.mrf.mxu0 }
 0x36c   :  { %v1171_v19 = vsel %vm141_vm0, %v5727_v50, -inf }
 0x36d   :  { %1172 = vmax.xlane.f32.xlu2 %v1171_v19 }
 0x36e   :  { %1908 = vmatpush.bf16.msrb.mxu2 %v1878_v29 }
 0x372   :  { %1169 = vmax.xlane.f32.xlu0 %v1168_v57 }
 0x373   :  { %v1059_v28 = vpop.f32.mrf.mxu0 }
 0x374   :  { %v1174_v43 = vsel %vm141_vm0, %v1059_v28, -inf }
 0x375   :  { %1175 = vmax.xlane.f32.xlu1 %v1174_v43 }
 0x378   :  { %4298 = vmatmul.msk.bf16.gmra.mxu1 %vm141_vm0, %v5635_v27 }
 0x37b   :  { %v5735_v3 = vpop.f32.mrf.mxu0 }
 0x37c   :  { %v1177_v54 = vsel %vm141_vm0, %v5735_v3, -inf }
 0x37d   :  { %1178 = vmax.xlane.f32.xlu0 %v1177_v54 }
 0x383   :  { %v5739_v41 = vpop.f32.mrf.mxu0 }
 0x384   :  { %v1180_v35 = vsel %vm141_vm0, %v5739_v41, -inf }
 0x385   :  { %1181 = vmax.xlane.f32.xlu1 %v1180_v35 }
 0x388   :  { %4299 = vmatmul.msk.bf16.gmra.mxu1 %vm141_vm0, %v5656_v40 }
 0x38b   :  { %v5745_v31 = vpop.f32.mrf.mxu0 }
 0x38c   :  { %v1183_v27 = vsel %vm141_vm0, %v5745_v31, -inf }
 0x38d   :  { %1184 = vmax.xlane.f32.xlu0 %v1183_v27 }
 0x393   :  { %v5749_v32 = vpop.f32.mrf.mxu0 }
 0x394   :  { %v1186_v37 = vsel %vm141_vm0, %v5749_v32, -inf }
 0x395   :  { %1187 = vmax.xlane.f32.xlu2 %v1186_v37 }
 0x398   :  { %4300 = vmatmul.msk.bf16.gmra.mxu1 %vm141_vm0, %v5679_v4 }
 0x3b6   :  { %v5755_v49 = vpop.f32.mrf.mxu0 }
 0x3b7   :  { %v1665_v40 = vsel %vm141_vm0, %v5755_v49, -inf }
 0x3b8   :  { %1666 = vmax.xlane.f32.xlu0 %v1665_v40 }
 0x3ba   :  { %v1611_v21 = vpop.permute.xlu0 %1610 }
 0x3bb   :  { %v1634_v51 = vsel %vm141_vm0, %v1611_v21, 0 }
 0x3bc   :  { %1640 = vmatpush.bf16.xpose.msra.mxu1 %v1634_v51 }
 0x3be   :  { %v5760_v61 = vpop.f32.mrf.mxu0 }
 0x3c4   :  { %1641 = vmatpush.bf16.xpose.msra.mxu1 %v1631_v0  ;;  %v1603_v0 = vpop.permute.xlu2 %1602 }
 0x3c7   :  { %v5764_v10 = vpop.f32.mrf.mxu0 }
 0x3c8   :  { %v1671_v4 = vsel %vm141_vm0, %v5764_v10, -inf }
 0x3c9   :  { %1672 = vmax.xlane.f32.xlu0 %v1671_v4 }
 0x3cc   :  { %1642 = vmatpush.bf16.xpose.msra.mxu1 %v1628_v25 }
 0x3cf   :  { %v5776_v2 = vpop.f32.mrf.mxu0 }
 0x3d0   :  { %v1167_v34 = vpop.xlane.xlu1 %1166 }
 0x3d4   :  { %1643 = vmatpush.bf16.xpose.msra.mxu1 %v1625_v44 }
 0x3d7   :  { %v5788_v62 = vpop.f32.mrf.mxu0 }
 0x3d8   :  { %v1677_v19 = vsel %vm141_vm0, %v5788_v62, -inf }
 0x3db   :  { %4313 = vmatmul.msk.bf16.vlgmr.msra.gmra.mxu1 %vm141_vm0, %v1597_v45 }
 0x3df   :  { %v5798_v29 = vpop.f32.mrf.mxu0 }
 0x3e5   :  { %v5772_v8 = vpop.f32.mrf.mxu1  ;;  %v1170_v38 = vpop.xlane.xlu0 %1169 }
 0x3e6   :  { %v1214_v39 = vsub.f32 %v1054_v6, %v1170_v38  ;;  %v1189_v5 = vsel %vm141_vm0, %v5772_v8, -inf  ;;  %v1213_v38 = vsub.f32 %v5718_v52, %v1167_v34 }
 0x3e7   :  { %1190 = vmax.xlane.f32.xlu2 %v1189_v5 }
 0x3e8   :  { %v1231_v30 = vmul.f32 1.442695, %v1214_v39  ;;  %v1176_v58 = vpop.xlane.xlu1 %1175 }
 0x3e9   :  { %v1216_v18 = vsub.f32 %v1059_v28, %v1176_v58  ;;  %v1173_v58 = vpop.xlane.xlu2 %1172 }
 0x3ea   :  { %4824 = vpow2.f32 %v1231_v30  ;;  %v1229_v30 = vmul.f32 1.442695, %v1213_v38 }
 0x3eb   :  { %4314 = vmatmul.msk.bf16.gmra.mxu1 %vm141_vm0, %v5713_v9  ;;  %v1235_v6 = vmul.f32 1.442695, %v1216_v18 }
 0x3ed   :  { %v5780_v59 = vpop.f32.mrf.mxu1  ;;  %4826 = vpow2.f32 %v1235_v6  ;;  %v1668_v6 = vsel %vm141_vm0, %v5760_v61, -inf }
 0x3ee   :  { %v1192_v45 = vsel %vm141_vm0, %v5780_v59, -inf }
 0x3ef   :  { %1193 = vmax.xlane.f32.xlu1 %v1192_v45  ;;  %v1215_v45 = vsub.f32 %v5727_v50, %v1173_v58 }
 0x3f0   :  { %v5784_v63 = vpop.eup %4824  ;;  %v1179_v34 = vpop.xlane.xlu0 %1178 }
 0x3f1   :  { %v1264_v11 = vsel %vm141_vm0, %v5784_v63, 0.0  ;;  %v1233_v52 = vmul.f32 1.442695, %v1215_v45 }
 0x3f2   :  { %1265 = vadd.xlane.f32.xlu0 %v1264_v11 }
 0x3f3   :  { %v5802_v43 = vpop.eup %4826 }
 0x3f4   :  { %v1270_v27 = vsel %vm141_vm0, %v5802_v43, 0.0 }
 0x3f5   :  { %v5790_v23 = vpop.f32.mrf.mxu1 }
 0x3f6   :  { %v1195_v9 = vsel %vm141_vm0, %v5790_v23, -inf }
 0x3f7   :  { %1196 = vmax.xlane.f32.xlu2 %v1195_v9 }
 0x3f8   :  { %v1182_v57 = vpop.xlane.xlu1 %1181 }
 0x3f9   :  { %v1218_v35 = vsub.f32 %v5739_v41, %v1182_v57  ;;  %v1674_v57 = vsel %vm141_vm0, %v5776_v2, -inf }
 0x3fa   :  { %1678 = vmax.xlane.f32.xlu0 %v1677_v19  ;;  %v1217_v19 = vsub.f32 %v5735_v3, %v1179_v34  ;;  %v1680_v3 = vsel %vm141_vm0, %v5798_v29, -inf }
 0x3fb   :  { %4315 = vmatmul.msk.bf16.gmra.mxu1 %vm141_vm0, %v5716_v36  ;;  %v1239_v37 = vmul.f32 1.442695, %v1218_v35  ;;  %v5811_v36 = vpop.f32.mrf.mxu0 }
 0x3fc   :  { %v1683_v51 = vsel %vm141_vm0, %v5811_v36, -inf }
 0x3fd   :  { %v5800_v28 = vpop.f32.mrf.mxu1  ;;  %4828 = vpow2.f32 %v1239_v37 }
 0x3fe   :  { %v1198_v54 = vsel %vm141_vm0, %v5800_v28, -inf  ;;  %4830 = vpow2.f32 %v1229_v30 }
 0x3ff   :  { %1199 = vmax.xlane.f32.xlu1 %v1198_v54  ;;  %4832 = vpow2.f32 %v1233_v52  ;;  %v1237_v54 = vmul.f32 1.442695, %v1217_v19 }
 0x400   :  { %v1185_v35 = vpop.xlane.xlu0 %1184 }
 0x401   :  { %4834 = vpow2.f32 %v1237_v54  ;;  %v1219_v37 = vsub.f32 %v5745_v31, %v1185_v35 }
 0x402   :  { %1271 = vadd.xlane.f32.xlu0 %v1270_v27 }
 0x403   :  { %v5820_v4 = vpop.eup %4828 }
 0x404   :  { %v1276_v44 = vsel %vm141_vm0, %v5820_v4, 0.0  ;;  %v5838_v9 = vpop.eup %4830 }
 0x405   :  { %v5809_v40 = vpop.f32.mrf.mxu1  ;;  %v1261_v50 = vsel %vm141_vm0, %v5838_v9, 0.0  ;;  %v5845_v27 = vpop.eup %4832 }
 0x406   :  { %v1201_v21 = vsel %vm141_vm0, %v5809_v40, -inf }
 0x407   :  { %1202 = vmax.xlane.f32.xlu2 %v1201_v21  ;;  %v1267_v21 = vsel %vm141_vm0, %v5845_v27, 0.0 }
 0x408   :  { %v1188_v30 = vpop.xlane.xlu2 %1187 }
 0x409   :  { %v1220_v58 = vsub.f32 %v5749_v32, %v1188_v30 }
 0x40a   :  { %1684 = vmax.xlane.f32.xlu0 %v1683_v51  ;;  %v1241_v51 = vmul.f32 1.442695, %v1219_v37 }
 0x40b   :  { %4316 = vmatmul.msk.bf16.gmra.mxu1 %vm141_vm0, %v1603_v0  ;;  %v5852_v0 = vpop.eup %4834  ;;  %v1243_v45 = vmul.f32 1.442695, %v1220_v58 }
 0x40c   :  { %4836 = vpow2.f32 %v1241_v51  ;;  %v1273_v31 = vsel %vm141_vm0, %v5852_v0, 0.0 }
 0x40d   :  { %v5818_v41 = vpop.f32.mrf.mxu1  ;;  %4838 = vpow2.f32 %v1243_v45 }
 0x40e   :  { %v1204_v25 = vsel %vm141_vm0, %v5818_v41, -inf }
 0x40f   :  { %1205 = vmax.xlane.f32.xlu1 %v1204_v25  ;;  %v5854_v25 = vpop.f32.mrf.mxu0 }
 0x412   :  { %1277 = vadd.xlane.f32.xlu0 %v1276_v44  ;;  %v1686_v44 = vsel %vm141_vm0, %v5854_v25, -inf  ;;  %v5860_v38 = vpop.eup %4836 }
 0x415   :  { %v5827_v39 = vpop.f32.mrf.mxu1 }
 0x416   :  { %v1207_v5 = vsel %vm141_vm0, %v5827_v39, -inf }
 0x417   :  { %1208 = vmax.xlane.f32.xlu2 %v1207_v5  ;;  %v1279_v5 = vsel %vm141_vm0, %v5860_v38, 0.0 }
 0x41d   :  { %v5832_v18 = vpop.f32.mrf.mxu1 }
 0x41e   :  { %v1210_v11 = vsel %vm141_vm0, %v5832_v18, -inf }
 0x41f   :  { %1211 = vmax.xlane.f32.xlu1 %v1210_v11  ;;  %1669 = vmax.xlane.f32.xlu2 %v1668_v6 }
 0x427   :  { %1262 = vadd.xlane.f32.xlu1 %v1261_v50  ;;  %1675 = vmax.xlane.f32.xlu2 %v1674_v57  ;;  %v5870_v50 = vpop.eup %4838 }
 0x428   :  { %v1282_v54 = vsel %vm141_vm0, %v5870_v50, 0.0 }
 0x42f   :  { %1268 = vadd.xlane.f32.xlu1 %v1267_v21  ;;  %1681 = vmax.xlane.f32.xlu2 %v1680_v3 }
 0x437   :  { %1687 = vmax.xlane.f32.xlu2 %v1686_v44  ;;  %1274 = vadd.xlane.f32.xlu1 %v1273_v31 }
 0x43f   :  { %1280 = vadd.xlane.f32.xlu1 %v1279_v5 }
 0x458   :  { %v5865_v11 = vpop.f32.mrf.mxu1 }
 0x459   :  { %v1689_v6 = vsel %vm141_vm0, %v5865_v11, -inf }
 0x45a   :  { %v1191_v52 = vpop.xlane.xlu2 %1190  ;;  %1690 = vmax.xlane.f32.xlu0 %v1689_v6 }
 0x45b   :  { %v1221_v34 = vsub.f32 %v5772_v8, %v1191_v52 }
 0x45d   :  { %v1245_v19 = vmul.f32 1.442695, %v1221_v34 }
 0x45f   :  { %4840 = vpow2.f32 %v1245_v19 }
 0x460   :  { %v5872_v57 = vpop.f32.mrf.mxu1 }
 0x461   :  { %v1692_v32 = vsel %vm141_vm0, %v5872_v57, -inf }
 0x462   :  { %v1194_v35 = vpop.xlane.xlu1 %1193  ;;  %1693 = vmax.xlane.f32.xlu2 %v1692_v32  ;;  %1283 = vadd.xlane.f32.xlu0 %v1282_v54 }
 0x463   :  { %v1222_v37 = vsub.f32 %v5780_v59, %v1194_v35 }
 0x465   :  { %v5879_v21 = vpop.eup %4840  ;;  %v1247_v8 = vmul.f32 1.442695, %v1222_v37  ;;  %v1667_v37 = vpop.xlane.xlu0 %1666 }
 0x466   :  { %v1285_v3 = vsel %vm141_vm0, %v5879_v21, 0.0 }
 0x467   :  { %4842 = vpow2.f32 %v1247_v8  ;;  %1286 = vadd.xlane.f32.xlu1 %v1285_v3 }
 0x468   :  { %v5883_v51 = vpop.f32.mrf.mxu1 }
 0x469   :  { %v1695_v44 = vsel %vm141_vm0, %v5883_v51, -inf }
 0x46a   :  { %v1197_v31 = vpop.xlane.xlu2 %1196  ;;  %1696 = vmax.xlane.f32.xlu2 %v1695_v44 }
 0x46b   :  { %v1223_v5 = vsub.f32 %v5790_v23, %v1197_v31 }
 0x46d   :  { %v5888_v30 = vpop.eup %4842  ;;  %v1249_v59 = vmul.f32 1.442695, %v1223_v5 }
 0x46e   :  { %v1288_v58 = vsel %vm141_vm0, %v5888_v30, 0.0 }
 0x46f   :  { %4844 = vpow2.f32 %v1249_v59  ;;  %1289 = vadd.xlane.f32.xlu0 %v1288_v58  ;;  %v1673_v59 = vpop.xlane.xlu0 %1672 }
 0x470   :  { %v5892_v45 = vpop.f32.mrf.mxu1 }
 0x471   :  { %v1698_v32 = vsel %vm141_vm0, %v5892_v45, -inf }
 0x472   :  { %v1200_v6 = vpop.xlane.xlu1 %1199 }
 0x473   :  { %v1224_v52 = vsub.f32 %v5800_v28, %v1200_v6 }
 0x475   :  { %v5895_v34 = vpop.eup %4844  ;;  %v1251_v19 = vmul.f32 1.442695, %v1224_v52 }
 0x476   :  { %v1291_v23 = vsel %vm141_vm0, %v5895_v34, 0.0 }
 0x477   :  { %4846 = vpow2.f32 %v1251_v19  ;;  %1699 = vmax.xlane.f32.xlu0 %v1698_v32  ;;  %1292 = vadd.xlane.f32.xlu1 %v1291_v23  ;;  %v1713_v19 = vsub.f32 %v5755_v49, %v1667_v37 }
 0x478   :  { %v5901_v54 = vpop.f32.mrf.mxu1 }
 0x479   :  { %v1701_v35 = vsel %vm141_vm0, %v5901_v54, -inf }
 0x47a   :  { %v1203_v8 = vpop.xlane.xlu2 %1202  ;;  %1702 = vmax.xlane.f32.xlu2 %v1701_v35 }
 0x47b   :  { %v1225_v28 = vsub.f32 %v5809_v40, %v1203_v8  ;;  %v1729_v8 = vmul.f32 1.442695, %v1713_v19 }
 0x47d   :  { %v5906_v3 = vpop.eup %4846  ;;  %v1253_v44 = vmul.f32 1.442695, %v1225_v28  ;;  %v1266_v28 = vpop.xlane.xlu0 %1265 }
 0x47e   :  { %v1294_v31 = vsel %vm141_vm0, %v5906_v3, 0.0 }
 0x47f   :  { %4848 = vpow2.f32 %v1253_v44  ;;  %1295 = vadd.xlane.f32.xlu0 %v1294_v31 }
 0x480   :  { %v5910_v5 = vpop.f32.mrf.mxu1 }
 0x481   :  { %v1704_v40 = vsel %vm141_vm0, %v5910_v5, -inf }
 0x482   :  { %v1206_v58 = vpop.xlane.xlu1 %1205 }
 0x483   :  { %v1226_v6 = vsub.f32 %v5818_v41, %v1206_v58 }
 0x485   :  { %v5913_v52 = vpop.eup %4848  ;;  %v1255_v32 = vmul.f32 1.442695, %v1226_v6 }
 0x486   :  { %v1297_v23 = vsel %vm141_vm0, %v5913_v52, 0.0 }
 0x487   :  { %4850 = vpow2.f32 %v1255_v32  ;;  %1705 = vmax.xlane.f32.xlu0 %v1704_v40  ;;  %1298 = vadd.xlane.f32.xlu1 %v1297_v23 }
 0x488   :  { %v5920_v35 = vpop.f32.mrf.mxu1  ;;  %4852 = vpow2.f32 %v1729_v8  ;;  %v5935_v8 = vpop.xlane.xlu0 %1678 }
 0x48a   :  { %v1209_v44 = vpop.xlane.xlu2 %1208 }
 0x48b   :  { %v1227_v41 = vsub.f32 %v5827_v39, %v1209_v44 }
 0x48d   :  { %v5923_v31 = vpop.eup %4850  ;;  %v1257_v49 = vmul.f32 1.442695, %v1227_v41  ;;  %v1715_v41 = vsub.f32 %v5764_v10, %v1673_v59 }
 0x48e   :  { %v1300_v37 = vsel %vm141_vm0, %v5923_v31, 0.0  ;;  %v5931_v40 = vpop.eup %4852 }
 0x48f   :  { %4854 = vpow2.f32 %v1257_v49  ;;  %1301 = vadd.xlane.f32.xlu2 %v1300_v37 }
 0x490   :  { %v5927_v58 = vpop.f32.mrf.mxu1  ;;  %4856 = vrcp.f32 %v1266_v28 }
 0x491   :  { %v1710_v6 = vsel %vm141_vm0, %v5927_v58, -inf }
 0x492   :  { %v1212_v32 = vpop.xlane.xlu1 %1211  ;;  %v1670_v19 = vpop.xlane.xlu2 %1669  ;;  %1711 = vmax.xlane.f32.xlu0 %v1710_v6  ;;  %v1761_v6 = vsel %vm141_vm0, %v5931_v40, 0.0 }
 0x493   :  { %v1228_v39 = vsub.f32 %v5832_v18, %v1212_v32  ;;  %v1714_v23 = vsub.f32 %v5760_v61, %v1670_v19  ;;  %v1733_v61 = vmul.f32 1.442695, %v1715_v41 }
 0x495   :  { %v5937_v44 = vpop.eup %4854  ;;  %v1259_v49 = vmul.f32 1.442695, %v1228_v39  ;;  %v1731_v37 = vmul.f32 1.442695, %v1714_v23  ;;  %v1272_v39 = vpop.xlane.xlu0 %1271 }
 0x496   :  { %v1303_v53 = vsel %vm141_vm0, %v5937_v44, 0.0  ;;  %v4857_v19 = vpop.eup %4856 }
 0x497   :  { %4858 = vpow2.f32 %v1259_v49  ;;  %1304 = vadd.xlane.f32.xlu1 %v1303_v53  ;;  %1762 = vadd.xlane.f32.xlu2 %v1761_v6  ;;  %v1326_v28 = vmul.f32 %v4857_v19, %v5784_v63 }
 0x498   :  { %4860 = vpow2.f32 %v1731_v37 }
 0x499   :  { %v1342_v49 = vpack.c.bf16 %v1326_v28, %v1326_v28 }
 0x49a   :  { %v1263_v18 = vpop.xlane.xlu1 %1262  ;;  %v5944_v32 = vpop.xlane.xlu2 %1675 }
 0x49b   :  { %4862 = vrcp.f32 %v1263_v18  ;;  %v1366_v13 = vunpack.c.l.b16 %v1342_v49 }
 0x49c   :  { %4864 = vpow2.f32 %v1733_v61 }
 0x49d   :  { %v5946_v10 = vpop.eup %4858 }
 0x49e   :  { %v5948_v59 = vpop.eup %4860  ;;  %v1306_v23 = vsel %vm141_vm0, %v5946_v10, 0.0 }
 0x49f   :  { %v1764_v53 = vsel %vm141_vm0, %v5948_v59, 0.0  ;;  %1307 = vadd.xlane.f32.xlu2 %v1306_v23 }
 0x4a0   :  { %1765 = vadd.xlane.f32.xlu1 %v1764_v53 }
 0x4a1   :  { %v4863_v41 = vpop.eup %4862 }
 0x4a2   :  { %v1325_v37 = vmul.f32 %v4863_v41, %v5838_v9  ;;  %v1269_v6 = vpop.xlane.xlu1 %1268  ;;  %v1682_v18 = vpop.xlane.xlu2 %1681 }
 0x4a3   :  { %v5956_v61 = vpop.eup %4864  ;;  %4866 = vrcp.f32 %v1269_v6  ;;  %v1718_v63 = vsub.f32 %v5798_v29, %v1682_v18  ;;  %v1685_v9 = vpop.xlane.xlu0 %1684 }
 0x4a4   :  { %v1341_v19 = vpack.c.bf16 %v1325_v37, %v1325_v37  ;;  %4868 = vrcp.f32 %v1272_v39  ;;  %v1767_v28 = vsel %vm141_vm0, %v5956_v61, 0.0 }
 0x4a5   :  { %v1739_v16 = vmul.f32 1.442695, %v1718_v63 }
 0x4a6   :  { %v1365_v7 = vunpack.c.l.b16 %v1341_v19  ;;  %1956 = vrot.lane.b32.xlu0 %v5688_v14, %s5193_s23 }
 0x4a7   :  { %4870 = vpow2.f32 %v1739_v16  ;;  %1768 = vadd.xlane.f32.xlu2 %v1767_v28  ;;  %v1707_v16 = vsel %vm141_vm0, %v5920_v35, -inf }
 0x4a8   :  { %v1373_v23 = vpack.c.b16 %v1366_v13, %v1365_v7 }
 0x4a9   :  { %v4867_v53 = vpop.eup %4866 }
 0x4aa   :  { %v1688_v41 = vpop.xlane.xlu2 %1687  ;;  %4301 = vmatmul.msk.bf16.vlgmr.msra.gmra.mxu2 %vm141_vm0, %v1373_v23  ;;  %v4869_v29 = vpop.eup %4868  ;;  %v1327_v49 = vmul.f32 %v4867_v53, %v5845_v27 }
 0x4ab   :  { %v1720_v39 = vsub.f32 %v5854_v25, %v1688_v41  ;;  %v1328_v7 = vmul.f32 %v4869_v29, %v5802_v43  ;;  %v1275_v13 = vpop.xlane.xlu1 %1274  ;;  %v1278_v63 = vpop.xlane.xlu0 %1277 }
 0x4ac   :  { %v1343_v18 = vpack.c.bf16 %v1327_v49, %v1327_v49  ;;  %v1716_v49 = vsub.f32 %v5776_v2, %v5944_v32 }
 0x4ad   :  { %v5966_v37 = vpop.eup %4870  ;;  %v1743_v6 = vmul.f32 1.442695, %v1720_v39  ;;  %v1344_v25 = vpack.c.bf16 %v1328_v7, %v1328_v7 }
 0x4ae   :  { %v1776_v14 = vsel %vm141_vm0, %v5966_v37, 0.0  ;;  %v1367_v27 = vunpack.c.l.b16 %v1343_v18 }
 0x4af   :  { %4872 = vpow2.f32 %v1743_v6  ;;  %1777 = vadd.xlane.f32.xlu1 %v1776_v14  ;;  %1708 = vmax.xlane.f32.xlu2 %v1707_v16  ;;  %v1368_v23 = vunpack.c.l.b16 %v1344_v25  ;;  %v1735_v16 = vmul.f32 1.442695, %v1716_v49 }
 0x4b0   :  { %4874 = vrcp.f32 %v1275_v13  ;;  %v1717_v13 = vsub.f32 %v5788_v62, %v5935_v8 }
 0x4b1   :  { %4876 = vrcp.f32 %v1278_v63  ;;  %v1374_v53 = vpack.c.b16 %v1368_v23, %v1367_v27 }
 0x4b2   :  { %4878 = vpow2.f32 %v1735_v16  ;;  %v1737_v25 = vmul.f32 1.442695, %v1717_v13 }
 0x4b4   :  { %4880 = vpow2.f32 %v1737_v25 }
 0x4b5   :  { %v5973_v19 = vpop.eup %4872 }
 0x4b6   :  { %v1782_v28 = vsel %vm141_vm0, %v5973_v19, 0.0  ;;  %v4875_v41 = vpop.eup %4874 }
 0x4b7   :  { %1783 = vadd.xlane.f32.xlu1 %v1782_v28  ;;  %v4877_v43 = vpop.eup %4876  ;;  %v1329_v29 = vmul.f32 %v4875_v41, %v5852_v0  ;;  %v1281_v0 = vpop.xlane.xlu1 %1280 }
 0x4b8   :  { %v1330_v39 = vmul.f32 %v4877_v43, %v5820_v4  ;;  %v5985_v27 = vpop.eup %4878  ;;  %v1719_v4 = vsub.f32 %v5811_v36, %v1685_v9  ;;  %4882 = vrcp.f32 %v1281_v0 }
 0x4b9   :  { %v1345_v6 = vpack.c.bf16 %v1329_v29, %v1329_v29  ;;  %v1770_v32 = vsel %vm141_vm0, %v5985_v27, 0.0 }
 0x4ba   :  { %4302 = vmatmul.msk.bf16.gmra.mxu2 %vm141_vm0, %v1374_v53  ;;  %v1346_v14 = vpack.c.bf16 %v1330_v39, %v1330_v39  ;;  %v1741_v8 = vmul.f32 1.442695, %v1719_v4  ;;  %v5991_v23 = vpop.eup %4880 }
 0x4bb   :  { %v1369_v7 = vunpack.c.l.b16 %v1345_v6 }
 0x4bc   :  { %v1370_v18 = vunpack.c.l.b16 %v1346_v14 }
 0x4be   :  { %v1375_v63 = vpack.c.b16 %v1370_v18, %v1369_v7  ;;  %v4883_v43 = vpop.eup %4882 }
 0x4bf   :  { %v1331_v39 = vmul.f32 %v4883_v43, %v5860_v38 }
 0x4ca   :  { %4303 = vmatmul.msk.bf16.gmra.mxu2 %vm141_vm0, %v1375_v63 }
 0x4cd   :  { %v1691_v28 = vpop.xlane.xlu0 %1690 }
 0x4ce   :  { %v1721_v2 = vsub.f32 %v5865_v11, %v1691_v28  ;;  %v1773_v11 = vsel %vm141_vm0, %v5991_v23, 0.0 }
 0x4d0   :  { %v1745_v62 = vmul.f32 1.442695, %v1721_v2  ;;  %1771 = vadd.xlane.f32.xlu0 %v1770_v32 }
 0x4d2   :  { %4884 = vpow2.f32 %v1745_v62 }
 0x4d3   :  { %4886 = vpow2.f32 %v1741_v8 }
 0x4d5   :  { %v1694_v53 = vpop.xlane.xlu2 %1693  ;;  %v1284_v41 = vpop.xlane.xlu0 %1283 }
 0x4d6   :  { %v1722_v36 = vsub.f32 %v5872_v57, %v1694_v53  ;;  %4888 = vrcp.f32 %v1284_v41  ;;  %v1347_v57 = vpack.c.bf16 %v1331_v39, %v1331_v39 }
 0x4d8   :  { %v5996_v9 = vpop.eup %4884  ;;  %v1747_v29 = vmul.f32 1.442695, %v1722_v36  ;;  %1774 = vadd.xlane.f32.xlu0 %v1773_v11  ;;  %v1371_v38 = vunpack.c.l.b16 %v1347_v57 }
 0x4d9   :  { %v1785_v49 = vsel %vm141_vm0, %v5996_v9, 0.0  ;;  %v6001_v14 = vpop.eup %4886 }
 0x4da   :  { %4890 = vpow2.f32 %v1747_v29  ;;  %v1287_v6 = vpop.xlane.xlu1 %1286  ;;  %1786 = vadd.xlane.f32.xlu1 %v1785_v49  ;;  %v1779_v18 = vsel %vm141_vm0, %v6001_v14, 0.0 }
 0x4db   :  { %4892 = vrcp.f32 %v1287_v6 }
 0x4dc   :  { %v4889_v16 = vpop.eup %4888 }
 0x4dd   :  { %v1332_v7 = vmul.f32 %v4889_v16, %v5870_v50  ;;  %v1697_v39 = vpop.xlane.xlu2 %1696 }
 0x4df   :  { %v1348_v13 = vpack.c.bf16 %v1332_v7, %v1332_v7 }
 0x4e0   :  { %v6006_v63 = vpop.eup %4890  ;;  %1780 = vadd.xlane.f32.xlu0 %v1779_v18 }
 0x4e1   :  { %v1372_v25 = vunpack.c.l.b16 %v1348_v13  ;;  %v1788_v4 = vsel %vm141_vm0, %v6006_v63, 0.0  ;;  %v4893_v28 = vpop.eup %4892 }
 0x4e2   :  { %1789 = vadd.xlane.f32.xlu2 %v1788_v4  ;;  %v1290_v0 = vpop.xlane.xlu0 %1289  ;;  %v1333_v50 = vmul.f32 %v4893_v28, %v5879_v21 }
 0x4e3   :  { %4894 = vrcp.f32 %v1290_v0  ;;  %v1376_v2 = vpack.c.b16 %v1372_v25, %v1371_v38 }
 0x4e4   :  { %v1349_v62 = vpack.c.bf16 %v1333_v50, %v1333_v50 }
 0x4e5   :  { %4304 = vmatmul.msk.bf16.gmra.mxu2 %vm141_vm0, %v1376_v2 }
 0x4e6   :  { %v1450_v36 = vunpack.c.l.b16 %v1349_v62 }
 0x4e9   :  { %v4895_v32 = vpop.eup %4894 }
 0x4ea   :  { %v1334_v8 = vmul.f32 %v4895_v32, %v5888_v30  ;;  %v1293_v53 = vpop.xlane.xlu1 %1292  ;;  %v1700_v41 = vpop.xlane.xlu0 %1699 }
 0x4eb   :  { %4896 = vrcp.f32 %v1293_v53  ;;  %v1724_v2 = vsub.f32 %v5892_v45, %v1700_v41 }
 0x4ec   :  { %v1350_v43 = vpack.c.bf16 %v1334_v8, %v1334_v8 }
 0x4ed   :  { %v1703_v57 = vpop.xlane.xlu2 %1702 }
 0x4ee   :  { %v1451_v11 = vunpack.c.l.b16 %v1350_v43  ;;  %v1751_v43 = vmul.f32 1.442695, %v1724_v2 }
 0x4f0   :  { %v1458_v29 = vpack.c.b16 %v1451_v11, %v1450_v36 }
 0x4f1   :  { %v4897_v6 = vpop.eup %4896 }
 0x4f2   :  { %4305 = vmatmul.msk.bf16.vlgmr.msra.gmra.mxu3 %vm141_vm0, %v1458_v29  ;;  %v1296_v49 = vpop.xlane.xlu0 %1295  ;;  %v1335_v21 = vmul.f32 %v4897_v6, %v5895_v34 }
 0x4f3   :  { %4898 = vrcp.f32 %v1296_v49  ;;  %1954 = vrot.lane.b32.xlu1 %v5698_v56, %s5193_s23  ;;  %v1725_v49 = vsub.f32 %v5901_v54, %v1703_v57 }
 0x4f4   :  { %1950 = vrot.lane.b32.xlu0 %v5708_v48, %s5193_s23  ;;  %v1351_v16 = vpack.c.bf16 %v1335_v21, %v1335_v21 }
 0x4f5   :  { %v1753_v6 = vmul.f32 1.442695, %v1725_v49 }
 0x4f6   :  { %v1452_v38 = vunpack.c.l.b16 %v1351_v16 }
 0x4f9   :  { %v4899_v30 = vpop.eup %4898 }
 0x4fa   :  { %v1336_v7 = vmul.f32 %v4899_v30, %v5906_v3  ;;  %v1299_v13 = vpop.xlane.xlu1 %1298  ;;  %1952 = vrot.lane.b32.xlu2 %v5701_v46, %s5193_s23  ;;  %v1706_v0 = vpop.xlane.xlu0 %1705  ;;  %v1723_v3 = vsub.f32 %v5883_v51, %v1697_v39 }
 0x4fb   :  { %4900 = vrcp.f32 %v1299_v13 }
 0x4fc   :  { %v1352_v18 = vpack.c.bf16 %v1336_v7, %v1336_v7  ;;  %v1749_v53 = vmul.f32 1.442695, %v1723_v3 }
 0x4fe   :  { %v1453_v25 = vunpack.c.l.b16 %v1352_v18 }
 0x500   :  { %v1459_v4 = vpack.c.b16 %v1453_v25, %v1452_v38 }
 0x501   :  { %v4901_v48 = vpop.eup %4900 }
 0x502   :  { %v1302_v56 = vpop.xlane.xlu2 %1301  ;;  %4306 = vmatmul.msk.bf16.gmra.mxu3 %vm141_vm0, %v1459_v4  ;;  %v1337_v34 = vmul.f32 %v4901_v48, %v5913_v52 }
 0x503   :  { %4902 = vrcp.f32 %v1302_v56 }
 0x504   :  { %v1353_v50 = vpack.c.bf16 %v1337_v34, %v1337_v34 }
 0x505   :  { %v1712_v29 = vpop.xlane.xlu0 %1711 }
 0x506   :  { %v1454_v36 = vunpack.c.l.b16 %v1353_v50  ;;  %v1728_v18 = vsub.f32 %v5927_v58, %v1712_v29 }
 0x508   :  { %v1759_v34 = vmul.f32 1.442695, %v1728_v18 }
 0x509   :  { %v4903_v28 = vpop.eup %4902 }
 0x50a   :  { %v1338_v46 = vmul.f32 %v4903_v28, %v5923_v31  ;;  %v1305_v32 = vpop.xlane.xlu1 %1304  ;;  %v1763_v62 = vpop.xlane.xlu2 %1762  ;;  %v1726_v31 = vsub.f32 %v5910_v5, %v1706_v0 }
 0x50b   :  { %4904 = vrcp.f32 %v1305_v32 }
 0x50c   :  { %v1354_v8 = vpack.c.bf16 %v1338_v46, %v1338_v46  ;;  %4906 = vrcp.f32 %v1763_v62  ;;  %v1755_v16 = vmul.f32 1.442695, %v1726_v31 }
 0x50d   :  { %4908 = vpow2.f32 %v1749_v53 }
 0x50e   :  { %v1455_v11 = vunpack.c.l.b16 %v1354_v8  ;;  %4910 = vpow2.f32 %v1751_v43 }
 0x510   :  { %v1460_v52 = vpack.c.b16 %v1455_v11, %v1454_v36 }
 0x511   :  { %v4905_v45 = vpop.eup %4904 }
 0x512   :  { %v1308_v51 = vpop.xlane.xlu2 %1307  ;;  %4307 = vmatmul.msk.bf16.gmra.mxu3 %vm141_vm0, %v1460_v52  ;;  %v4907_v39 = vpop.eup %4906  ;;  %v1339_v21 = vmul.f32 %v4905_v45, %v5937_v44 }
 0x513   :  { %v1766_v41 = vpop.xlane.xlu1 %1765  ;;  %4912 = vrcp.f32 %v1308_v51  ;;  %v6031_v30 = vpop.eup %4908  ;;  %v1825_v7 = vmul.f32 %v4907_v39, %v5931_v40 }
 0x514   :  { %4914 = vrcp.f32 %v1766_v41  ;;  %v6034_v54 = vpop.eup %4910  ;;  %v1355_v38 = vpack.c.bf16 %v1339_v21, %v1339_v21  ;;  %v1791_v40 = vsel %vm141_vm0, %v6031_v30, 0.0 }
 0x515   :  { %4916 = vpow2.f32 %v1753_v6  ;;  %v1841_v44 = vpack.c.bf16 %v1825_v7, %v1825_v7  ;;  %v1794_v58 = vsel %vm141_vm0, %v6034_v54, 0.0 }
 0x516   :  { %4918 = vpow2.f32 %v1755_v16  ;;  %v1456_v28 = vunpack.c.l.b16 %v1355_v38 }
 0x517   :  { %4920 = vpow2.f32 %v1759_v34 }
 0x518   :  { %v1957_v57 = vpop.permute.xlu0 %1956 }
 0x519   :  { %v4913_v13 = vpop.eup %4912  ;;  %1978 = vmatpush.bf16.msrb.mxu3 %v1957_v57 }
 0x51a   :  { %v4915_v5 = vpop.eup %4914  ;;  %v1340_v25 = vmul.f32 %v4913_v13, %v5946_v10  ;;  %v1769_v4 = vpop.xlane.xlu2 %1768  ;;  %v1865_v10 = vunpack.c.l.b16 %v1841_v44 }
 0x51b   :  { %v1826_v56 = vmul.f32 %v4915_v5, %v5948_v59  ;;  %v6043_v2 = vpop.eup %4916 }
 0x51c   :  { %v1356_v48 = vpack.c.bf16 %v1340_v25, %v1340_v25  ;;  %v6045_v32 = vpop.eup %4918  ;;  %v1797_v8 = vsel %vm141_vm0, %v6043_v2, 0.0 }
 0x51d   :  { %v1842_v0 = vpack.c.bf16 %v1826_v56, %v1826_v56  ;;  %1792 = vadd.xlane.f32.xlu1 %v1791_v40  ;;  %v1800_v43 = vsel %vm141_vm0, %v6045_v32, 0.0  ;;  %v6054_v11 = vpop.eup %4920 }
 0x51e   :  { %v1457_v3 = vunpack.c.l.b16 %v1356_v48  ;;  %1795 = vadd.xlane.f32.xlu0 %v1794_v58  ;;  %v1806_v29 = vsel %vm141_vm0, %v6054_v11, 0.0 }
 0x51f   :  { %v1866_v50 = vunpack.c.l.b16 %v1842_v0 }
 0x520   :  { %v1461_v46 = vpack.c.b16 %v1457_v3, %v1456_v28 }
 0x521   :  { %v1873_v59 = vpack.c.b16 %v1866_v50, %v1865_v10 }
 0x522   :  { %v1709_v62 = vpop.xlane.xlu2 %1708  ;;  %4308 = vmatmul.msk.bf16.gmra.mxu3 %vm141_vm0, %v1461_v46  ;;  %v1778_v45 = vpop.xlane.xlu1 %1777 }
 0x523   :  { %v1727_v53 = vsub.f32 %v5920_v35, %v1709_v62  ;;  %4317 = vmatmul.msk.bf16.vlgmr.msrb.gmra.mxu2 %vm141_vm0, %v1873_v59  ;;  %1798 = vadd.xlane.f32.xlu2 %v1797_v8 }
 0x525   :  { %v1757_v36 = vmul.f32 1.442695, %v1727_v53  ;;  %1801 = vadd.xlane.f32.xlu1 %v1800_v43 }
 0x527   :  { %4922 = vpow2.f32 %v1757_v36 }
 0x528   :  { %4924 = vrcp.f32 %v1769_v4 }
 0x52a   :  { %v1784_v13 = vpop.xlane.xlu1 %1783 }
 0x52b   :  { %1807 = vadd.xlane.f32.xlu2 %v1806_v29 }
 0x52d   :  { %v6058_v52 = vpop.eup %4922  ;;  %v6067_v48 = vpop.f32.mrf.mxu2 }
 0x52e   :  { %v1803_v35 = vsel %vm141_vm0, %v6058_v52, 0.0  ;;  %v4925_v51 = vpop.eup %4924 }
 0x52f   :  { %1804 = vadd.xlane.f32.xlu0 %v1803_v35  ;;  %v1827_v31 = vmul.f32 %v4925_v51, %v5956_v61 }
 0x531   :  { %v1843_v39 = vpack.c.bf16 %v1827_v31, %v1827_v31 }
 0x533   :  { %v1867_v7 = vunpack.c.l.b16 %v1843_v39 }
 0x535   :  { %v6071_v50 = vpop.f32.mrf.mxu2 }
 0x53d   :  { %v6076_v31 = vpop.f32.mrf.mxu2 }
 0x543   :  { %v1772_v49 = vpop.xlane.xlu0 %1771 }
 0x544   :  { %4926 = vrcp.f32 %v1772_v49 }
 0x54a   :  { %v4927_v41 = vpop.eup %4926 }
 0x54b   :  { %v1828_v6 = vmul.f32 %v4927_v41, %v5985_v27  ;;  %v1775_v21 = vpop.xlane.xlu0 %1774 }
 0x54c   :  { %4928 = vrcp.f32 %v1775_v21 }
 0x54d   :  { %v1844_v16 = vpack.c.bf16 %v1828_v6, %v1828_v6  ;;  %4930 = vrcp.f32 %v1778_v45  ;;  %v1787_v44 = vpop.xlane.xlu1 %1786 }
 0x54f   :  { %v1868_v57 = vunpack.c.l.b16 %v1844_v16 }
 0x551   :  { %v1874_v18 = vpack.c.b16 %v1868_v57, %v1867_v7 }
 0x552   :  { %v4929_v5 = vpop.eup %4928 }
 0x553   :  { %4318 = vmatmul.msk.bf16.gmra.mxu2 %vm141_vm0, %v1874_v18  ;;  %v4931_v38 = vpop.eup %4930  ;;  %v1829_v25 = vmul.f32 %v4929_v5, %v5991_v23  ;;  %v1781_v27 = vpop.xlane.xlu0 %1780 }
 0x554   :  { %v1830_v61 = vmul.f32 %v4931_v38, %v5966_v37 }
 0x555   :  { %v1790_v4 = vpop.xlane.xlu2 %1789  ;;  %v1845_v56 = vpack.c.bf16 %v1829_v25, %v1829_v25 }
 0x556   :  { %4932 = vrcp.f32 %v1790_v4  ;;  %v1846_v40 = vpack.c.bf16 %v1830_v61, %v1830_v61 }
 0x557   :  { %4934 = vrcp.f32 %v1787_v44  ;;  %v1869_v34 = vunpack.c.l.b16 %v1845_v56 }
 0x558   :  { %4936 = vrcp.f32 %v1781_v27  ;;  %v1870_v0 = vunpack.c.l.b16 %v1846_v40 }
 0x559   :  { %4938 = vrcp.f32 %v1784_v13 }
 0x55a   :  { %v1875_v3 = vpack.c.b16 %v1870_v0, %v1869_v34 }
 0x55c   :  { %v4933_v58 = vpop.eup %4932 }
 0x55d   :  { %v4935_v28 = vpop.eup %4934  ;;  %v1834_v23 = vmul.f32 %v4933_v58, %v6006_v63  ;;  %v1953_v29 = vpop.permute.xlu2 %1952 }
 0x55e   :  { %v4937_v10 = vpop.eup %4936  ;;  %v1833_v46 = vmul.f32 %v4935_v28, %v5996_v9 }
 0x55f   :  { %v4939_v37 = vpop.eup %4938  ;;  %v1831_v59 = vmul.f32 %v4937_v10, %v6001_v14  ;;  %v1850_v53 = vpack.c.bf16 %v1834_v23, %v1834_v23 }
 0x560   :  { %v1832_v8 = vmul.f32 %v4939_v37, %v5973_v19  ;;  %v1849_v43 = vpack.c.bf16 %v1833_v46, %v1833_v46  ;;  %v6080_v19 = vpop.f32.mrf.mxu2 }
 0x561   :  { %v1847_v36 = vpack.c.bf16 %v1831_v59, %v1831_v59  ;;  %v1939_v63 = vunpack.c.l.b16 %v1850_v53 }
 0x562   :  { %v1848_v35 = vpack.c.bf16 %v1832_v8, %v1832_v8  ;;  %v1938_v49 = vunpack.c.l.b16 %v1849_v43 }
 0x563   :  { %4319 = vmatmul.msk.bf16.gmra.mxu2 %vm141_vm0, %v1875_v3  ;;  %v1871_v51 = vunpack.c.l.b16 %v1847_v36 }
 0x564   :  { %v1872_v9 = vunpack.c.l.b16 %v1848_v35  ;;  %v1946_v41 = vpack.c.b16 %v1939_v63, %v1938_v49 }
 0x565   :  { %v1955_v62 = vpop.permute.xlu1 %1954 }
 0x566   :  { %1979 = vmatpush.bf16.msrb.mxu3 %v1955_v62  ;;  %v1951_v45 = vpop.permute.xlu0 %1950  ;;  %v1876_v14 = vpack.c.b16 %v1872_v9, %v1871_v51 }
 0x568   :  { %v6082_v39 = vpop.f32.mrf.mxu2 }
 0x56a   :  { %1980 = vmatpush.bf16.msrb.mxu3 %v1953_v29 }
 0x56e   :  { %1981 = vmatpush.bf16.msrb.mxu3 %v1951_v45 }
 0x570   :  { %v6084_v6 = vpop.f32.mrf.mxu2 }
 0x571   :  { %4321 = vmatmul.msk.bf16.vlgmr.msrb.gmra.mxu3 %vm141_vm0, %v1946_v41 }
 0x573   :  { %4320 = vmatmul.msk.bf16.gmra.mxu2 %vm141_vm0, %v1876_v14 }
 0x575   :  { %v6095_v28 = vpop.f32.mrf.mxu3 }
 0x578   :  { %v6086_v7 = vpop.f32.mrf.mxu2 }
 0x57d   :  { %v6097_v36 = vpop.f32.mrf.mxu3 }
 0x580   :  { %v6090_v27 = vpop.f32.mrf.mxu2 }
 0x585   :  { %v6103_v49 = vpop.f32.mrf.mxu3 }
 0x58d   :  { %v6106_v41 = vpop.f32.mrf.mxu3 }
 0x590   :  { %v1793_v21 = vpop.xlane.xlu1 %1792 }
 0x591   :  { %4940 = vrcp.f32 %v1793_v21  ;;  %v1796_v16 = vpop.xlane.xlu0 %1795 }
 0x592   :  { %4942 = vrcp.f32 %v1796_v16 }
 0x595   :  { %v6108_v14 = vpop.f32.mrf.mxu3 }
 0x596   :  { %v1799_v25 = vpop.xlane.xlu2 %1798 }
 0x597   :  { %v4941_v57 = vpop.eup %4940 }
 0x598   :  { %v4943_v13 = vpop.eup %4942  ;;  %v1835_v18 = vmul.f32 %v4941_v57, %v6031_v30  ;;  %v1802_v5 = vpop.xlane.xlu1 %1801 }
 0x599   :  { %v1836_v38 = vmul.f32 %v4943_v13, %v6034_v54  ;;  %4944 = vrcp.f32 %v1802_v5 }
 0x59a   :  { %v1851_v61 = vpack.c.bf16 %v1835_v18, %v1835_v18  ;;  %4946 = vrcp.f32 %v1799_v25  ;;  %v4655_v18 = vld [vmem:[#allocation2 + $0x110] sm:$0xff]  ;;  %v4653_v25 = vld [vmem:[#allocation2 + $0x100] sm:$0xff] }
 0x59b   :  { %v1852_v4 = vpack.c.bf16 %v1836_v38, %v1836_v38  ;;  %v4654_v38 = vld [vmem:[#allocation2 + $0x108] sm:$0xff] }
 0x59c   :  { %v1940_v44 = vunpack.c.l.b16 %v1851_v61 }
 0x59d   :  { %v1941_v56 = vunpack.c.l.b16 %v1852_v4  ;;  %v6110_v16 = vpop.f32.mrf.mxu3 }
 0x59e   :  { %v1808_v37 = vpop.xlane.xlu2 %1807 }
 0x59f   :  { %v1947_v40 = vpack.c.b16 %v1941_v56, %v1940_v44  ;;  %v4945_v34 = vpop.eup %4944  ;;  %v4652_v56 = vld [vmem:[#allocation2 + $0xf8] sm:$0xff] }
 0x5a0   :  { %v4947_v0 = vpop.eup %4946  ;;  %v1838_v58 = vmul.f32 %v4945_v34, %v6045_v32 }
 0x5a1   :  { %4322 = vmatmul.msk.bf16.gmra.mxu3 %vm141_vm0, %v1947_v40  ;;  %v1837_v30 = vmul.f32 %v4947_v0, %v6043_v2  ;;  %v4651_v40 = vld [vmem:[#allocation2 + $0xf0] sm:$0xff] }
 0x5a2   :  { %v1854_v3 = vpack.c.bf16 %v1838_v58, %v1838_v58  ;;  %v1805_v10 = vpop.xlane.xlu0 %1804  ;;  %v4650_v58 = vld [vmem:[#allocation2 + $0xe8] sm:$0xff] }
 0x5a3   :  { %v1853_v23 = vpack.c.bf16 %v1837_v30, %v1837_v30  ;;  %4948 = vrcp.f32 %v1805_v10 }
 0x5a4   :  { %v1943_v46 = vunpack.c.l.b16 %v1854_v3  ;;  %4950 = vrcp.f32 %v1808_v37 }
 0x5a5   :  { %v1942_v59 = vunpack.c.l.b16 %v1853_v23  ;;  %v6113_v13 = vpop.f32.mrf.mxu3  ;;  %v4649_v23 = vld [vmem:[#allocation2 + $0xe0] sm:$0xff] }
 0x5a6   :  { %v1910_v54 = vpop.f32.mrf.mxu2 }
 0x5a7   :  { %v1948_v53 = vpack.c.b16 %v1943_v46, %v1942_v59 }
 0x5a9   :  { %v4949_v43 = vpop.eup %4948 }
 0x5aa   :  { %v4951_v2 = vpop.eup %4950  ;;  %v1839_v32 = vmul.f32 %v4949_v43, %v6058_v52 }
 0x5ab   :  { %v1840_v29 = vmul.f32 %v4951_v2, %v6054_v11  ;;  %v4656_v11 = vld [vmem:[#allocation2 + $0x118] sm:$0xff] }
 0x5ac   :  { %v1855_v35 = vpack.c.bf16 %v1839_v32, %v1839_v32  ;;  %2155 = vmatpush.bf16.msrb.mxu0 %v4656_v11 }
 0x5ad   :  { %v1856_v63 = vpack.c.bf16 %v1840_v29, %v1840_v29  ;;  %v6115_v61 = vpop.f32.mrf.mxu3 }
 0x5ae   :  { %v1912_v62 = vpop.f32.mrf.mxu2  ;;  %v1944_v51 = vunpack.c.l.b16 %v1855_v35 }
 0x5af   :  { %v4738_v8 = vpack.i.bf16 %v1912_v62, %v1910_v54  ;;  %v1945_v45 = vunpack.c.l.b16 %v1856_v63 }
 0x5b0   :  { %2156 = vmatpush.bf16.msrb.mxu0 %v4655_v18 }
 0x5b1   :  { %4739 = vrot.lane.b32.xlu1 %v4738_v8, %s5193_s23  ;;  %4323 = vmatmul.msk.bf16.gmra.mxu3 %vm141_vm0, %v1948_v53  ;;  %v1949_v9 = vpack.c.b16 %v1945_v45, %v1944_v51 }
 0x5b4   :  { %2157 = vmatpush.bf16.msrb.mxu0 %v4654_v38 }
 0x5b8   :  { %2158 = vmatpush.bf16.msrb.mxu0 %v4653_v25 }
 0x5bc   :  { %2159 = vmatpush.bf16.msrb.mxu0 %v4652_v56 }
 0x5c0   :  { %2160 = vmatpush.bf16.msrb.mxu0 %v4651_v40 }
 0x5c1   :  { %4324 = vmatmul.msk.bf16.gmra.mxu3 %vm141_vm0, %v1949_v9 }
 0x5c4   :  { %2161 = vmatpush.bf16.msrb.mxu0 %v4650_v58 }
 0x5c8   :  { %2162 = vmatpush.bf16.msrb.mxu0 %v4649_v23 }
 0x5d6   :  { %v1915_v21 = vpop.f32.mrf.mxu2 }
 0x5de   :  { %v1917_v57 = vpop.f32.mrf.mxu2 }
 0x5df   :  { %v4743_v52 = vpack.i.bf16 %v1917_v57, %v1915_v21 }
 0x5e1   :  { %4744 = vrot.lane.b32.xlu0 %v4743_v52, %s5193_s23 }
 0x5e6   :  { %v1920_v5 = vpop.f32.mrf.mxu2 }
 0x5ee   :  { %v1922_v4 = vpop.f32.mrf.mxu2 }
 0x5ef   :  { %v4748_v44 = vpack.i.bf16 %v1922_v4, %v1920_v5 }
 0x5f1   :  { %4749 = vrot.lane.b32.xlu2 %v4748_v44, %s5193_s23 }
 0x5f4   :  { %v1983_v34 = vpop.f32.mrf.mxu3 }
 0x5f6   :  { %v1925_v0 = vpop.f32.mrf.mxu2 }
 0x5fc   :  { %v1985_v30 = vpop.f32.mrf.mxu3 }
 0x5fd   :  { %v4758_v54 = vpack.i.bf16 %v1985_v30, %v1983_v34 }
 0x5fe   :  { %v1927_v3 = vpop.f32.mrf.mxu2 }
 0x5ff   :  { %4759 = vrot.lane.b32.xlu1 %v4758_v54, %s5193_s23  ;;  %v4753_v10 = vpack.i.bf16 %v1927_v3, %v1925_v0 }
 0x601   :  { %4754 = vrot.lane.b32.xlu0 %v4753_v10, %s5193_s23 }
 0x623   :  { %v4740_v37 = vpop.permute.xlu1 %4739 }
 0x624   :  { %v4742_v46 = vunpack.i.h.bf16 %v4740_v37  ;;  %v4741_v59 = vunpack.i.l.bf16 %v4740_v37  ;;  %v1988_v62 = vpop.f32.mrf.mxu3 }
 0x626   :  { %v2068_v8 = vsel %vm141_vm0, %v6071_v50, %v4742_v46  ;;  %v2067_v53 = vsel %vm141_vm0, %v6067_v48, %v4741_v59 }
 0x627   :  { %v2083_v43 = vpack.c.bf16 %v2068_v8, %v2067_v53 }
 0x629   :  { %2163 = vmatmul.bf16.vlgmr.msrb.gmra.mxu0 %v2083_v43 }
 0x62c   :  { %v1990_v2 = vpop.f32.mrf.mxu3 }
 0x62d   :  { %v4763_v32 = vpack.i.bf16 %v1990_v2, %v1988_v62 }
 0x62f   :  { %4764 = vrot.lane.b32.xlu2 %v4763_v32, %s5193_s23 }
 0x634   :  { %v1993_v29 = vpop.f32.mrf.mxu3 }
 0x63c   :  { %v1995_v35 = vpop.f32.mrf.mxu3 }
 0x63d   :  { %v4768_v63 = vpack.i.bf16 %v1995_v35, %v1993_v29 }
 0x63f   :  { %4769 = vrot.lane.b32.xlu0 %v4768_v63, %s5193_s23 }
 0x644   :  { %v1998_v51 = vpop.f32.mrf.mxu3 }
 0x64b   :  { %v4750_v18 = vpop.permute.xlu2 %4749 }
 0x64c   :  { %v2000_v45 = vpop.f32.mrf.mxu3  ;;  %v4752_v5 = vunpack.i.h.bf16 %v4750_v18  ;;  %v4751_v38 = vunpack.i.l.bf16 %v4750_v18 }
 0x64d   :  { %v4773_v9 = vpack.i.bf16 %v2000_v45, %v1998_v51 }
 0x64e   :  { %v2071_v25 = vsel %vm141_vm0, %v6082_v39, %v4751_v38  ;;  %v2072_v4 = vsel %vm141_vm0, %v6084_v6, %v4752_v5 }
 0x64f   :  { %4774 = vrot.lane.b32.xlu1 %v4773_v9, %s5193_s23  ;;  %v2085_v44 = vpack.c.bf16 %v2072_v4, %v2071_v25 }
 0x653   :  { %v4745_v50 = vpop.permute.xlu0 %4744 }
 0x654   :  { %v4747_v21 = vunpack.i.h.bf16 %v4745_v50  ;;  %v4746_v57 = vunpack.i.l.bf16 %v4745_v50 }
 0x656   :  { %v2069_v48 = vsel %vm141_vm0, %v6076_v31, %v4746_v57  ;;  %v2070_v52 = vsel %vm141_vm0, %v6080_v19, %v4747_v21 }
 0x657   :  { %v2084_v11 = vpack.c.bf16 %v2070_v52, %v2069_v48 }
 0x659   :  { %2168 = vmatmul.bf16.gmra.mxu0 %v2084_v11 }
 0x669   :  { %2173 = vmatmul.bf16.gmra.mxu0 %v2085_v44 }
 0x671   :  { %v4760_v58 = vpop.permute.xlu1 %4759 }
 0x672   :  { %v4762_v30 = vunpack.i.h.bf16 %v4760_v58  ;;  %v4761_v54 = vunpack.i.l.bf16 %v4760_v58 }
 0x673   :  { %v4755_v56 = vpop.permute.xlu0 %4754 }
 0x674   :  { %v4757_v40 = vunpack.i.h.bf16 %v4755_v56  ;;  %v4756_v34 = vunpack.i.l.bf16 %v4755_v56  ;;  %v2075_v39 = vsel %vm141_vm0, %v6095_v28, %v4761_v54  ;;  %v2076_v6 = vsel %vm141_vm0, %v6097_v36, %v4762_v30  ;;  %v6150_v28 = vld [vmem:[%s7150_s3 + $0x6] ss:$0 sm:$0xff] }
 0x675   :  { %v2087_v3 = vpack.c.bf16 %v2076_v6, %v2075_v39 }
 0x676   :  { %v2073_v31 = vsel %vm141_vm0, %v6086_v7, %v4756_v34  ;;  %v2074_v19 = vsel %vm141_vm0, %v6090_v27, %v4757_v40 }
 0x677   :  { %v2086_v0 = vpack.c.bf16 %v2074_v19, %v2073_v31 }
 0x679   :  { %2178 = vmatmul.bf16.gmra.mxu0 %v2086_v0 }
 0x689   :  { %2183 = vmatmul.bf16.gmra.mxu0 %v2087_v3  ;;  %v4765_v10 = vpop.permute.xlu2 %4764 }
 0x68a   :  { %v4767_v23 = vunpack.i.h.bf16 %v4765_v10  ;;  %v4766_v37 = vunpack.i.l.bf16 %v4765_v10 }
 0x68c   :  { %v2077_v7 = vsel %vm141_vm0, %v6103_v49, %v4766_v37  ;;  %v2078_v27 = vsel %vm141_vm0, %v6106_v41, %v4767_v23 }
 0x68d   :  { %v2088_v46 = vpack.c.bf16 %v2078_v27, %v2077_v7 }
 0x699   :  { %2188 = vmatmul.bf16.gmra.mxu0 %v2088_v46 }
 0x6a6   :  { %v2164_v59 = vpop.f32.mrf.mxu0 }
 0x6a7   :  { %v2204_v36 = vadd.f32 %v2164_v59, %v5264_v12 }
 0x6a9   :  { %v6154_v62 = vadd.f32 %v6150_v28, %v2204_v36 }
 0x6ab   :  { %7181 = vst [vmem:[#allocation15_spill] sm:$0xff] %v6154_v62  ;;  %2240 = vadd.xlane.f32.xlu2 %v6154_v62 }
 0x6ae   :  { %v2166_v8 = vpop.f32.mrf.mxu0 }
 0x6af   :  { %v2205_v49 = vadd.f32 %v2166_v8, %v5272_v15 }
 0x6b1   :  { %v6159_v41 = vadd.f32 %v6150_v28, %v2205_v49  ;;  %v4770_v53 = vpop.permute.xlu0 %4769 }
 0x6b2   :  { %v4772_v43 = vunpack.i.h.bf16 %v4770_v53  ;;  %v4771_v2 = vunpack.i.l.bf16 %v4770_v53 }
 0x6b3   :  { %7182 = vst [vmem:[#allocation16_spill] sm:$0xff] %v6159_v41  ;;  %2242 = vadd.xlane.f32.xlu0 %v6159_v41 }
 0x6b4   :  { %v2079_v32 = vsel %vm141_vm0, %v6108_v14, %v4771_v2  ;;  %v2080_v12 = vsel %vm141_vm0, %v6110_v16, %v4772_v43 }
 0x6b5   :  { %v2089_v29 = vpack.c.bf16 %v2080_v12, %v2079_v32 }
 0x6b7   :  { %2193 = vmatmul.bf16.gmra.mxu0 %v2089_v29 }
 0x6c1   :  { %v4775_v35 = vpop.permute.xlu1 %4774 }
 0x6c2   :  { %v4777_v63 = vunpack.i.h.bf16 %v4775_v35  ;;  %v4776_v51 = vunpack.i.l.bf16 %v4775_v35 }
 0x6c4   :  { %v2081_v15 = vsel %vm141_vm0, %v6113_v13, %v4776_v51  ;;  %v2082_v45 = vsel %vm141_vm0, %v6115_v61, %v4777_v63 }
 0x6c5   :  { %v2090_v9 = vpack.c.bf16 %v2082_v45, %v2081_v15  ;;  %v7193_v15 = vld [vmem:[#allocation11_spill] sm:$0xff] }
 0x6c7   :  { %2198 = vmatmul.bf16.gmra.mxu0 %v2090_v9 }
 0x6d6   :  { %v2169_v50 = vpop.f32.mrf.mxu0 }
 0x6d7   :  { %v2206_v21 = vadd.f32 %v2169_v50, %v5276_v17 }
 0x6d9   :  { %v6172_v14 = vadd.f32 %v6150_v28, %v2206_v21 }
 0x6db   :  { %7183 = vst [vmem:[#allocation17_spill] sm:$0xff] %v6172_v14  ;;  %2244 = vadd.xlane.f32.xlu1 %v6172_v14 }
 0x6de   :  { %v2171_v16 = vpop.f32.mrf.mxu0 }
 0x6df   :  { %v2207_v57 = vadd.f32 %v2171_v16, %v5284_v20 }
 0x6e1   :  { %v6177_v48 = vadd.f32 %v6150_v28, %v2207_v57  ;;  %v7195_v57 = vld [vmem:[#allocation12_spill] sm:$0xff] }
 0x6e3   :  { %7184 = vst [vmem:[#allocation18_spill] sm:$0xff] %v6177_v48  ;;  %2246 = vadd.xlane.f32.xlu2 %v6177_v48 }
 0x6e6   :  { %v2174_v13 = vpop.f32.mrf.mxu0 }
 0x6e7   :  { %v2208_v61 = vadd.f32 %v2174_v13, %v5288_v22 }
 0x6e9   :  { %v6182_v52 = vadd.f32 %v6150_v28, %v2208_v61 }
 0x6eb   :  { %7185 = vst [vmem:[#allocation19_spill] sm:$0xff] %v6182_v52  ;;  %2248 = vadd.xlane.f32.xlu0 %v6182_v52 }
 0x6ee   :  { %v2176_v17 = vpop.f32.mrf.mxu0 }
 0x6ef   :  { %v2209_v11 = vadd.f32 %v2176_v17, %v5292_v24 }
 0x6f1   :  { %v6187_v18 = vadd.f32 %v6150_v28, %v2209_v11  ;;  %v4471_v11 = vld [vmem:[#allocation5 + $0xe0] sm:$0xf] }
 0x6f3   :  { %7186 = vst [vmem:[#allocation20_spill] sm:$0xff] %v6187_v18  ;;  %2250 = vadd.xlane.f32.xlu1 %v6187_v18 }
 0x6f6   :  { %v2179_v20 = vpop.f32.mrf.mxu0 }
 0x6f7   :  { %v2210_v5 = vadd.f32 %v2179_v20, %v5296_v26  ;;  %v4687_v20 = vld [vmem:[#allocation5 + $0xec] sm:$0xf0] }
 0x6f9   :  { %v6192_v38 = vadd.f32 %v6150_v28, %v2210_v5  ;;  %v4685_v5 = vld [vmem:[#allocation5 + $0xe4] sm:$0xf] }
 0x6fb   :  { %7187 = vst [vmem:[#allocation21_spill] sm:$0xff] %v6192_v38  ;;  %2252 = vadd.xlane.f32.xlu1 %v6192_v38 }
 0x6fe   :  { %v2181_v24 = vpop.f32.mrf.mxu0 }
 0x6ff   :  { %v2211_v40 = vadd.f32 %v2181_v24, %v5312_v42  ;;  %v4472_v24 = vor.u32 %v4687_v20, %v4471_v11  ;;  %v4673_v11 = vld [vmem:[#allocation5 + $0x84] sm:$0xf] }
 0x701   :  { %v6207_v31 = vadd.f32 %v6150_v28, %v2211_v40  ;;  %v4688_v40 = vld [vmem:[#allocation5 + $0xf4] sm:$0xf0]  ;;  %2804 = vmatpush.bf16.msrb.mxu1 %v4472_v24 }
 0x703   :  { %7188 = vst [vmem:[#allocation22_spill] sm:$0xff] %v6207_v31 }
 0x706   :  { %v2184_v0 = vpop.f32.mrf.mxu0 }
 0x707   :  { %v2212_v58 = vadd.f32 %v2184_v0, %v5319_v47  ;;  %v4686_v0 = vld [vmem:[#allocation5 + $0xec] sm:$0xf] }
 0x709   :  { %v6214_v30 = vadd.f32 %v6150_v28, %v2212_v58  ;;  %v4481_v58 = vld [vmem:[#allocation5 + $0xf8] sm:$0xf0] }
 0x70b   :  { %7189 = vst [vmem:[#allocation23_spill] sm:$0xff] %v6214_v30 }
 0x70e   :  { %v2186_v42 = vpop.f32.mrf.mxu0 }
 0x70f   :  { %v2213_v47 = vadd.f32 %v2186_v42, %v5332_v55  ;;  %v4484_v42 = vor.u32 %v4686_v0, %v4481_v58  ;;  %v4671_v0 = vld [vmem:[#allocation5 + $0x6c] sm:$0xf0]  ;;  %v4669_v58 = vld [vmem:[#allocation5 + $0x64] sm:$0xf] }
 0x711   :  { %v6229_v27 = vadd.f32 %v6150_v28, %v2213_v47  ;;  %2951 = vmatpush.bf16.msra.mxu0 %v4484_v42  ;;  %v4457_v47 = vld [vmem:[#allocation5 + $0xd0] sm:$0xf0] }
 0x713   :  { %7190 = vst [vmem:[#allocation24_spill] sm:$0xff] %v6229_v27 }
 0x716   :  { %v2189_v10 = vpop.f32.mrf.mxu0 }
 0x717   :  { %v2214_v36 = vadd.f32 %v2189_v10, %v5339_v60 }
 0x719   :  { %v6240_v53 = vadd.f32 %v6150_v28, %v2214_v36 }
 0x71b   :  { %7191 = vst [vmem:[#allocation25_spill] sm:$0xff] %v6240_v53 }
 0x71e   :  { %v2241_v22 = vpop.xlane.xlu2 %2240  ;;  %v2191_v55 = vpop.f32.mrf.mxu0 }
 0x71f   :  { %v2272_v25 = vmul.f32 %v2241_v22, %v5299_v33  ;;  %v2215_v32 = vadd.f32 %v2191_v55, %v5349_v1  ;;  %v7197_v22 = vld [vmem:[#allocation13_spill] sm:$0xff]  ;;  %v4465_v55 = vld [vmem:[#allocation5 + $0xd8] sm:$0xf0] }
 0x721   :  { %v6197_v4 = vsub.f32 %v6154_v62, %v2272_v25  ;;  %v6251_v35 = vadd.f32 %v6150_v28, %v2215_v32  ;;  %v4679_v32 = vld [vmem:[#allocation5 + $0xac] sm:$0xf0] }
 0x723   :  { %v2304_v44 = vmul.f32 %v6197_v4, %v6197_v4  ;;  %7192 = vst [vmem:[#allocation26_spill] sm:$0xff] %v6251_v35 }
 0x725   :  { %2320 = vadd.xlane.f32.xlu2 %v2304_v44  ;;  %v4473_v44 = vld [vmem:[#allocation5 + $0xf0] sm:$0xf0] }
 0x726   :  { %v2243_v56 = vpop.xlane.xlu0 %2242 }
 0x727   :  { %v2273_v26 = vmul.f32 %v2243_v56, %v5299_v33  ;;  %v4479_v56 = vld [vmem:[#allocation5 + $0xe8] sm:$0xf] }
 0x729   :  { %v6204_v34 = vsub.f32 %v6159_v41, %v2273_v26  ;;  %v4476_v26 = vor.u32 %v4685_v5, %v4473_v44  ;;  %v4425_v5 = vld [vmem:[#allocation5 + $0x90] sm:$0xf0] }
 0x72a   :  { %v4428_v24 = vor.u32 %v4673_v11, %v4425_v5  ;;  %v4664_v11 = vld [vmem:[#allocation5 + $0x34] sm:$0xf0] }
 0x72b   :  { %v2305_v19 = vmul.f32 %v6204_v34, %v6204_v34  ;;  %2853 = vmatpush.bf16.msra.mxu2 %v4476_v26 }
 0x72d   :  { %2322 = vadd.xlane.f32.xlu0 %v2305_v19  ;;  %2254 = vadd.xlane.f32.xlu2 %v6207_v31  ;;  %v4480_v19 = vor.u32 %v4688_v40, %v4479_v56  ;;  %v4674_v56 = vld [vmem:[#allocation5 + $0x8c] sm:$0xf]  ;;  %v4433_v40 = vld [vmem:[#allocation5 + $0x98] sm:$0xf0] }
 0x72e   :  { %v4436_v26 = vor.u32 %v4674_v56, %v4433_v40  ;;  %v4359_v40 = vld [vmem:[#allocation5] sm:$0xf] }
 0x72f   :  { %2902 = vmatpush.bf16.msra.mxu3 %v4480_v19  ;;  %v4407_v19 = vld [vmem:[#allocation5 + $0x60] sm:$0xf] }
 0x730   :  { %v4408_v42 = vor.u32 %v4671_v0, %v4407_v19  ;;  %v4657_v19 = vld [vmem:[#allocation5 + $0x4] sm:$0xf] }
 0x734   :  { %v2194_v12 = vpop.f32.mrf.mxu0 }
 0x735   :  { %2256 = vadd.xlane.f32.xlu2 %v6214_v30  ;;  %v2216_v45 = vadd.f32 %v2194_v12, %v7193_v15  ;;  %v4680_v15 = vld [vmem:[#allocation5 + $0xb4] sm:$0xf0] }
 0x737   :  { %v6262_v21 = vadd.f32 %v6150_v28, %v2216_v45 }
 0x739   :  { %7194 = vst [vmem:[#allocation11_spill] sm:$0xff] %v6262_v21 }
 0x73c   :  { %v2196_v50 = vpop.f32.mrf.mxu0 }
 0x73d   :  { %v2217_v13 = vadd.f32 %v2196_v50, %v7195_v57  ;;  %v4678_v50 = vld [vmem:[#allocation5 + $0xac] sm:$0xf] }
 0x73f   :  { %v6269_v61 = vadd.f32 %v6150_v28, %v2217_v13  ;;  %v4423_v13 = vld [vmem:[#allocation5 + $0x80] sm:$0xf] }
 0x741   :  { %7196 = vst [vmem:[#allocation12_spill] sm:$0xff] %v6269_v61 }
 0x744   :  { %v2199_v17 = vpop.f32.mrf.mxu0 }
 0x745   :  { %v2218_v25 = vadd.f32 %v2199_v17, %v7197_v22  ;;  %v4675_v17 = vld [vmem:[#allocation5 + $0x8c] sm:$0xf0]  ;;  %v4431_v22 = vld [vmem:[#allocation5 + $0x88] sm:$0xf] }
 0x746   :  { %v4424_v20 = vor.u32 %v4675_v17, %v4423_v13  ;;  %v4377_v13 = vld [vmem:[#allocation5 + $0x30] sm:$0xf0]  ;;  %v4383_v17 = vld [vmem:[#allocation5 + $0x28] sm:$0xf] }
 0x747   :  { %v6274_v10 = vadd.f32 %v6150_v28, %v2218_v25  ;;  %v4676_v25 = vld [vmem:[#allocation5 + $0x94] sm:$0xf0] }
 0x748   :  { %v4432_v44 = vor.u32 %v4676_v25, %v4431_v22  ;;  %v4384_v22 = vor.u32 %v4664_v11, %v4383_v17  ;;  %v4662_v25 = vld [vmem:[#allocation5 + $0x2c] sm:$0xf] }
 0x749   :  { %7198 = vst [vmem:[#allocation13_spill] sm:$0xff] %v6274_v10 }
 0x74c   :  { %v2201_v11 = vpop.f32.mrf.mxu0 }
 0x74e   :  { %v2245_v54 = vpop.xlane.xlu1 %2244 }
 0x74f   :  { %v2274_v39 = vmul.f32 %v2245_v54, %v5299_v33  ;;  %v4455_v54 = vld [vmem:[#allocation5 + $0xc0] sm:$0xf] }
 0x751   :  { %v6219_v6 = vsub.f32 %v6172_v14, %v2274_v39  ;;  %v4683_v39 = vld [vmem:[#allocation5 + $0xcc] sm:$0xf0] }
 0x753   :  { %v2306_v3 = vmul.f32 %v6219_v6, %v6219_v6 }
 0x755   :  { %2324 = vadd.xlane.f32.xlu0 %v2306_v3  ;;  %v4681_v3 = vld [vmem:[#allocation5 + $0xc4] sm:$0xf] }
 0x756   :  { %v2247_v23 = vpop.xlane.xlu2 %2246 }
 0x757   :  { %v2275_v37 = vmul.f32 %v2247_v23, %v5299_v33  ;;  %v4456_v23 = vor.u32 %v4683_v39, %v4455_v54  ;;  %v4409_v54 = vld [vmem:[#allocation5 + $0x70] sm:$0xf0]  ;;  %v4415_v39 = vld [vmem:[#allocation5 + $0x68] sm:$0xf] }
 0x759   :  { %v6226_v7 = vsub.f32 %v6177_v48, %v2275_v37  ;;  %v4463_v37 = vld [vmem:[#allocation5 + $0xc8] sm:$0xf]  ;;  %2805 = vmatpush.bf16.msrb.mxu1 %v4456_v23  ;;  %v4412_v23 = vor.u32 %v4669_v58, %v4409_v54 }
 0x75a   :  { %v4367_v54 = vld [vmem:[#allocation5 + $0x8] sm:$0xf] }
 0x75b   :  { %v2307_v46 = vmul.f32 %v6226_v7, %v6226_v7 }
 0x75d   :  { %2326 = vadd.xlane.f32.xlu1 %v2307_v46  ;;  %2258 = vadd.xlane.f32.xlu0 %v6229_v27  ;;  %v4684_v46 = vld [vmem:[#allocation5 + $0xd4] sm:$0xf0] }
 0x75e   :  { %v2249_v59 = vpop.xlane.xlu0 %2248  ;;  %v4464_v36 = vor.u32 %v4684_v46, %v4463_v37  ;;  %v4670_v37 = vld [vmem:[#allocation5 + $0x6c] sm:$0xf]  ;;  %v4417_v46 = vld [vmem:[#allocation5 + $0x78] sm:$0xf0] }
 0x75f   :  { %v2276_v8 = vmul.f32 %v2249_v59, %v5299_v33  ;;  %v4460_v59 = vor.u32 %v4681_v3, %v4457_v47  ;;  %v4672_v3 = vld [vmem:[#allocation5 + $0x74] sm:$0xf0] }
 0x760   :  { %2903 = vmatpush.bf16.msra.mxu3 %v4464_v36  ;;  %v4416_v47 = vor.u32 %v4672_v3, %v4415_v39  ;;  %v4391_v36 = vld [vmem:[#allocation5 + $0x40] sm:$0xf]  ;;  %v4660_v3 = vld [vmem:[#allocation5 + $0x14] sm:$0xf0] }
 0x761   :  { %v6237_v49 = vsub.f32 %v6182_v52, %v2276_v8  ;;  %v4682_v8 = vld [vmem:[#allocation5 + $0xcc] sm:$0xf]  ;;  %2854 = vmatpush.bf16.msra.mxu2 %v4460_v59  ;;  %v4420_v59 = vor.u32 %v4670_v37, %v4417_v46  ;;  %v4368_v37 = vor.u32 %v4660_v3, %v4367_v54 }
 0x763   :  { %v2308_v43 = vmul.f32 %v6237_v49, %v6237_v49 }
 0x765   :  { %2328 = vadd.xlane.f32.xlu1 %v2308_v43  ;;  %2260 = vadd.xlane.f32.xlu0 %v6240_v53  ;;  %v4468_v43 = vor.u32 %v4682_v8, %v4465_v55  ;;  %v4667_v8 = vld [vmem:[#allocation5 + $0x4c] sm:$0xf0]  ;;  %v4665_v55 = vld [vmem:[#allocation5 + $0x44] sm:$0xf] }
 0x766   :  { %v2251_v2 = vpop.xlane.xlu1 %2250 }
 0x767   :  { %v2277_v60 = vmul.f32 %v2251_v2, %v5299_v33  ;;  %v4439_v2 = vld [vmem:[#allocation5 + $0xa0] sm:$0xf]  ;;  %2952 = vmatpush.bf16.msra.mxu0 %v4468_v43  ;;  %v4392_v43 = vor.u32 %v4667_v8, %v4391_v36 }
 0x768   :  { %v4440_v12 = vor.u32 %v4679_v32, %v4439_v2  ;;  %v4393_v2 = vld [vmem:[#allocation5 + $0x50] sm:$0xf0]  ;;  %v4399_v32 = vld [vmem:[#allocation5 + $0x48] sm:$0xf] }
 0x769   :  { %v6248_v29 = vsub.f32 %v6187_v18, %v2277_v60  ;;  %v4677_v60 = vld [vmem:[#allocation5 + $0xa4] sm:$0xf] }
 0x76a   :  { %2806 = vmatpush.bf16.msrb.mxu1 %v4440_v12  ;;  %v4396_v12 = vor.u32 %v4665_v55, %v4393_v2 }
 0x76b   :  { %v2309_v63 = vmul.f32 %v6248_v29, %v6248_v29 }
 0x76d   :  { %2330 = vadd.xlane.f32.xlu2 %v2309_v63  ;;  %2262 = vadd.xlane.f32.xlu1 %v6251_v35  ;;  %v4441_v63 = vld [vmem:[#allocation5 + $0xb0] sm:$0xf0] }
 0x76e   :  { %v2253_v51 = vpop.xlane.xlu1 %2252  ;;  %v4444_v45 = vor.u32 %v4677_v60, %v4441_v63  ;;  %2807 = vmatpush.bf16.msrb.mxu1 %v4424_v20  ;;  %v4668_v60 = vld [vmem:[#allocation5 + $0x54] sm:$0xf0] }
 0x76f   :  { %v2278_v1 = vmul.f32 %v2253_v51, %v5299_v33  ;;  %v4447_v51 = vld [vmem:[#allocation5 + $0xa8] sm:$0xf]  ;;  %v4400_v63 = vor.u32 %v4668_v60, %v4399_v32 }
 0x770   :  { %2855 = vmatpush.bf16.msra.mxu2 %v4444_v45 }
 0x771   :  { %v6259_v9 = vsub.f32 %v6192_v38, %v2278_v1  ;;  %v4448_v1 = vor.u32 %v4680_v15, %v4447_v51  ;;  %v4666_v51 = vld [vmem:[#allocation5 + $0x4c] sm:$0xf]  ;;  %v4401_v15 = vld [vmem:[#allocation5 + $0x58] sm:$0xf0] }
 0x772   :  { %2808 = vmatpush.bf16.msrb.mxu1 %v4408_v42  ;;  %v4404_v45 = vor.u32 %v4666_v51, %v4401_v15  ;;  %v4361_v42 = vld [vmem:[#allocation5 + $0x10] sm:$0xf0] }
 0x773   :  { %v2310_v16 = vmul.f32 %v6259_v9, %v6259_v9  ;;  %2904 = vmatpush.bf16.msra.mxu3 %v4448_v1  ;;  %v4375_v1 = vld [vmem:[#allocation5 + $0x20] sm:$0xf]  ;;  %v4364_v39 = vor.u32 %v4657_v19, %v4361_v42 }
 0x774   :  { %2856 = vmatpush.bf16.msra.mxu2 %v4428_v24  ;;  %v4385_v24 = vld [vmem:[#allocation5 + $0x38] sm:$0xf0] }
 0x775   :  { %2332 = vadd.xlane.f32.xlu2 %v2310_v16  ;;  %2264 = vadd.xlane.f32.xlu1 %v6262_v21  ;;  %v4449_v16 = vld [vmem:[#allocation5 + $0xb8] sm:$0xf0]  ;;  %v4388_v56 = vor.u32 %v4662_v25, %v4385_v24  ;;  %v7199_v25 = vld [vmem:[#allocation14_spill] sm:$0xff] }
 0x776   :  { %v4452_v57 = vor.u32 %v4678_v50, %v4449_v16  ;;  %2809 = vmatpush.bf16.msrb.mxu1 %v4392_v43  ;;  %v4663_v50 = vld [vmem:[#allocation5 + $0x2c] sm:$0xf0]  ;;  %v4661_v16 = vld [vmem:[#allocation5 + $0x24] sm:$0xf]  ;;  %v2219_v24 = vadd.f32 %v2201_v11, %v7199_v25 }
 0x777   :  { %2905 = vmatpush.bf16.msra.mxu3 %v4432_v44  ;;  %v4380_v5 = vor.u32 %v4661_v16, %v4377_v13 }
 0x778   :  { %2953 = vmatpush.bf16.msra.mxu0 %v4452_v57  ;;  %2857 = vmatpush.bf16.msra.mxu2 %v4412_v23  ;;  %v4376_v57 = vor.u32 %v4663_v50, %v4375_v1  ;;  %v4658_v23 = vld [vmem:[#allocation5 + $0xc] sm:$0xf]  ;;  %v6299_v19 = vadd.f32 %v6150_v28, %v2219_v24 }
 0x77a   :  { %2810 = vmatpush.bf16.msrb.mxu1 %v4376_v57  ;;  %7200 = vst [vmem:[#allocation14_spill] sm:$0xff] %v6299_v19 }
 0x77b   :  { %2906 = vmatpush.bf16.msra.mxu3 %v4416_v47  ;;  %v4369_v47 = vld [vmem:[#allocation5 + $0x18] sm:$0xf0] }
 0x77c   :  { %2954 = vmatpush.bf16.msra.mxu0 %v4436_v26  ;;  %2858 = vmatpush.bf16.msra.mxu2 %v4396_v12  ;;  %v4659_v26 = vld [vmem:[#allocation5 + $0xc] sm:$0xf0]  ;;  %v4372_v46 = vor.u32 %v4658_v23, %v4369_v47 }
 0x77d   :  { %2266 = vadd.xlane.f32.xlu2 %v6269_v61  ;;  %v4360_v58 = vor.u32 %v4659_v26, %v4359_v40 }
 0x77f   :  { %2907 = vmatpush.bf16.msra.mxu3 %v4400_v63  ;;  %2811 = vmatpush.bf16.msrb.mxu1 %v4360_v58  ;;  %v6304_v58 = vld [vmem:[%s7150_s3 + $0x8] ss:$0 sm:$0xff] }
 0x780   :  { %2955 = vmatpush.bf16.msra.mxu0 %v4420_v59  ;;  %2859 = vmatpush.bf16.msra.mxu2 %v4380_v5 }
 0x783   :  { %2908 = vmatpush.bf16.msra.mxu3 %v4384_v22 }
 0x784   :  { %2956 = vmatpush.bf16.msra.mxu0 %v4404_v45  ;;  %2860 = vmatpush.bf16.msra.mxu2 %v4364_v39 }
 0x785   :  { %2268 = vadd.xlane.f32.xlu2 %v6274_v10 }
 0x787   :  { %2909 = vmatpush.bf16.msra.mxu3 %v4368_v37 }
 0x788   :  { %2957 = vmatpush.bf16.msra.mxu0 %v4388_v56  ;;  %v6295_v56 = vld [vmem:[%s7150_s3 + $0x7] ss:$0 sm:$0xff] }
 0x78c   :  { %2958 = vmatpush.bf16.msra.mxu0 %v4372_v46 }
 0x798   :  { %v2321_v20 = vpop.xlane.xlu2 %2320 }
 0x799   :  { %v2352_v44 = vmul.f32 %v2321_v20, %v5299_v33 }
 0x79b   :  { %v2368_v0 = vadd.f32 1e-05, %v2352_v44 }
 0x79d   :  { %4952 = vrsqrt.f32 %v2368_v0  ;;  %vm2390_vm5 = vweird.f32 %v2368_v0 }
 0x7a0   :  { %v2323_v59 = vpop.xlane.xlu0 %2322  ;;  %v2255_v36 = vpop.xlane.xlu2 %2254 }
 0x7a1   :  { %v2353_v8 = vmul.f32 %v2323_v59, %v5299_v33  ;;  %v2279_v55 = vmul.f32 %v2255_v36, %v5299_v33 }
 0x7a3   :  { %v4953_v43 = vpop.eup %4952  ;;  %v2369_v2 = vadd.f32 1e-05, %v2353_v8  ;;  %v6281_v32 = vsub.f32 %v6207_v31, %v2279_v55 }
 0x7a4   :  { %v2385_v60 = vmul.f32 %v4953_v43, %v2368_v0  ;;  %vm2391_vm0 = vweird.f32 %v4953_v43 }
 0x7a5   :  { %4954 = vrsqrt.f32 %v2369_v2  ;;  %v2311_v12 = vmul.f32 %v6281_v32, %v6281_v32  ;;  %vm2392_vm6 = vmor %vm2390_vm5, %vm2391_vm0  ;;  %vm2400_vm8 = vweird.f32 %v2369_v2 }
 0x7a6   :  { %v2386_v63 = vmul.f32 %v4953_v43, %v2385_v60 }
 0x7a7   :  { %2334 = vadd.xlane.f32.xlu0 %v2311_v12 }
 0x7a8   :  { %v2387_v51 = vmul.f32 0.5, %v2386_v63  ;;  %v2257_v15 = vpop.xlane.xlu2 %2256 }
 0x7a9   :  { %v2280_v45 = vmul.f32 %v2257_v15, %v5299_v33 }
 0x7aa   :  { %v2388_v1 = vsub.f32 1.5, %v2387_v51 }
 0x7ab   :  { %v4955_v50 = vpop.eup %4954  ;;  %v6287_v16 = vsub.f32 %v6214_v30, %v2280_v45 }
 0x7ac   :  { %v2389_v57 = vmul.f32 %v4953_v43, %v2388_v1  ;;  %v2395_v13 = vmul.f32 %v4955_v50, %v2369_v2  ;;  %vm2401_vm7 = vweird.f32 %v4955_v50 }
 0x7ad   :  { %v2312_v17 = vmul.f32 %v6287_v16, %v6287_v16  ;;  %vm2402_vm9 = vmor %vm2400_vm8, %vm2401_vm7 }
 0x7ae   :  { %v2396_v20 = vmul.f32 %v4955_v50, %v2395_v13  ;;  %v2393_v5 = vsel %vm2392_vm6, %v4953_v43, %v2389_v57 }
 0x7af   :  { %2336 = vadd.xlane.f32.xlu0 %v2312_v17  ;;  %v2544_v40 = vmul.f32 %v2393_v5, %v6197_v4 }
 0x7b0   :  { %v2397_v22 = vmul.f32 0.5, %v2396_v20 }
 0x7b1   :  { %v2561_v42 = vmul.f32 %v6295_v56, %v2544_v40 }
 0x7b2   :  { %v2398_v44 = vsub.f32 1.5, %v2397_v22 }
 0x7b3   :  { %v2578_v39 = vadd.f32 %v6304_v58, %v2561_v42 }
 0x7b4   :  { %v2399_v26 = vmul.f32 %v4955_v50, %v2398_v44 }
 0x7b6   :  { %v2403_v0 = vsel %vm2402_vm9, %v4955_v50, %v2399_v26 }
 0x7b7   :  { %v2545_v54 = vmul.f32 %v2403_v0, %v6204_v34  ;;  %2270 = vadd.xlane.f32.xlu0 %v6299_v19 }
 0x7b9   :  { %v2562_v4 = vmul.f32 %v6295_v56, %v2545_v54 }
 0x7bb   :  { %v2579_v28 = vadd.f32 %v6304_v58, %v2562_v4 }
 0x7bd   :  { %v2594_v3 = vpack.c.bf16 %v2579_v28, %v2578_v39 }
 0x7bf   :  { %2812 = vmatmul.bf16.vlgmr.msrb.gmra.mxu1 %v2594_v3  ;;  %2861 = vmatmul.bf16.vlgmr.msra.gmra.mxu2 %v2594_v3 }
 0x7c0   :  { %2910 = vmatmul.bf16.vlgmr.msra.gmra.mxu3 %v2594_v3  ;;  %2959 = vmatmul.bf16.vlgmr.msra.gmra.mxu0 %v2594_v3 }
 0x7c8   :  { %v2325_v23 = vpop.xlane.xlu0 %2324 }
 0x7c9   :  { %v2354_v47 = vmul.f32 %v2325_v23, %v5299_v33 }
 0x7cb   :  { %v2370_v37 = vadd.f32 1e-05, %v2354_v47 }
 0x7cd   :  { %4956 = vrsqrt.f32 %v2370_v37  ;;  %vm2410_vm11 = vweird.f32 %v2370_v37 }
 0x7d0   :  { %v2327_v46 = vpop.xlane.xlu1 %2326  ;;  %v2259_v34 = vpop.xlane.xlu0 %2258 }
 0x7d1   :  { %v2355_v59 = vmul.f32 %v2327_v46, %v5299_v33  ;;  %v2281_v36 = vmul.f32 %v2259_v34, %v5299_v33 }
 0x7d3   :  { %v4957_v8 = vpop.eup %4956  ;;  %v2371_v55 = vadd.f32 1e-05, %v2355_v59  ;;  %v6316_v43 = vsub.f32 %v6229_v27, %v2281_v36 }
 0x7d4   :  { %v2405_v2 = vmul.f32 %v4957_v8, %v2370_v37  ;;  %vm2411_vm10 = vweird.f32 %v4957_v8 }
 0x7d5   :  { %4958 = vrsqrt.f32 %v2371_v55  ;;  %v2313_v60 = vmul.f32 %v6316_v43, %v6316_v43  ;;  %vm2412_vm12 = vmor %vm2410_vm11, %vm2411_vm10  ;;  %vm2420_vm14 = vweird.f32 %v2371_v55 }
 0x7d6   :  { %v2406_v12 = vmul.f32 %v4957_v8, %v2405_v2 }
 0x7d7   :  { %2338 = vadd.xlane.f32.xlu1 %v2313_v60 }
 0x7d8   :  { %v2407_v63 = vmul.f32 0.5, %v2406_v12  ;;  %v2329_v51 = vpop.xlane.xlu1 %2328  ;;  %v2261_v15 = vpop.xlane.xlu0 %2260 }
 0x7d9   :  { %v2356_v45 = vmul.f32 %v2329_v51, %v5299_v33  ;;  %v2282_v1 = vmul.f32 %v2261_v15, %v5299_v33 }
 0x7da   :  { %v2408_v50 = vsub.f32 1.5, %v2407_v63 }
 0x7db   :  { %v4959_v57 = vpop.eup %4958  ;;  %v2372_v13 = vadd.f32 1e-05, %v2356_v45  ;;  %v6323_v17 = vsub.f32 %v6240_v53, %v2282_v1 }
 0x7dc   :  { %v2409_v11 = vmul.f32 %v4957_v8, %v2408_v50  ;;  %v2415_v20 = vmul.f32 %v4959_v57, %v2371_v55  ;;  %vm2421_vm13 = vweird.f32 %v4959_v57 }
 0x7dd   :  { %4960 = vrsqrt.f32 %v2372_v13  ;;  %v2314_v5 = vmul.f32 %v6323_v17, %v6323_v17  ;;  %vm2422_vm15 = vmor %vm2420_vm14, %vm2421_vm13  ;;  %vm2430_vm2 = vweird.f32 %v2372_v13 }
 0x7de   :  { %v2416_v22 = vmul.f32 %v4959_v57, %v2415_v20  ;;  %v2413_v25 = vsel %vm2412_vm12, %v4957_v8, %v2409_v11 }
 0x7df   :  { %2340 = vadd.xlane.f32.xlu1 %v2314_v5  ;;  %v2546_v4 = vmul.f32 %v2413_v25, %v6219_v6 }
 0x7e0   :  { %v2417_v24 = vmul.f32 0.5, %v2416_v22  ;;  %v2331_v44 = vpop.xlane.xlu2 %2330  ;;  %v2263_v40 = vpop.xlane.xlu1 %2262 }
 0x7e1   :  { %v2357_v26 = vmul.f32 %v2331_v44, %v5299_v33  ;;  %v2283_v0 = vmul.f32 %v2263_v40, %v5299_v33  ;;  %v2563_v59 = vmul.f32 %v6295_v56, %v2546_v4 }
 0x7e2   :  { %v2418_v42 = vsub.f32 1.5, %v2417_v24 }
 0x7e3   :  { %v4961_v54 = vpop.eup %4960  ;;  %v2373_v39 = vadd.f32 1e-05, %v2357_v26  ;;  %v6331_v28 = vsub.f32 %v6251_v35, %v2283_v0  ;;  %v2580_v51 = vadd.f32 %v6304_v58, %v2563_v59 }
 0x7e4   :  { %v2419_v3 = vmul.f32 %v4959_v57, %v2418_v42  ;;  %v2425_v23 = vmul.f32 %v4961_v54, %v2372_v13  ;;  %vm2431_vm1 = vweird.f32 %v4961_v54 }
 0x7e5   :  { %4962 = vrsqrt.f32 %v2373_v39  ;;  %v2315_v47 = vmul.f32 %v6331_v28, %v6331_v28  ;;  %vm2432_vm3 = vmor %vm2430_vm2, %vm2431_vm1  ;;  %vm2440_vm0 = vweird.f32 %v2373_v39 }
 0x7e6   :  { %v2423_v37 = vsel %vm2422_vm15, %v4959_v57, %v2419_v3  ;;  %v2426_v46 = vmul.f32 %v4961_v54, %v2425_v23 }
 0x7e7   :  { %v2547_v34 = vmul.f32 %v2423_v37, %v6226_v7  ;;  %2342 = vadd.xlane.f32.xlu2 %v2315_v47 }
 0x7e8   :  { %v2427_v6 = vmul.f32 0.5, %v2426_v46  ;;  %v2333_v36 = vpop.xlane.xlu2 %2332  ;;  %v2265_v8 = vpop.xlane.xlu1 %2264 }
 0x7e9   :  { %v2284_v2 = vmul.f32 %v2265_v8, %v5299_v33  ;;  %v2564_v55 = vmul.f32 %v6295_v56, %v2547_v34 }
 0x7ea   :  { %v2428_v60 = vsub.f32 1.5, %v2427_v6 }
 0x7eb   :  { %v4963_v12 = vpop.eup %4962  ;;  %v6340_v63 = vsub.f32 %v6262_v21, %v2284_v2  ;;  %v2581_v15 = vadd.f32 %v6304_v58, %v2564_v55 }
 0x7ec   :  { %v2429_v7 = vmul.f32 %v4961_v54, %v2428_v60  ;;  %v2435_v45 = vmul.f32 %v4963_v12, %v2373_v39  ;;  %vm2441_vm4 = vweird.f32 %v4963_v12 }
 0x7ed   :  { %v2595_v1 = vpack.c.bf16 %v2581_v15, %v2580_v51  ;;  %v2316_v50 = vmul.f32 %v6340_v63, %v6340_v63  ;;  %vm2442_vm5 = vmor %vm2440_vm0, %vm2441_vm4 }
 0x7ee   :  { %v2436_v57 = vmul.f32 %v4963_v12, %v2435_v45  ;;  %v2433_v11 = vsel %vm2432_vm3, %v4961_v54, %v2429_v7 }
 0x7ef   :  { %2817 = vmatmul.bf16.gmra.mxu1 %v2595_v1  ;;  %2866 = vmatmul.bf16.gmra.mxu2 %v2595_v1  ;;  %v2548_v24 = vmul.f32 %v2433_v11, %v6237_v49 }
 0x7f0   :  { %v2437_v20 = vmul.f32 0.5, %v2436_v57  ;;  %2915 = vmatmul.bf16.gmra.mxu3 %v2595_v1  ;;  %2964 = vmatmul.bf16.gmra.mxu0 %v2595_v1  ;;  %v2267_v5 = vpop.xlane.xlu2 %2266 }
 0x7f1   :  { %2344 = vadd.xlane.f32.xlu0 %v2316_v50  ;;  %v2285_v22 = vmul.f32 %v2267_v5, %v5299_v33  ;;  %v2565_v42 = vmul.f32 %v6295_v56, %v2548_v24 }
 0x7f2   :  { %v2438_v25 = vsub.f32 1.5, %v2437_v20 }
 0x7f3   :  { %v6349_v44 = vsub.f32 %v6269_v61, %v2285_v22  ;;  %v2582_v39 = vadd.f32 %v6304_v58, %v2565_v42 }
 0x7f4   :  { %v2439_v13 = vmul.f32 %v4963_v12, %v2438_v25 }
 0x7f5   :  { %v2317_v40 = vmul.f32 %v6349_v44, %v6349_v44 }
 0x7f6   :  { %v2443_v26 = vsel %vm2442_vm5, %v4963_v12, %v2439_v13 }
 0x7f7   :  { %v2549_v0 = vmul.f32 %v2443_v26, %v6248_v29  ;;  %2346 = vadd.xlane.f32.xlu1 %v2317_v40  ;;  %v2358_v29 = vmul.f32 %v2333_v36, %v5299_v33 }
 0x7f8   :  { %v2269_v54 = vpop.xlane.xlu2 %2268 }
 0x7f9   :  { %v2286_v4 = vmul.f32 %v2269_v54, %v5299_v33  ;;  %v2566_v49 = vmul.f32 %v6295_v56, %v2549_v0  ;;  %v2374_v46 = vadd.f32 1e-05, %v2358_v29 }
 0x7fb   :  { %v6358_v3 = vsub.f32 %v6274_v10, %v2286_v4  ;;  %v2583_v23 = vadd.f32 %v6304_v58, %v2566_v49  ;;  %4964 = vrsqrt.f32 %v2374_v46  ;;  %vm2450_vm7 = vweird.f32 %v2374_v46  ;;  %v4697_v10 = vld [vmem:[#allocation2 + $0x160] sm:$0xff] }
 0x7fd   :  { %v2596_v47 = vpack.c.bf16 %v2583_v23, %v2582_v39  ;;  %v2318_v37 = vmul.f32 %v6358_v3, %v6358_v3 }
 0x7ff   :  { %2822 = vmatmul.bf16.gmra.mxu1 %v2596_v47  ;;  %2871 = vmatmul.bf16.gmra.mxu2 %v2596_v47 }
 0x800   :  { %2920 = vmatmul.bf16.gmra.mxu3 %v2596_v47  ;;  %2969 = vmatmul.bf16.gmra.mxu0 %v2596_v47 }
 0x801   :  { %2348 = vadd.xlane.f32.xlu2 %v2318_v37  ;;  %v4965_v34 = vpop.eup %4964 }
 0x802   :  { %v2445_v59 = vmul.f32 %v4965_v34, %v2374_v46  ;;  %vm2451_vm6 = vweird.f32 %v4965_v34 }
 0x803   :  { %vm2452_vm8 = vmor %vm2450_vm7, %vm2451_vm6 }
 0x804   :  { %v2446_v6 = vmul.f32 %v4965_v34, %v2445_v59 }
 0x806   :  { %v2447_v60 = vmul.f32 0.5, %v2446_v6 }
 0x808   :  { %v2448_v12 = vsub.f32 1.5, %v2447_v60 }
 0x80a   :  { %v2449_v7 = vmul.f32 %v4965_v34, %v2448_v12 }
 0x80c   :  { %v2453_v36 = vsel %vm2452_vm8, %v4965_v34, %v2449_v7 }
 0x80d   :  { %v2550_v5 = vmul.f32 %v2453_v36, %v6259_v9 }
 0x80f   :  { %v2567_v26 = vmul.f32 %v6295_v56, %v2550_v5 }
 0x811   :  { %v2584_v42 = vadd.f32 %v6304_v58, %v2567_v26 }
 0x81a   :  { %v2335_v8 = vpop.xlane.xlu0 %2334 }
 0x81b   :  { %v2359_v2 = vmul.f32 %v2335_v8, %v5299_v33 }
 0x81d   :  { %v2375_v55 = vadd.f32 1e-05, %v2359_v2 }
 0x81f   :  { %4966 = vrsqrt.f32 %v2375_v55  ;;  %vm2460_vm10 = vweird.f32 %v2375_v55 }
 0x822   :  { %v2337_v51 = vpop.xlane.xlu0 %2336 }
 0x823   :  { %v2360_v4 = vmul.f32 %v2337_v51, %v5299_v33 }
 0x825   :  { %v4967_v15 = vpop.eup %4966  ;;  %v2376_v49 = vadd.f32 1e-05, %v2360_v4 }
 0x826   :  { %v2455_v45 = vmul.f32 %v4967_v15, %v2375_v55  ;;  %vm2461_vm9 = vweird.f32 %v4967_v15 }
 0x827   :  { %vm2462_vm11 = vmor %vm2460_vm10, %vm2461_vm9  ;;  %4968 = vrsqrt.f32 %v2376_v49  ;;  %vm2470_vm13 = vweird.f32 %v2376_v49 }
 0x828   :  { %v2456_v1 = vmul.f32 %v4967_v15, %v2455_v45 }
 0x82a   :  { %v2457_v50 = vmul.f32 0.5, %v2456_v1  ;;  %v2271_v57 = vpop.xlane.xlu0 %2270 }
 0x82b   :  { %v2287_v11 = vmul.f32 %v2271_v57, %v5299_v33 }
 0x82c   :  { %v2458_v20 = vsub.f32 1.5, %v2457_v50 }
 0x82d   :  { %v6369_v22 = vsub.f32 %v6299_v19, %v2287_v11  ;;  %v4969_v39 = vpop.eup %4968 }
 0x82e   :  { %v2459_v25 = vmul.f32 %v4967_v15, %v2458_v20  ;;  %vm2471_vm12 = vweird.f32 %v4969_v39 }
 0x82f   :  { %v2319_v24 = vmul.f32 %v6369_v22, %v6369_v22  ;;  %vm2472_vm14 = vmor %vm2470_vm13, %vm2471_vm12 }
 0x830   :  { %v2463_v13 = vsel %vm2462_vm11, %v4967_v15, %v2459_v25 }
 0x831   :  { %v2551_v40 = vmul.f32 %v2463_v13, %v6281_v32  ;;  %2350 = vadd.xlane.f32.xlu0 %v2319_v24  ;;  %v2465_v32 = vmul.f32 %v4969_v39, %v2376_v49 }
 0x833   :  { %v2568_v0 = vmul.f32 %v6295_v56, %v2551_v40  ;;  %v2466_v37 = vmul.f32 %v4969_v39, %v2465_v32 }
 0x835   :  { %v2585_v9 = vadd.f32 %v6304_v58, %v2568_v0  ;;  %v2467_v46 = vmul.f32 0.5, %v2466_v37 }
 0x837   :  { %v2597_v54 = vpack.c.bf16 %v2585_v9, %v2584_v42  ;;  %v2468_v8 = vsub.f32 1.5, %v2467_v46 }
 0x839   :  { %2827 = vmatmul.bf16.gmra.mxu1 %v2597_v54  ;;  %2876 = vmatmul.bf16.gmra.mxu2 %v2597_v54  ;;  %v2469_v55 = vmul.f32 %v4969_v39, %v2468_v8 }
 0x83a   :  { %2925 = vmatmul.bf16.gmra.mxu3 %v2597_v54  ;;  %2974 = vmatmul.bf16.gmra.mxu0 %v2597_v54 }
 0x83b   :  { %v2473_v45 = vsel %vm2472_vm14, %v4969_v39, %v2469_v55 }
 0x83c   :  { %v2552_v11 = vmul.f32 %v2473_v45, %v6287_v16 }
 0x83e   :  { %v2569_v42 = vmul.f32 %v6295_v56, %v2552_v11  ;;  %v2635_v11 = vld [vmem:[#allocation5 + $0x108] sm:$0x11] }
 0x840   :  { %v2586_v39 = vadd.f32 %v6304_v58, %v2569_v42  ;;  %v2638_v42 = vunpack.c.l.bf16 %v2635_v11 }
 0x84a   :  { %v2339_v23 = vpop.xlane.xlu1 %2338 }
 0x84b   :  { %v2361_v47 = vmul.f32 %v2339_v23, %v5299_v33 }
 0x84d   :  { %v2377_v29 = vadd.f32 1e-05, %v2361_v47 }
 0x84f   :  { %4970 = vrsqrt.f32 %v2377_v29  ;;  %vm2480_vm1 = vweird.f32 %v2377_v29 }
 0x852   :  { %v2341_v34 = vpop.xlane.xlu1 %2340 }
 0x853   :  { %v2362_v59 = vmul.f32 %v2341_v34, %v5299_v33 }
 0x855   :  { %v2378_v6 = vadd.f32 1e-05, %v2362_v59  ;;  %v4971_v2 = vpop.eup %4970 }
 0x856   :  { %v2475_v60 = vmul.f32 %v4971_v2, %v2377_v29  ;;  %vm2481_vm15 = vweird.f32 %v4971_v2 }
 0x857   :  { %4972 = vrsqrt.f32 %v2378_v6  ;;  %vm2482_vm2 = vmor %vm2480_vm1, %vm2481_vm15  ;;  %vm2490_vm0 = vweird.f32 %v2378_v6 }
 0x858   :  { %v2476_v15 = vmul.f32 %v4971_v2, %v2475_v60 }
 0x85a   :  { %v2343_v12 = vpop.xlane.xlu2 %2342  ;;  %v2477_v1 = vmul.f32 0.5, %v2476_v15  ;;  %v2813_v15 = vpop.f32.mrf.mxu1 }
 0x85b   :  { %v2363_v51 = vmul.f32 %v2343_v12, %v5299_v33 }
 0x85c   :  { %v2478_v50 = vsub.f32 1.5, %v2477_v1 }
 0x85d   :  { %v2379_v7 = vadd.f32 1e-05, %v2363_v51  ;;  %v4973_v36 = vpop.eup %4972  ;;  %v2634_v51 = vld [vmem:[#allocation5 + $0x100] sm:$0x11] }
 0x85e   :  { %v2485_v57 = vmul.f32 %v4973_v36, %v2378_v6  ;;  %v2479_v20 = vmul.f32 %v4971_v2, %v2478_v50  ;;  %vm2491_vm3 = vweird.f32 %v4973_v36 }
 0x85f   :  { %4974 = vrsqrt.f32 %v2379_v7  ;;  %vm2492_vm5 = vmor %vm2490_vm0, %vm2491_vm3  ;;  %vm2500_vm6 = vweird.f32 %v2379_v7 }
 0x860   :  { %v2486_v5 = vmul.f32 %v4973_v36, %v2485_v57  ;;  %v2483_v25 = vsel %vm2482_vm2, %v4971_v2, %v2479_v20  ;;  %v2636_v57 = vunpack.c.l.bf16 %v2634_v51  ;;  %v2960_v20 = vpop.f32.mrf.mxu0 }
 0x861   :  { %v2553_v40 = vmul.f32 %v2483_v25, %v6316_v43 }
 0x862   :  { %v2487_v26 = vmul.f32 0.5, %v2486_v5 }
 0x863   :  { %v2570_v4 = vmul.f32 %v6295_v56, %v2553_v40  ;;  %v6402_v40 = vperm.slane %v2636_v57, 0 }
 0x864   :  { %v2345_v24 = vpop.xlane.xlu0 %2344  ;;  %v2488_v49 = vsub.f32 1.5, %v2487_v26  ;;  %v2637_v26 = vunpack.c.h.bf16 %v2634_v51 }
 0x865   :  { %v4975_v13 = vpop.eup %4974  ;;  %v2364_v0 = vmul.f32 %v2345_v24, %v5299_v33  ;;  %v2587_v32 = vadd.f32 %v6304_v58, %v2570_v4  ;;  %v2639_v24 = vunpack.c.h.bf16 %v2635_v11 }
 0x866   :  { %v2495_v9 = vmul.f32 %v4975_v13, %v2379_v7  ;;  %v2489_v46 = vmul.f32 %v4973_v36, %v2488_v49  ;;  %vm2501_vm4 = vweird.f32 %v4975_v13 }
 0x867   :  { %v6386_v54 = vadd.f32 1e-05, %v2364_v0  ;;  %v2598_v47 = vpack.c.bf16 %v2587_v32, %v2586_v39  ;;  %vm2502_vm7 = vmor %vm2500_vm6, %vm2501_vm4  ;;  %v6406_v49 = vperm.slane %v2639_v24, 0  ;;  %v2815_v39 = vpop.f32.mrf.mxu1 }
 0x868   :  { %v2496_v16 = vmul.f32 %v4975_v13, %v2495_v9  ;;  %v2493_v55 = vsel %vm2492_vm5, %v4973_v36, %v2489_v46  ;;  %v6418_v46 = vadd.f32 %v2815_v39, %v6402_v40 }
 0x869   :  { %4976 = vrsqrt.f32 %v6386_v54  ;;  %2832 = vmatmul.bf16.gmra.mxu1 %v2598_v47  ;;  %2881 = vmatmul.bf16.gmra.mxu2 %v2598_v47  ;;  %v2554_v6 = vmul.f32 %v2493_v55, %v6323_v17  ;;  %v2862_v17 = vpop.f32.mrf.mxu2  ;;  %vm2510_vm10 = vweird.f32 %v6386_v54 }
 0x86a   :  { %v2497_v23 = vmul.f32 0.5, %v2496_v16  ;;  %v2347_v43 = vpop.xlane.xlu1 %2346  ;;  %2930 = vmatmul.bf16.gmra.mxu3 %v2598_v47  ;;  %2979 = vmatmul.bf16.gmra.mxu0 %v2598_v47  ;;  %v2911_v16 = vpop.f32.mrf.mxu3  ;;  %v6413_v47 = vadd.f32 %v2813_v15, %v6402_v40  ;;  %v3004_v15 = vmul.f32 %v6418_v46, %v6418_v46 }
 0x86b   :  { %v2365_v37 = vmul.f32 %v2347_v43, %v5299_v33  ;;  %v2571_v25 = vmul.f32 %v6295_v56, %v2554_v6 }
 0x86c   :  { %v2498_v29 = vsub.f32 1.5, %v2497_v23  ;;  %v6408_v23 = vperm.slane %v2637_v26, 0 }
 0x86d   :  { %v2381_v34 = vadd.f32 1e-05, %v2365_v37  ;;  %v2588_v9 = vadd.f32 %v6304_v58, %v2571_v25  ;;  %v6415_v37 = vperm.slane %v2638_v42, 0 }
 0x86e   :  { %v2499_v59 = vmul.f32 %v4975_v13, %v2498_v29  ;;  %v6425_v55 = vadd.f32 %v2862_v17, %v6408_v23 }
 0x86f   :  { %v6393_v8 = vpop.eup %4976  ;;  %4978 = vrsqrt.f32 %v2381_v34  ;;  %7201 = vst [vmem:[#allocation27_spill] sm:$0xff] %v6415_v37  ;;  %vm2520_vm12 = vweird.f32 %v2381_v34  ;;  %v6431_v51 = vadd.f32 %v2911_v16, %v6415_v37 }
 0x870   :  { %v2505_v2 = vmul.f32 %v6393_v8, %v6386_v54  ;;  %v2503_v60 = vsel %vm2502_vm7, %v4975_v13, %v2499_v59  ;;  %vm2511_vm8 = vweird.f32 %v6393_v8  ;;  %v6422_v59 = vadd.f32 %v2960_v20, %v6406_v49 }
 0x871   :  { %v2555_v45 = vmul.f32 %v2503_v60, %v6331_v28  ;;  %vm2512_vm11 = vmor %vm2510_vm10, %vm2511_vm8  ;;  %v3068_v20 = vmul.f32 %v3004_v15, %v6418_v46 }
 0x872   :  { %v2506_v12 = vmul.f32 %v6393_v8, %v2505_v2  ;;  %v2962_v2 = vpop.f32.mrf.mxu0  ;;  %v2913_v57 = vpop.f32.mrf.mxu3 }
 0x873   :  { %v2572_v36 = vmul.f32 %v6295_v56, %v2555_v45  ;;  %v6436_v6 = vadd.f32 %v2962_v2, %v6406_v49  ;;  %v2864_v45 = vpop.f32.mrf.mxu2  ;;  %v3132_v42 = vmul.f32 0.044715, %v3068_v20 }
 0x874   :  { %v2507_v7 = vmul.f32 0.5, %v2506_v12  ;;  %v3000_v12 = vmul.f32 %v6413_v47, %v6413_v47  ;;  %v6451_v25 = vadd.f32 %v2864_v45, %v6408_v23  ;;  %v2349_v17 = vpop.xlane.xlu2 %2348 }
 0x875   :  { %v4979_v1 = vpop.eup %4978  ;;  %v2589_v4 = vadd.f32 %v6304_v58, %v2572_v36  ;;  %v6455_v36 = vadd.f32 %v2913_v57, %v6415_v37 }
 0x876   :  { %v2515_v50 = vmul.f32 %v4979_v1, %v2381_v34  ;;  %v2508_v0 = vsub.f32 1.5, %v2507_v7  ;;  %vm2521_vm9 = vweird.f32 %v4979_v1  ;;  %v3003_v34 = vmul.f32 %v6422_v59, %v6422_v59 }
 0x877   :  { %v2599_v32 = vpack.c.bf16 %v2589_v4, %v2588_v9  ;;  %vm2522_vm13 = vmor %vm2520_vm12, %vm2521_vm9  ;;  %v3002_v7 = vmul.f32 %v6431_v51, %v6431_v51  ;;  %v3005_v9 = vmul.f32 %v6451_v25, %v6451_v25  ;;  %v3006_v16 = vmul.f32 %v6455_v36, %v6455_v36 }
 0x878   :  { %v2516_v5 = vmul.f32 %v4979_v1, %v2515_v50  ;;  %v2509_v43 = vmul.f32 %v6393_v8, %v2508_v0  ;;  %v3001_v50 = vmul.f32 %v6425_v55, %v6425_v55 }
 0x879   :  { %2837 = vmatmul.bf16.gmra.mxu1 %v2599_v32  ;;  %2886 = vmatmul.bf16.gmra.mxu2 %v2599_v32  ;;  %v3066_v0 = vmul.f32 %v3002_v7, %v6431_v51  ;;  %v3069_v15 = vmul.f32 %v3005_v9, %v6451_v25  ;;  %v3070_v45 = vmul.f32 %v3006_v16, %v6455_v36  ;;  %v4712_v9 = vld [vmem:[#allocation2 + $0x1d8] sm:$0xff] }
 0x87a   :  { %v2517_v13 = vmul.f32 0.5, %v2516_v5  ;;  %2935 = vmatmul.bf16.gmra.mxu3 %v2599_v32  ;;  %2984 = vmatmul.bf16.gmra.mxu0 %v2599_v32  ;;  %v2513_v60 = vsel %vm2512_vm11, %v6393_v8, %v2509_v43  ;;  %v3007_v5 = vmul.f32 %v6436_v6, %v6436_v6  ;;  %v3065_v24 = vmul.f32 %v3001_v50, %v6425_v55 }
 0x87b   :  { %v2556_v8 = vmul.f32 %v2513_v60, %v6340_v63  ;;  %v3067_v63 = vmul.f32 %v3003_v34, %v6422_v59  ;;  %v3130_v2 = vmul.f32 0.044715, %v3066_v0  ;;  %v3133_v7 = vmul.f32 0.044715, %v3069_v15  ;;  %v2818_v0 = vpop.f32.mrf.mxu1  ;;  %3962 = vmatpush.bf16.msrb.mxu3 %v4712_v9 }
 0x87c   :  { %v2518_v28 = vsub.f32 1.5, %v2517_v13  ;;  %v3129_v43 = vmul.f32 0.044715, %v3065_v24 }
 0x87d   :  { %v3131_v4 = vmul.f32 0.044715, %v3067_v63  ;;  %v3194_v57 = vadd.f32 %v3130_v2, %v6431_v51 }
 0x87e   :  { %v2519_v29 = vmul.f32 %v4979_v1, %v2518_v28  ;;  %v3071_v28 = vmul.f32 %v3007_v5, %v6436_v6  ;;  %v3134_v5 = vmul.f32 0.044715, %v3070_v45 }
 0x87f   :  { %v3195_v34 = vadd.f32 %v3131_v4, %v6422_v59  ;;  %v4720_v4 = vld [vmem:[#allocation2 + $0x218] sm:$0xff] }
 0x880   :  { %v2523_v54 = vsel %vm2522_vm13, %v4979_v1, %v2519_v29  ;;  %v3064_v1 = vmul.f32 %v3000_v12, %v6413_v47  ;;  %v3196_v12 = vadd.f32 %v3132_v42, %v6418_v46  ;;  %v4696_v42 = vld [vmem:[#allocation2 + $0x158] sm:$0xff]  ;;  %4011 = vmatpush.bf16.msrb.mxu0 %v4720_v4 }
 0x881   :  { %v2557_v11 = vmul.f32 %v2523_v54, %v6349_v44  ;;  %v2573_v44 = vmul.f32 %v6295_v56, %v2556_v8  ;;  %v3135_v54 = vmul.f32 0.044715, %v3071_v28  ;;  %v3259_v20 = vmul.f32 0.7978846, %v3195_v34  ;;  %v4704_v28 = vld [vmem:[#allocation2 + $0x198] sm:$0xff]  ;;  %3864 = vmatpush.bf16.msra.mxu1 %v4696_v42 }
 0x882   :  { %v3128_v26 = vmul.f32 0.044715, %v3064_v1  ;;  %3913 = vmatpush.bf16.msrb.mxu2 %v4704_v28 }
 0x883   :  { %v2574_v13 = vmul.f32 %v6295_v56, %v2557_v11  ;;  %v2590_v39 = vadd.f32 %v6304_v58, %v2573_v44  ;;  %v2366_v56 = vmul.f32 %v2349_v17, %v5299_v33  ;;  %v3260_v11 = vmul.f32 0.7978846, %v3196_v12  ;;  %v2965_v17 = vpop.f32.mrf.mxu0 }
 0x884   :  { %v3192_v29 = vadd.f32 %v3128_v26, %v6413_v47  ;;  %v3199_v1 = vadd.f32 %v3135_v54, %v6436_v6  ;;  %v3258_v44 = vmul.f32 0.7978846, %v3194_v57  ;;  %v3198_v26 = vadd.f32 %v3134_v5, %v6455_v36  ;;  %v4711_v5 = vld [vmem:[#allocation2 + $0x1d0] sm:$0xff] }
 0x885   :  { %v2591_v32 = vadd.f32 %v6304_v58, %v2574_v13  ;;  %v3193_v58 = vadd.f32 %v3129_v43, %v6425_v55  ;;  %v6475_v8 = vadd.f32 1e-05, %v2366_v56  ;;  %v3197_v13 = vadd.f32 %v3133_v7, %v6451_v25  ;;  %v4695_v7 = vld [vmem:[#allocation2 + $0x150] sm:$0xff]  ;;  %3963 = vmatpush.bf16.msrb.mxu3 %v4711_v5  ;;  %v4710_v5 = vld [vmem:[#allocation2 + $0x1c8] sm:$0xff] }
 0x886   :  { %v3256_v50 = vmul.f32 0.7978846, %v3192_v29  ;;  %v3263_v24 = vmul.f32 0.7978846, %v3199_v1  ;;  %v3262_v43 = vmul.f32 0.7978846, %v3198_v26  ;;  %v2867_v29 = vpop.f32.mrf.mxu2  ;;  %3865 = vmatpush.bf16.msra.mxu1 %v4695_v7 }
 0x887   :  { %v2600_v60 = vpack.c.bf16 %v2591_v32, %v2590_v39  ;;  %v3257_v63 = vmul.f32 0.7978846, %v3193_v58  ;;  %4980 = vrsqrt.f32 %v6475_v8  ;;  %v3261_v39 = vmul.f32 0.7978846, %v3197_v13  ;;  %v4719_v13 = vld [vmem:[#allocation2 + $0x210] sm:$0xff]  ;;  %v4694_v7 = vld [vmem:[#allocation2 + $0x148] sm:$0xff] }
 0x888   :  { %4982 = vtanh.f32 %v3256_v50  ;;  %v6487_v58 = vadd.f32 %v2818_v0, %v6402_v40  ;;  %4012 = vmatpush.bf16.msrb.mxu0 %v4719_v13  ;;  %vm2530_vm15 = vweird.f32 %v6475_v8 }
 0x889   :  { %2842 = vmatmul.bf16.gmra.mxu1 %v2600_v60  ;;  %2891 = vmatmul.bf16.gmra.mxu2 %v2600_v60  ;;  %4984 = vtanh.f32 %v3260_v11  ;;  %v6490_v11 = vpop.f32.mrf.mxu1 }
 0x88a   :  { %2940 = vmatmul.bf16.gmra.mxu3 %v2600_v60  ;;  %2989 = vmatmul.bf16.gmra.mxu0 %v2600_v60  ;;  %4986 = vtanh.f32 %v3259_v20  ;;  %v2916_v60 = vpop.f32.mrf.mxu3  ;;  %v4703_v20 = vld [vmem:[#allocation2 + $0x190] sm:$0xff]  ;;  %v3008_v4 = vmul.f32 %v6487_v58, %v6487_v58 }
 0x88b   :  { %4988 = vtanh.f32 %v3257_v63  ;;  %3914 = vmatpush.bf16.msrb.mxu2 %v4703_v20  ;;  %v4702_v20 = vld [vmem:[#allocation2 + $0x188] sm:$0xff]  ;;  %3866 = vmatpush.bf16.msra.mxu1 %v4694_v7 }
 0x88c   :  { %4990 = vtanh.f32 %v3258_v44  ;;  %v6492_v44 = vpop.f32.mrf.mxu0  ;;  %3964 = vmatpush.bf16.msrb.mxu3 %v4710_v5 }
 0x88d   :  { %v6482_v16 = vpop.eup %4980  ;;  %4992 = vtanh.f32 %v3263_v24 }
 0x88e   :  { %v4983_v32 = vpop.eup %4982  ;;  %v2525_v12 = vmul.f32 %v6482_v16, %v6475_v8  ;;  %4994 = vtanh.f32 %v3261_v39  ;;  %v6498_v39 = vadd.f32 %v2965_v17, %v6406_v49  ;;  %vm2531_vm14 = vweird.f32 %v6482_v16 }
 0x88f   :  { %v4985_v56 = vpop.eup %4984  ;;  %4996 = vtanh.f32 %v3262_v43  ;;  %v3384_v50 = vadd.f32 1.0, %v4983_v32  ;;  %3915 = vmatpush.bf16.msrb.mxu2 %v4702_v20  ;;  %vm6567_vm1 = vmor %vm2530_vm15, %vm2531_vm14 }
 0x890   :  { %v4987_v2 = vpop.eup %4986  ;;  %v3388_v34 = vadd.f32 1.0, %v4985_v56  ;;  %v2526_v57 = vmul.f32 %v6482_v16, %v2525_v12  ;;  %v6503_v12 = vadd.f32 %v2867_v29, %v6408_v23  ;;  %v3011_v29 = vmul.f32 %v6498_v39, %v6498_v39 }
 0x891   :  { %v4989_v54 = vpop.eup %4988  ;;  %v3387_v63 = vadd.f32 1.0, %v4987_v2 }
 0x892   :  { %v4991_v15 = vpop.eup %4990  ;;  %v3385_v26 = vadd.f32 1.0, %v4989_v54  ;;  %v3452_v28 = vmul.f32 0.5, %v3388_v34  ;;  %v2527_v56 = vmul.f32 0.5, %v2526_v57  ;;  %v2869_v54 = vpop.f32.mrf.mxu2  ;;  %v3072_v57 = vmul.f32 %v3008_v4, %v6487_v58  ;;  %v4709_v4 = vld [vmem:[#allocation2 + $0x1c0] sm:$0xff] }
 0x893   :  { %v4993_v45 = vpop.eup %4992  ;;  %v3386_v42 = vadd.f32 1.0, %v4991_v15  ;;  %v3451_v2 = vmul.f32 0.5, %v3387_v63  ;;  %v4718_v63 = vld [vmem:[#allocation2 + $0x208] sm:$0xff]  ;;  %3965 = vmatpush.bf16.msrb.mxu3 %v4709_v4 }
 0x894   :  { %v3391_v0 = vadd.f32 1.0, %v4993_v45  ;;  %v4995_v9 = vpop.eup %4994  ;;  %v3449_v15 = vmul.f32 0.5, %v3385_v26  ;;  %v6507_v45 = vmul.f32 %v3452_v28, %v6418_v46  ;;  %v2528_v26 = vsub.f32 1.5, %v2527_v56  ;;  %v4693_v46 = vld [vmem:[#allocation2 + $0x140] sm:$0xff]  ;;  %4013 = vmatpush.bf16.msrb.mxu0 %v4718_v63  ;;  %v2970_v53 = vpop.f32.mrf.mxu0 }
 0x895   :  { %v4997_v43 = vpop.eup %4996  ;;  %v3450_v34 = vmul.f32 0.5, %v3386_v42  ;;  %v4701_v42 = vld [vmem:[#allocation2 + $0x180] sm:$0xff]  ;;  %v6516_v28 = vmul.f32 %v3451_v2, %v6422_v59  ;;  %v2823_v2 = vpop.f32.mrf.mxu1  ;;  %v3136_v5 = vmul.f32 0.044715, %v3072_v57  ;;  %v3075_v63 = vmul.f32 %v3011_v29, %v6498_v39  ;;  %3867 = vmatpush.bf16.msra.mxu1 %v4693_v46  ;;  %v4708_v57 = vld [vmem:[#allocation2 + $0x1b8] sm:$0xff] }
 0x896   :  { %v3455_v17 = vmul.f32 0.5, %v3391_v0  ;;  %v3009_v0 = vmul.f32 %v6503_v12, %v6503_v12  ;;  %3916 = vmatpush.bf16.msrb.mxu2 %v4701_v42  ;;  %v6582_v59 = vadd.f32 %v6492_v44, %v6406_v49 }
 0x897   :  { %v3200_v4 = vadd.f32 %v3136_v5, %v6487_v58  ;;  %v4691_v5 = vld [vmem:[#allocation2 + $0x130] sm:$0xff]  ;;  %3966 = vmatpush.bf16.msrb.mxu3 %v4708_v57 }
 0x898   :  { %v6532_v56 = vmul.f32 %v3455_v17, %v6436_v6  ;;  %v3073_v17 = vmul.f32 %v3009_v0, %v6503_v12 }
 0x89a   :  { %v2872_v8 = vpop.f32.mrf.mxu2 }
 0x89c   :  { %v2972_v35 = vpop.f32.mrf.mxu0 }
 0x8a2   :  { %v2874_v30 = vpop.f32.mrf.mxu2 }
 0x8a4   :  { %v2351_v1 = vpop.xlane.xlu0 %2350 }
 0x8a5   :  { %v2367_v24 = vmul.f32 %v2351_v1, %v5299_v33  ;;  %v3448_v33 = vmul.f32 0.5, %v3384_v50  ;;  %v2918_v1 = vpop.f32.mrf.mxu3  ;;  %v3390_v50 = vadd.f32 1.0, %v4997_v43  ;;  %v4717_v43 = vld [vmem:[#allocation2 + $0x200] sm:$0xff] }
 0x8a6   :  { %4014 = vmatpush.bf16.msrb.mxu0 %v4717_v43  ;;  %v3139_v43 = vmul.f32 0.044715, %v3075_v63  ;;  %v4699_v63 = vld [vmem:[#allocation2 + $0x170] sm:$0xff] }
 0x8a7   :  { %v6500_v32 = vadd.f32 1e-05, %v2367_v24  ;;  %v3389_v24 = vadd.f32 1.0, %v4995_v9  ;;  %v6513_v13 = vmul.f32 %v3448_v33, %v6413_v47  ;;  %v6521_v9 = vadd.f32 %v2916_v60, %v6415_v37 }
 0x8a8   :  { %v6524_v47 = vmul.f32 %v3449_v15, %v6425_v55  ;;  %v6527_v33 = vmul.f32 %v3450_v34, %v6431_v51  ;;  %v3454_v20 = vmul.f32 0.5, %v3390_v50  ;;  %v2529_v55 = vmul.f32 %v6482_v16, %v2528_v26  ;;  %v4692_v15 = vld [vmem:[#allocation2 + $0x138] sm:$0xff] }
 0x8a9   :  { %4998 = vrsqrt.f32 %v6500_v32  ;;  %v3453_v60 = vmul.f32 0.5, %v3389_v24  ;;  %v6541_v51 = vadd.f32 %v6490_v11, %v6402_v40  ;;  %v4700_v34 = vld [vmem:[#allocation2 + $0x178] sm:$0xff]  ;;  %v3010_v24 = vmul.f32 %v6521_v9, %v6521_v9  ;;  %3868 = vmatpush.bf16.msra.mxu1 %v4692_v15 }
 0x8aa   :  { %v6549_v50 = vadd.f32 %v2823_v2, %v6402_v40  ;;  %v4716_v11 = vld [vmem:[#allocation2 + $0x1f8] sm:$0xff]  ;;  %v6555_v26 = vadd.f32 %v2869_v54, %v6408_v23  ;;  %v6562_v0 = vmul.f32 %v3454_v20, %v6455_v36  ;;  %v2533_v54 = vsel %vm6567_vm1, %v6482_v16, %v2529_v55  ;;  %3917 = vmatpush.bf16.msrb.mxu2 %v4700_v34  ;;  %v4715_v55 = vld [vmem:[#allocation2 + $0x1f0] sm:$0xff] }
 0x8ab   :  { %v6559_v42 = vmul.f32 %v3453_v60, %v6451_v25  ;;  %v3012_v25 = vmul.f32 %v6541_v51, %v6541_v51  ;;  %v6577_v36 = vadd.f32 %v2918_v1, %v6415_v37  ;;  %v3074_v29 = vmul.f32 %v3010_v24, %v6521_v9  ;;  %4015 = vmatpush.bf16.msrb.mxu0 %v4716_v11  ;;  %v4707_v1 = vld [vmem:[#allocation2 + $0x1b0] sm:$0xff] }
 0x8ac   :  { %v3016_v16 = vmul.f32 %v6549_v50, %v6549_v50  ;;  %v3013_v15 = vmul.f32 %v6555_v26, %v6555_v26  ;;  %v6589_v34 = vadd.f32 %v2970_v53, %v6406_v49  ;;  %v3203_v24 = vadd.f32 %v3139_v43, %v6498_v39  ;;  %v4690_v43 = vld [vmem:[#allocation2 + $0x128] sm:$0xff]  ;;  %3967 = vmatpush.bf16.msrb.mxu3 %v4707_v1  ;;  %v5112_v1 = vld [vmem:[%s7150_s3 + $0x7] ss:$0 sm:$0xff] }
 0x8ad   :  { %v2921_v60 = vpop.f32.mrf.mxu3  ;;  %v2558_v44 = vmul.f32 %v2533_v54, %v6358_v3  ;;  %v3076_v11 = vmul.f32 %v3012_v25, %v6541_v51  ;;  %v3014_v2 = vmul.f32 %v6577_v36, %v6577_v36  ;;  %vm2540_vm3 = vweird.f32 %v6500_v32  ;;  %3869 = vmatpush.bf16.msra.mxu1 %v4691_v5  ;;  %v2825_v25 = vpop.f32.mrf.mxu1  ;;  %v4714_v5 = vld [vmem:[#allocation2 + $0x1e8] sm:$0xff] }
 0x8ae   :  { %v6598_v57 = vadd.f32 %v2921_v60, %v6415_v37  ;;  %3918 = vmatpush.bf16.msrb.mxu2 %v4699_v63  ;;  %v3264_v3 = vmul.f32 0.7978846, %v3200_v4  ;;  %v3015_v54 = vmul.f32 %v6582_v59, %v6582_v59  ;;  %v3080_v60 = vmul.f32 %v3016_v16, %v6549_v50 }
 0x8af   :  { %v6534_v7 = vpop.eup %4998  ;;  %4016 = vmatpush.bf16.msrb.mxu0 %v4715_v55  ;;  %v3138_v63 = vmul.f32 0.044715, %v3074_v29  ;;  %v3019_v4 = vmul.f32 %v6589_v34, %v6589_v34  ;;  %v2575_v29 = vmul.f32 %v5112_v1, %v2558_v44  ;;  %v3140_v55 = vmul.f32 0.044715, %v3076_v11  ;;  %v4705_v44 = vld [vmem:[#allocation2 + $0x1a0] sm:$0xff] }
 0x8b0   :  { %v2535_v6 = vmul.f32 %v6534_v7, %v6500_v32  ;;  %vm2541_vm2 = vweird.f32 %v6534_v7  ;;  %v4706_v32 = vld [vmem:[#allocation2 + $0x1a8] sm:$0xff]  ;;  %v3018_v21 = vmul.f32 %v6598_v57, %v6598_v57  ;;  %v6625_v19 = vadd.f32 %v2825_v25, %v6402_v40  ;;  %v4713_v11 = vld [vmem:[#allocation2 + $0x1e0] sm:$0xff] }
 0x8b1   :  { %vm2542_vm4 = vmor %vm2540_vm3, %vm2541_vm2  ;;  %3870 = vmatpush.bf16.msra.mxu1 %v4690_v43  ;;  %v3267_v27 = vmul.f32 0.7978846, %v3203_v24  ;;  %3968 = vmatpush.bf16.msrb.mxu3 %v4706_v32  ;;  %v3202_v25 = vadd.f32 %v3138_v63, %v6521_v9  ;;  %v3204_v32 = vadd.f32 %v3140_v55, %v6541_v51  ;;  %5000 = vtanh.f32 %v3264_v3 }
 0x8b2   :  { %v2536_v46 = vmul.f32 %v6534_v7, %v2535_v6  ;;  %v3137_v6 = vmul.f32 0.044715, %v3073_v17  ;;  %v3082_v24 = vmul.f32 %v3018_v21, %v6598_v57 }
 0x8b3   :  { %4017 = vmatpush.bf16.msrb.mxu0 %v4714_v5  ;;  %5002 = vtanh.f32 %v3267_v27 }
 0x8b4   :  { %v2537_v20 = vmul.f32 0.5, %v2536_v46  ;;  %v6595_v46 = vadd.f32 %v2872_v8, %v6408_v23  ;;  %v3201_v8 = vadd.f32 %v3137_v6, %v6503_v12 }
 0x8b5   :  { %v2923_v43 = vpop.f32.mrf.mxu3  ;;  %3969 = vmatpush.bf16.msrb.mxu3 %v4705_v44  ;;  %v3268_v44 = vmul.f32 0.7978846, %v3204_v32 }
 0x8b6   :  { %v2538_v17 = vsub.f32 1.5, %v2537_v20  ;;  %v4698_v20 = vld [vmem:[#allocation2 + $0x168] sm:$0xff]  ;;  %v3017_v16 = vmul.f32 %v6595_v46, %v6595_v46  ;;  %v6648_v55 = vadd.f32 %v2923_v43, %v6415_v37 }
 0x8b7   :  { %3919 = vmatpush.bf16.msrb.mxu2 %v4698_v20  ;;  %4018 = vmatpush.bf16.msrb.mxu0 %v4713_v11  ;;  %v5001_v32 = vpop.eup %5000 }
 0x8b8   :  { %v2539_v53 = vmul.f32 %v6534_v7, %v2538_v17  ;;  %v3077_v17 = vmul.f32 %v3013_v15, %v6555_v26  ;;  %v3078_v15 = vmul.f32 %v3014_v2, %v6577_v36  ;;  %v3265_v2 = vmul.f32 0.7978846, %v3201_v8 }
 0x8b9   :  { %v3081_v20 = vmul.f32 %v3017_v16, %v6595_v46  ;;  %v3020_v8 = vmul.f32 %v6625_v19, %v6625_v19  ;;  %v2828_v16 = vpop.f32.mrf.mxu1 }
 0x8ba   :  { %v2543_v6 = vsel %vm2542_vm4, %v6534_v7, %v2539_v53  ;;  %v6628_v7 = vadd.f32 %v2972_v35, %v6406_v49  ;;  %v4689_v53 = vld [vmem:[#allocation2 + $0x120] sm:$0xff]  ;;  %v3141_v38 = vmul.f32 0.044715, %v3077_v17  ;;  %v3083_v35 = vmul.f32 %v3019_v4, %v6589_v34 }
 0x8bb   :  { %v2559_v61 = vmul.f32 %v2543_v6, %v6369_v22  ;;  %v3079_v22 = vmul.f32 %v3015_v54, %v6582_v59  ;;  %v3144_v6 = vmul.f32 0.044715, %v3080_v60  ;;  %v5113_v54 = vld [vmem:[%s7150_s3 + $0x8] ss:$0 sm:$0xff]  ;;  %v3142_v5 = vmul.f32 0.044715, %v3078_v15  ;;  %3871 = vmatpush.bf16.msra.mxu1 %v4689_v53  ;;  %3920 = vmatpush.bf16.msrb.mxu2 %v4697_v10 }
 0x8bc   :  { %v3023_v63 = vmul.f32 %v6628_v7, %v6628_v7  ;;  %v6645_v4 = vadd.f32 %v2874_v30, %v6408_v23  ;;  %v3205_v15 = vadd.f32 %v3141_v38, %v6555_v26  ;;  %v3145_v10 = vmul.f32 0.044715, %v3081_v20 }
 0x8bd   :  { %v2576_v31 = vmul.f32 %v5112_v1, %v2559_v61  ;;  %v2592_v61 = vadd.f32 %v5113_v54, %v2575_v29  ;;  %v3143_v17 = vmul.f32 0.044715, %v3079_v22  ;;  %v3208_v21 = vadd.f32 %v3144_v6, %v6549_v50  ;;  %v2975_v22 = vpop.f32.mrf.mxu0  ;;  %v2926_v20 = vpop.f32.mrf.mxu3 }
 0x8be   :  { %v3147_v29 = vmul.f32 0.044715, %v3083_v35  ;;  %v3146_v53 = vmul.f32 0.044715, %v3082_v24  ;;  %5004 = vtanh.f32 %v3265_v2  ;;  %v3206_v30 = vadd.f32 %v3142_v5, %v6577_v36 }
 0x8bf   :  { %v2593_v60 = vadd.f32 %v5113_v54, %v2576_v31  ;;  %v3266_v31 = vmul.f32 0.7978846, %v3202_v25  ;;  %v3084_v6 = vmul.f32 %v3020_v8, %v6625_v19  ;;  %v3087_v3 = vmul.f32 %v3023_v63, %v6628_v7  ;;  %v2877_v25 = vpop.f32.mrf.mxu2 }
 0x8c0   :  { %v3207_v11 = vadd.f32 %v3143_v17, %v6582_v59  ;;  %v3272_v27 = vmul.f32 0.7978846, %v3208_v21  ;;  %v3021_v38 = vmul.f32 %v6645_v4, %v6645_v4  ;;  %v3211_v35 = vadd.f32 %v3147_v29, %v6589_v34  ;;  %v5003_v21 = vpop.eup %5002 }
 0x8c1   :  { %v2601_v1 = vpack.c.bf16 %v2593_v60, %v2592_v61  ;;  %5006 = vtanh.f32 %v3266_v31  ;;  %v3022_v2 = vmul.f32 %v6648_v55, %v6648_v55  ;;  %v6661_v43 = vadd.f32 %v2828_v16, %v6402_v40 }
 0x8c2   :  { %v3269_v24 = vmul.f32 0.7978846, %v3205_v15  ;;  %v3209_v54 = vadd.f32 %v3145_v10, %v6595_v46  ;;  %v3210_v61 = vadd.f32 %v3146_v53, %v6598_v57  ;;  %v6666_v60 = vadd.f32 %v2975_v22, %v6406_v49 }
 0x8c3   :  { %2847 = vmatmul.bf16.gmra.mxu1 %v2601_v1  ;;  %2896 = vmatmul.bf16.gmra.mxu2 %v2601_v1  ;;  %v3270_v5 = vmul.f32 0.7978846, %v3206_v30  ;;  %v3148_v8 = vmul.f32 0.044715, %v3084_v6  ;;  %v3151_v63 = vmul.f32 0.044715, %v3087_v3  ;;  %v6669_v17 = vadd.f32 %v2877_v25, %v6408_v23  ;;  %v2830_v3 = vpop.f32.mrf.mxu1 }
 0x8c4   :  { %2945 = vmatmul.bf16.gmra.mxu3 %v2601_v1  ;;  %2994 = vmatmul.bf16.gmra.mxu0 %v2601_v1  ;;  %v3271_v1 = vmul.f32 0.7978846, %v3207_v11  ;;  %5008 = vtanh.f32 %v3272_v27  ;;  %v3085_v16 = vmul.f32 %v3021_v38, %v6645_v4  ;;  %v6673_v31 = vadd.f32 %v2926_v20, %v6415_v37  ;;  %v5005_v29 = vpop.eup %5004 }
 0x8c5   :  { %7204 = vst [vmem:[#allocation28_spill] sm:$0xff] %v6669_v17  ;;  %v3275_v15 = vmul.f32 0.7978846, %v3211_v35  ;;  %v3086_v10 = vmul.f32 %v3022_v2, %v6648_v55  ;;  %v3024_v53 = vmul.f32 %v6661_v43, %v6661_v43  ;;  %5010 = vtanh.f32 %v3268_v44  ;;  %v2977_v2 = vpop.f32.mrf.mxu0 }
 0x8c6   :  { %v3273_v22 = vmul.f32 0.7978846, %v3209_v54  ;;  %v3274_v30 = vmul.f32 0.7978846, %v3210_v61  ;;  %v3027_v6 = vmul.f32 %v6666_v60, %v6666_v60  ;;  %5012 = vtanh.f32 %v3269_v24 }
 0x8c7   :  { %v5007_v11 = vpop.eup %5006  ;;  %v3212_v27 = vadd.f32 %v3148_v8, %v6625_v19  ;;  %v3215_v38 = vadd.f32 %v3151_v63, %v6628_v7  ;;  %v3025_v25 = vmul.f32 %v6669_v17, %v6669_v17  ;;  %5014 = vtanh.f32 %v3270_v5 }
 0x8c8   :  { %v3149_v35 = vmul.f32 0.044715, %v3085_v16  ;;  %v3026_v44 = vmul.f32 %v6673_v31, %v6673_v31  ;;  %v3392_v20 = vadd.f32 1.0, %v5001_v32  ;;  %5016 = vtanh.f32 %v3271_v1 }
 0x8c9   :  { %5018 = vtanh.f32 %v3275_v15  ;;  %v3150_v54 = vmul.f32 0.044715, %v3086_v10  ;;  %v3088_v24 = vmul.f32 %v3024_v53, %v6661_v43  ;;  %v6688_v61 = vadd.f32 %v2830_v3, %v6402_v40  ;;  %v2879_v53 = vpop.f32.mrf.mxu2 }
 0x8ca   :  { %v6690_v8 = vpop.eup %5008  ;;  %v3577_v63 = vpack.c.bf16 %v6559_v42, %v6524_v47  ;;  %v3578_v5 = vpack.c.bf16 %v6562_v0, %v6527_v33  ;;  %5020 = vtanh.f32 %v3273_v22  ;;  %v3091_v16 = vmul.f32 %v3027_v6, %v6666_v60  ;;  %v2928_v42 = vpop.f32.mrf.mxu3 }
 0x8cb   :  { %v5011_v32 = vpop.eup %5010  ;;  %5022 = vtanh.f32 %v3274_v30  ;;  %v3276_v1 = vmul.f32 0.7978846, %v3212_v27  ;;  %v3089_v15 = vmul.f32 %v3025_v25, %v6669_v17  ;;  %v6699_v10 = vadd.f32 %v2977_v2, %v6406_v49 }
 0x8cc   :  { %v5013_v3 = vpop.eup %5012  ;;  %v3279_v18 = vmul.f32 0.7978846, %v3215_v38  ;;  %v3213_v52 = vadd.f32 %v3149_v35, %v6645_v4  ;;  %v3090_v47 = vmul.f32 %v3026_v44, %v6673_v31  ;;  %v3456_v33 = vmul.f32 0.5, %v3392_v20 }
 0x8cd   :  { %v5015_v0 = vpop.eup %5014  ;;  %v3214_v22 = vadd.f32 %v3150_v54, %v6648_v55  ;;  %v3152_v6 = vmul.f32 0.044715, %v3088_v24  ;;  %v3028_v30 = vmul.f32 %v6688_v61, %v6688_v61  ;;  %v3393_v27 = vadd.f32 1.0, %v5005_v29 }
 0x8ce   :  { %v5017_v25 = vpop.eup %5016  ;;  %v3155_v2 = vmul.f32 0.044715, %v3091_v16  ;;  %v6707_v48 = vadd.f32 %v2879_v53, %v6408_v23  ;;  %v7205_v38 = vpack.c.bf16 %v6507_v45, %v6513_v13  ;;  %v3394_v35 = vadd.f32 1.0, %v5007_v11 }
 0x8cf   :  { %v3395_v44 = vadd.f32 1.0, %v5003_v21  ;;  %v6712_v20 = vpop.eup %5018  ;;  %v3153_v54 = vmul.f32 0.044715, %v3089_v15  ;;  %v3031_v24 = vmul.f32 %v6699_v10, %v6699_v10  ;;  %v6717_v29 = vadd.f32 %v2928_v42, %v6415_v37 }
 0x8d0   :  { %v7206_v16 = vpack.c.bf16 %v6532_v56, %v6516_v28  ;;  %v3396_v53 = vadd.f32 1.0, %v5011_v32  ;;  %v6722_v45 = vpop.eup %5020  ;;  %v3277_v13 = vmul.f32 0.7978846, %v3213_v52  ;;  %v3154_v11 = vmul.f32 0.044715, %v3090_v47 }
 0x8d1   :  { %v3397_v21 = vadd.f32 1.0, %v5013_v3  ;;  %v3278_v15 = vmul.f32 0.7978846, %v3214_v22  ;;  %v3216_v14 = vadd.f32 %v3152_v6, %v6661_v43  ;;  %v3092_v42 = vmul.f32 %v3028_v30, %v6688_v61 }
 0x8d2   :  { %v3399_v41 = vadd.f32 1.0, %v5017_v25  ;;  %v3029_v28 = vmul.f32 %v6707_v48, %v6707_v48  ;;  %v3457_v56 = vmul.f32 0.5, %v3393_v27  ;;  %5024 = vtanh.f32 %v3276_v1 }
 0x8d3   :  { %3872 = vmatmul.bf16.vlgmr.msra.gmra.mxu1 %v7205_v38  ;;  %3921 = vmatmul.bf16.vlgmr.msrb.gmra.mxu2 %v3577_v63  ;;  %v3398_v63 = vadd.f32 1.0, %v5015_v0  ;;  %v6724_v38 = vpop.eup %5022  ;;  %v3217_v52 = vadd.f32 %v3153_v54, %v6669_v17  ;;  %v3095_v32 = vmul.f32 %v3031_v24, %v6699_v10  ;;  %v3030_v3 = vmul.f32 %v6717_v29, %v6717_v29 }
 0x8d4   :  { %3970 = vmatmul.bf16.vlgmr.msrb.gmra.mxu3 %v3578_v5  ;;  %4019 = vmatmul.bf16.vlgmr.msrb.gmra.mxu0 %v7206_v16  ;;  %v3219_v5 = vadd.f32 %v3155_v2, %v6666_v60  ;;  %v3460_v47 = vmul.f32 0.5, %v3396_v53  ;;  %v3218_v0 = vadd.f32 %v3154_v11, %v6673_v31  ;;  %v3461_v22 = vmul.f32 0.5, %v3397_v21 }
 0x8d5   :  { %v3462_v6 = vmul.f32 0.5, %v3398_v63  ;;  %5026 = vtanh.f32 %v3277_v13  ;;  %v3280_v30 = vmul.f32 0.7978846, %v3216_v14  ;;  %v3156_v25 = vmul.f32 0.044715, %v3092_v42 }
 0x8d6   :  { %v3463_v2 = vmul.f32 0.5, %v3399_v41  ;;  %5028 = vtanh.f32 %v3278_v15  ;;  %v3283_v16 = vmul.f32 0.7978846, %v3219_v5  ;;  %v3093_v1 = vmul.f32 %v3029_v28, %v6707_v48 }
 0x8d7   :  { %v3458_v27 = vmul.f32 0.5, %v3394_v35  ;;  %5030 = vtanh.f32 %v3279_v18  ;;  %v3281_v54 = vmul.f32 0.7978846, %v3217_v52  ;;  %v3159_v24 = vmul.f32 0.044715, %v3095_v32 }
 0x8d8   :  { %v3094_v62 = vmul.f32 %v3030_v3, %v6717_v29  ;;  %v3459_v17 = vmul.f32 0.5, %v3395_v44  ;;  %v5025_v53 = vpop.eup %5024  ;;  %v3282_v37 = vmul.f32 0.7978846, %v3218_v0  ;;  %v3520_v11 = vmul.f32 %v3456_v33, %v6487_v58 }
 0x8d9   :  { %v3524_v13 = vmul.f32 %v3460_v47, %v6541_v51  ;;  %v3525_v14 = vmul.f32 %v3461_v22, %v6555_v26  ;;  %5032 = vtanh.f32 %v3280_v30  ;;  %v3220_v41 = vadd.f32 %v3156_v25, %v6688_v61 }
 0x8da   :  { %v3526_v21 = vmul.f32 %v3462_v6, %v6577_v36  ;;  %v3527_v18 = vmul.f32 %v3463_v2, %v6582_v59  ;;  %5034 = vtanh.f32 %v3283_v16  ;;  %v3157_v63 = vmul.f32 0.044715, %v3093_v1 }
 0x8db   :  { %v5027_v35 = vpop.eup %5026  ;;  %v3521_v44 = vmul.f32 %v3457_v56, %v6503_v12  ;;  %v3522_v15 = vmul.f32 %v3458_v27, %v6521_v9  ;;  %5036 = vtanh.f32 %v3281_v54  ;;  %v3223_v58 = vadd.f32 %v3159_v24, %v6699_v10 }
 0x8dc   :  { %v5029_v42 = vpop.eup %5028  ;;  %v3158_v51 = vmul.f32 0.044715, %v3094_v62  ;;  %v3523_v26 = vmul.f32 %v3459_v17, %v6498_v39  ;;  %5038 = vtanh.f32 %v3282_v37  ;;  %v3580_v5 = vpack.c.bf16 %v3524_v13, %v3520_v11 }
 0x8dd   :  { %v5031_v33 = vpop.eup %5030  ;;  %v3581_v36 = vpack.c.bf16 %v3525_v14, %v3521_v44  ;;  %v3400_v59 = vadd.f32 1.0, %v6690_v8  ;;  %v3284_v28 = vmul.f32 0.7978846, %v3220_v41  ;;  %v3582_v52 = vpack.c.bf16 %v3526_v21, %v3522_v15 }
 0x8de   :  { %v3583_v32 = vpack.c.bf16 %v3527_v18, %v3523_v26  ;;  %v3404_v3 = vadd.f32 1.0, %v5025_v53  ;;  %v3221_v12 = vadd.f32 %v3157_v63, %v6707_v48  ;;  %v3405_v9 = vadd.f32 1.0, %v5027_v35 }
 0x8df   :  { %v3406_v56 = vadd.f32 1.0, %v5029_v42  ;;  %v5033_v47 = vpop.eup %5032  ;;  %v3287_v62 = vmul.f32 0.7978846, %v3223_v58  ;;  %v3222_v39 = vadd.f32 %v3158_v51, %v6717_v29  ;;  %v3407_v37 = vadd.f32 1.0, %v5031_v33 }
 0x8e0   :  { %v5035_v17 = vpop.eup %5034  ;;  %v3464_v0 = vmul.f32 0.5, %v3400_v59  ;;  %v3401_v8 = vadd.f32 1.0, %v6722_v45  ;;  %v3402_v22 = vadd.f32 1.0, %v6724_v38  ;;  %v3468_v30 = vmul.f32 0.5, %v3404_v3 }
 0x8e1   :  { %v5037_v6 = vpop.eup %5036  ;;  %v3403_v25 = vadd.f32 1.0, %v6712_v20  ;;  %5040 = vtanh.f32 %v3284_v28  ;;  %v3285_v16 = vmul.f32 0.7978846, %v3221_v12  ;;  %v3469_v1 = vmul.f32 0.5, %v3405_v9 }
 0x8e2   :  { %v5039_v2 = vpop.eup %5038  ;;  %v3470_v27 = vmul.f32 0.5, %v3406_v56  ;;  %v3286_v54 = vmul.f32 0.7978846, %v3222_v39  ;;  %v3471_v24 = vmul.f32 0.5, %v3407_v37  ;;  %v3408_v53 = vadd.f32 1.0, %v5033_v47 }
 0x8e3   :  { %3877 = vmatmul.bf16.gmra.mxu1 %v3580_v5  ;;  %3926 = vmatmul.bf16.gmra.mxu2 %v3581_v36  ;;  %5042 = vtanh.f32 %v3287_v62  ;;  %v3528_v11 = vmul.f32 %v3464_v0, %v6549_v50  ;;  %v3465_v13 = vmul.f32 0.5, %v3401_v8  ;;  %v3466_v14 = vmul.f32 0.5, %v3402_v22  ;;  %v7207_v22 = vld [vmem:[#allocation27_spill] sm:$0xff] }
 0x8e4   :  { %3975 = vmatmul.bf16.gmra.mxu3 %v3582_v52  ;;  %4024 = vmatmul.bf16.gmra.mxu0 %v3583_v32  ;;  %v3411_v45 = vadd.f32 1.0, %v5035_v17  ;;  %v3532_v38 = vmul.f32 %v3468_v30, %v6625_v19  ;;  %v3467_v21 = vmul.f32 0.5, %v3403_v25  ;;  %v3409_v18 = vadd.f32 1.0, %v5037_v6  ;;  %v7208_v25 = vld [vmem:[#allocation28_spill] sm:$0xff] }
 0x8e5   :  { %v3410_v20 = vadd.f32 1.0, %v5039_v2  ;;  %v3533_v44 = vmul.f32 %v3469_v1, %v6645_v4  ;;  %v3534_v15 = vmul.f32 %v3470_v27, %v6648_v55  ;;  %5044 = vtanh.f32 %v3285_v16 }
 0x8e6   :  { %v2833_v41 = vpop.f32.mrf.mxu1  ;;  %v3535_v58 = vmul.f32 %v3471_v24, %v6628_v7  ;;  %v3472_v51 = vmul.f32 0.5, %v3408_v53  ;;  %5046 = vtanh.f32 %v3286_v54  ;;  %v3529_v26 = vmul.f32 %v3465_v13, %v6595_v46 }
 0x8e7   :  { %v6757_v35 = vadd.f32 %v2833_v41, %v6402_v40  ;;  %v2980_v63 = vpop.f32.mrf.mxu0  ;;  %v5041_v42 = vpop.eup %5040  ;;  %v3530_v33 = vmul.f32 %v3466_v14, %v6598_v57  ;;  %v3475_v5 = vmul.f32 0.5, %v3411_v45  ;;  %v3531_v36 = vmul.f32 %v3467_v21, %v6589_v34 }
 0x8e8   :  { %v6762_v50 = vadd.f32 %v2980_v63, %v6406_v49  ;;  %v3473_v59 = vmul.f32 0.5, %v3409_v18  ;;  %v3474_v28 = vmul.f32 0.5, %v3410_v20  ;;  %v3584_v52 = vpack.c.bf16 %v3532_v38, %v3528_v11 }
 0x8e9   :  { %v3032_v19 = vmul.f32 %v6757_v35, %v6757_v35  ;;  %v5043_v4 = vpop.eup %5042  ;;  %v3585_v32 = vpack.c.bf16 %v3533_v44, %v3529_v26  ;;  %v3412_v3 = vadd.f32 1.0, %v5041_v42  ;;  %v3586_v46 = vpack.c.bf16 %v3534_v15, %v3530_v33 }
 0x8ea   :  { %v3035_v55 = vmul.f32 %v6762_v50, %v6762_v50  ;;  %v3587_v56 = vpack.c.bf16 %v3535_v58, %v3531_v36  ;;  %v6775_v57 = vmul.f32 %v3472_v51, %v6661_v43  ;;  %v3415_v37 = vadd.f32 1.0, %v5043_v4 }
 0x8eb   :  { %v3096_v7 = vmul.f32 %v3032_v19, %v6757_v35  ;;  %v5045_v47 = vpop.eup %5044  ;;  %v6781_v17 = vmul.f32 %v3475_v5, %v6666_v60  ;;  %v6787_v2 = vmul.f32 %v3473_v59, %v7208_v25  ;;  %v6790_v43 = vmul.f32 %v3474_v28, %v6673_v31 }
 0x8ec   :  { %v3099_v12 = vmul.f32 %v3035_v55, %v6762_v50  ;;  %v2882_v9 = vpop.f32.mrf.mxu2  ;;  %v5047_v0 = vpop.eup %5046  ;;  %v3476_v54 = vmul.f32 0.5, %v3412_v3  ;;  %v3413_v11 = vadd.f32 1.0, %v5045_v47  ;;  %v3479_v20 = vmul.f32 0.5, %v3415_v37 }
 0x8ed   :  { %v3160_v62 = vmul.f32 0.044715, %v3096_v7  ;;  %v6778_v39 = vadd.f32 %v2882_v9, %v6408_v23  ;;  %v2931_v34 = vpop.f32.mrf.mxu3  ;;  %v3414_v41 = vadd.f32 1.0, %v5047_v0 }
 0x8ee   :  { %v3163_v8 = vmul.f32 0.044715, %v3099_v12  ;;  %v6784_v6 = vadd.f32 %v2931_v34, %v7207_v22  ;;  %v2835_v30 = vpop.f32.mrf.mxu1  ;;  %v3540_v15 = vmul.f32 %v3476_v54, %v6688_v61  ;;  %v3477_v19 = vmul.f32 0.5, %v3413_v11 }
 0x8ef   :  { %v3224_v16 = vadd.f32 %v3160_v62, %v6757_v35  ;;  %v3033_v1 = vmul.f32 %v6778_v39, %v6778_v39  ;;  %v6796_v60 = vadd.f32 %v2835_v30, %v6402_v40  ;;  %v2982_v27 = vpop.f32.mrf.mxu0  ;;  %v3478_v55 = vmul.f32 0.5, %v3414_v41 }
 0x8f0   :  { %v3227_v24 = vadd.f32 %v3163_v8, %v6762_v50  ;;  %v3034_v53 = vmul.f32 %v6784_v6, %v6784_v6  ;;  %v6802_v31 = vadd.f32 %v2982_v27, %v6406_v49  ;;  %v3543_v61 = vmul.f32 %v3479_v20, %v6699_v10 }
 0x8f1   :  { %v3288_v13 = vmul.f32 0.7978846, %v3224_v16  ;;  %v3097_v14 = vmul.f32 %v3033_v1, %v6778_v39  ;;  %v3036_v45 = vmul.f32 %v6796_v60, %v6796_v60  ;;  %v3588_v3 = vpack.c.bf16 %v3540_v15, %v6775_v57 }
 0x8f2   :  { %v3291_v38 = vmul.f32 0.7978846, %v3227_v24  ;;  %v3098_v21 = vmul.f32 %v3034_v53, %v6784_v6  ;;  %v3039_v18 = vmul.f32 %v6802_v31, %v6802_v31  ;;  %v3542_v37 = vmul.f32 %v3478_v55, %v6717_v29 }
 0x8f3   :  { %3882 = vmatmul.bf16.gmra.mxu1 %v3584_v52  ;;  %3931 = vmatmul.bf16.gmra.mxu2 %v3585_v32  ;;  %5048 = vtanh.f32 %v3288_v13  ;;  %v3161_v63 = vmul.f32 0.044715, %v3097_v14  ;;  %v3100_v44 = vmul.f32 %v3036_v45, %v6796_v60  ;;  %v3591_v29 = vpack.c.bf16 %v3543_v61, %v6781_v17 }
 0x8f4   :  { %3980 = vmatmul.bf16.gmra.mxu3 %v3586_v46  ;;  %4029 = vmatmul.bf16.gmra.mxu0 %v3587_v56  ;;  %5050 = vtanh.f32 %v3291_v38  ;;  %v3162_v42 = vmul.f32 0.044715, %v3098_v21  ;;  %v3103_v58 = vmul.f32 %v3039_v18, %v6802_v31  ;;  %v2884_v51 = vpop.f32.mrf.mxu2  ;;  %v3541_v56 = vmul.f32 %v3477_v19, %v6707_v48 }
 0x8f5   :  { %v3225_v26 = vadd.f32 %v3161_v63, %v6778_v39  ;;  %v3164_v33 = vmul.f32 0.044715, %v3100_v44  ;;  %v6815_v5 = vadd.f32 %v2884_v51, %v6408_v23  ;;  %v2933_v4 = vpop.f32.mrf.mxu3  ;;  %v3590_v38 = vpack.c.bf16 %v3542_v37, %v6790_v43 }
 0x8f6   :  { %v3226_v36 = vadd.f32 %v3162_v42, %v6784_v6  ;;  %v3167_v59 = vmul.f32 0.044715, %v3103_v58  ;;  %v6819_v28 = vadd.f32 %v2933_v4, %v7207_v22  ;;  %v2838_v34 = vpop.f32.mrf.mxu1  ;;  %v3589_v13 = vpack.c.bf16 %v3541_v56, %v6787_v2 }
 0x8f7   :  { %v3289_v7 = vmul.f32 0.7978846, %v3225_v26  ;;  %v3228_v52 = vadd.f32 %v3164_v33, %v6796_v60  ;;  %v3037_v32 = vmul.f32 %v6815_v5, %v6815_v5  ;;  %v6834_v30 = vadd.f32 %v2838_v34, %v6402_v40  ;;  %v2985_v25 = vpop.f32.mrf.mxu0 }
 0x8f8   :  { %v3290_v12 = vmul.f32 0.7978846, %v3226_v36  ;;  %v3231_v9 = vadd.f32 %v3167_v59, %v6802_v31  ;;  %v3038_v46 = vmul.f32 %v6819_v28, %v6819_v28  ;;  %v6837_v48 = vadd.f32 %v2985_v25, %v6406_v49 }
 0x8f9   :  { %v5049_v47 = vpop.eup %5048  ;;  %5052 = vtanh.f32 %v3289_v7  ;;  %v3292_v62 = vmul.f32 0.7978846, %v3228_v52  ;;  %v3101_v10 = vmul.f32 %v3037_v32, %v6815_v5  ;;  %v3040_v54 = vmul.f32 %v6834_v30, %v6834_v30 }
 0x8fa   :  { %v5051_v0 = vpop.eup %5050  ;;  %5054 = vtanh.f32 %v3290_v12  ;;  %v3295_v8 = vmul.f32 0.7978846, %v3231_v9  ;;  %v3102_v57 = vmul.f32 %v3038_v46, %v6819_v28  ;;  %v3416_v1 = vadd.f32 1.0, %v5049_v47 }
 0x8fb   :  { %v3165_v16 = vmul.f32 0.044715, %v3101_v10  ;;  %5056 = vtanh.f32 %v3292_v62  ;;  %v3419_v24 = vadd.f32 1.0, %v5051_v0  ;;  %v3043_v11 = vmul.f32 %v6837_v48, %v6837_v48 }
 0x8fc   :  { %v3166_v27 = vmul.f32 0.044715, %v3102_v57  ;;  %v3480_v14 = vmul.f32 0.5, %v3416_v1  ;;  %5058 = vtanh.f32 %v3295_v8  ;;  %v3104_v41 = vmul.f32 %v3040_v54, %v6834_v30  ;;  %v2887_v20 = vpop.f32.mrf.mxu2 }
 0x8fd   :  { %v3229_v53 = vadd.f32 %v3165_v16, %v6815_v5  ;;  %v3107_v17 = vmul.f32 %v3043_v11, %v6837_v48  ;;  %v6853_v44 = vmul.f32 0.5, %v3419_v24  ;;  %v6856_v58 = vadd.f32 %v2887_v20, %v6408_v23  ;;  %v2936_v51 = vpop.f32.mrf.mxu3 }
 0x8fe   :  { %v3230_v45 = vadd.f32 %v3166_v27, %v6819_v28  ;;  %v6851_v63 = vmul.f32 %v3480_v14, %v6757_v35  ;;  %v3168_v42 = vmul.f32 0.044715, %v3104_v41  ;;  %v6859_v33 = vadd.f32 %v2936_v51, %v7207_v22  ;;  %v2840_v35 = vpop.f32.mrf.mxu1 }
 0x8ff   :  { %v5053_v21 = vpop.eup %5052  ;;  %v3293_v18 = vmul.f32 0.7978846, %v3229_v53  ;;  %v3171_v26 = vmul.f32 0.044715, %v3107_v17  ;;  %v3041_v36 = vmul.f32 %v6856_v58, %v6856_v58  ;;  %v6867_v59 = vadd.f32 %v2840_v35, %v6402_v40  ;;  %v2987_v61 = vpop.f32.mrf.mxu0 }
 0x900   :  { %v5055_v2 = vpop.eup %5054  ;;  %v3294_v15 = vmul.f32 0.7978846, %v3230_v45  ;;  %v3417_v43 = vadd.f32 1.0, %v5053_v21  ;;  %v3232_v55 = vadd.f32 %v3168_v42, %v6834_v30  ;;  %v3042_v52 = vmul.f32 %v6859_v33, %v6859_v33 }
 0x901   :  { %v5057_v19 = vpop.eup %5056  ;;  %5060 = vtanh.f32 %v3293_v18  ;;  %v6861_v4 = vadd.f32 1.0, %v5055_v2  ;;  %v3235_v7 = vadd.f32 %v3171_v26, %v6837_v48  ;;  %v6873_v32 = vadd.f32 %v2987_v61, %v6406_v49 }
 0x902   :  { %5062 = vtanh.f32 %v3294_v15  ;;  %v6875_v12 = vpop.eup %5058  ;;  %v3296_v9 = vmul.f32 0.7978846, %v3232_v55  ;;  %v3105_v46 = vmul.f32 %v3041_v36, %v6856_v58  ;;  %v3044_v56 = vmul.f32 %v6867_v59, %v6867_v59 }
 0x903   :  { %3887 = vmatmul.bf16.gmra.mxu1 %v3588_v3  ;;  %3936 = vmatmul.bf16.gmra.mxu2 %v3589_v13  ;;  %v3420_v3 = vadd.f32 1.0, %v5057_v19  ;;  %v3481_v47 = vmul.f32 0.5, %v3417_v43  ;;  %v3299_v62 = vmul.f32 0.7978846, %v3235_v7  ;;  %v3106_v10 = vmul.f32 %v3042_v52, %v6859_v33 }
 0x904   :  { %3985 = vmatmul.bf16.gmra.mxu3 %v3590_v38  ;;  %4034 = vmatmul.bf16.gmra.mxu0 %v3591_v29  ;;  %v3047_v34 = vmul.f32 %v6873_v32, %v6873_v32  ;;  %5064 = vtanh.f32 %v3296_v9  ;;  %v3169_v0 = vmul.f32 0.044715, %v3105_v46  ;;  %v3108_v8 = vmul.f32 %v3044_v56, %v6867_v59  ;;  %v2889_v27 = vpop.f32.mrf.mxu2 }
 0x905   :  { %v3484_v37 = vmul.f32 0.5, %v3420_v3  ;;  %v3545_v57 = vmul.f32 %v3481_v47, %v6778_v39  ;;  %5066 = vtanh.f32 %v3299_v62  ;;  %v3170_v16 = vmul.f32 0.044715, %v3106_v10  ;;  %v2938_v13 = vpop.f32.mrf.mxu3 }
 0x906   :  { %v3111_v1 = vmul.f32 %v3047_v34, %v6873_v32  ;;  %v3233_v24 = vadd.f32 %v3169_v0, %v6856_v58  ;;  %v3172_v53 = vmul.f32 0.044715, %v3108_v8  ;;  %v6889_v11 = vadd.f32 %v2889_v27, %v6408_v23  ;;  %v2843_v42 = vpop.f32.mrf.mxu1 }
 0x907   :  { %v5061_v25 = vpop.eup %5060  ;;  %v3548_v54 = vmul.f32 %v3484_v37, %v6796_v60  ;;  %v3234_v45 = vadd.f32 %v3170_v16, %v6859_v33  ;;  %v6893_v41 = vadd.f32 %v2938_v13, %v7207_v22  ;;  %v6906_v26 = vadd.f32 %v2843_v42, %v6402_v40  ;;  %v2990_v35 = vpop.f32.mrf.mxu0 }
 0x908   :  { %v5063_v29 = vpop.eup %5062  ;;  %v3421_v14 = vadd.f32 1.0, %v5061_v25  ;;  %v3175_v39 = vmul.f32 0.044715, %v3111_v1  ;;  %v3297_v21 = vmul.f32 0.7978846, %v3233_v24  ;;  %v3236_v60 = vadd.f32 %v3172_v53, %v6867_v59 }
 0x909   :  { %v3592_v38 = vpack.c.bf16 %v3548_v54, %v6851_v63  ;;  %v3045_v18 = vmul.f32 %v6889_v11, %v6889_v11  ;;  %v3298_v20 = vmul.f32 0.7978846, %v3234_v45  ;;  %v3046_v15 = vmul.f32 %v6893_v41, %v6893_v41 }
 0x90a   :  { %v3485_v17 = vmul.f32 0.5, %v3421_v14  ;;  %v3239_v2 = vadd.f32 %v3175_v39, %v6873_v32  ;;  %v3422_v51 = vadd.f32 1.0, %v5063_v29  ;;  %v6902_v43 = vpop.eup %5064  ;;  %5068 = vtanh.f32 %v3297_v21 }
 0x90b   :  { %v3300_v19 = vmul.f32 0.7978846, %v3236_v60  ;;  %v3109_v63 = vmul.f32 %v3045_v18, %v6889_v11  ;;  %v6908_v55 = vpop.eup %5066  ;;  %5070 = vtanh.f32 %v3298_v20  ;;  %v3110_v61 = vmul.f32 %v3046_v15, %v6893_v41 }
 0x90c   :  { %v3303_v36 = vmul.f32 0.7978846, %v3239_v2  ;;  %v6912_v7 = vadd.f32 %v2990_v35, %v6406_v49  ;;  %v3048_v3 = vmul.f32 %v6906_v26, %v6906_v26  ;;  %v3549_v9 = vmul.f32 %v3485_v17, %v6815_v5  ;;  %v2892_v25 = vpop.f32.mrf.mxu2 }
 0x90d   :  { %5072 = vtanh.f32 %v3300_v19  ;;  %v3173_v52 = vmul.f32 0.044715, %v3109_v63  ;;  %v3174_v46 = vmul.f32 0.044715, %v3110_v61  ;;  %v3482_v47 = vmul.f32 0.5, %v6861_v4  ;;  %v2941_v29 = vpop.f32.mrf.mxu3 }
 0x90e   :  { %5074 = vtanh.f32 %v3303_v36  ;;  %v3051_v56 = vmul.f32 %v6912_v7, %v6912_v7  ;;  %v3112_v10 = vmul.f32 %v3048_v3, %v6906_v26  ;;  %v3593_v34 = vpack.c.bf16 %v3549_v9, %v3545_v57 }
 0x90f   :  { %v3237_v62 = vadd.f32 %v3173_v52, %v6889_v11  ;;  %v3486_v37 = vmul.f32 0.5, %v3422_v51  ;;  %v3238_v0 = vadd.f32 %v3174_v46, %v6893_v41  ;;  %v3546_v5 = vmul.f32 %v3482_v47, %v6784_v6  ;;  %v2845_v6 = vpop.f32.mrf.mxu1 }
 0x910   :  { %v3115_v8 = vmul.f32 %v3051_v56, %v6912_v7  ;;  %v3423_v16 = vadd.f32 1.0, %v6875_v12  ;;  %v6926_v1 = vpop.eup %5068  ;;  %v3176_v54 = vmul.f32 0.044715, %v3112_v10  ;;  %v6929_v4 = vadd.f32 %v2892_v25, %v6408_v23 }
 0x911   :  { %v3301_v27 = vmul.f32 0.7978846, %v3237_v62  ;;  %v3550_v57 = vmul.f32 %v3486_v37, %v6819_v28  ;;  %v6932_v24 = vpop.eup %5070  ;;  %v3302_v53 = vmul.f32 0.7978846, %v3238_v0  ;;  %v6935_v14 = vadd.f32 %v2941_v29, %v7207_v22  ;;  %v2992_v28 = vpop.f32.mrf.mxu0 }
 0x912   :  { %v3179_v13 = vmul.f32 0.044715, %v3115_v8  ;;  %v3487_v12 = vmul.f32 0.5, %v3423_v16  ;;  %v3240_v39 = vadd.f32 %v3176_v54, %v6906_v26  ;;  %v6941_v21 = vadd.f32 %v2845_v6, %v6402_v40 }
 0x913   :  { %3892 = vmatmul.bf16.gmra.mxu1 %v3592_v38  ;;  %3941 = vmatmul.bf16.gmra.mxu2 %v3593_v34  ;;  %v5073_v45 = vpop.eup %5072  ;;  %5076 = vtanh.f32 %v3301_v27  ;;  %v3049_v38 = vmul.f32 %v6929_v4, %v6929_v4  ;;  %v3050_v17 = vmul.f32 %v6935_v14, %v6935_v14  ;;  %v6949_v20 = vadd.f32 %v2992_v28, %v6406_v49 }
 0x914   :  { %v6943_v60 = vpop.eup %5074  ;;  %5078 = vtanh.f32 %v3302_v53  ;;  %v3243_v18 = vadd.f32 %v3179_v13, %v6912_v7  ;;  %v3304_v2 = vmul.f32 0.7978846, %v3240_v39  ;;  %v3052_v42 = vmul.f32 %v6941_v21, %v6941_v21  ;;  %v2894_v56 = vpop.f32.mrf.mxu2 }
 0x915   :  { %v3113_v15 = vmul.f32 %v3049_v38, %v6929_v4  ;;  %v3594_v51 = vpack.c.bf16 %v3550_v57, %v3546_v5  ;;  %v3114_v63 = vmul.f32 %v3050_v17, %v6935_v14  ;;  %v3055_v35 = vmul.f32 %v6949_v20, %v6949_v20 }
 0x916   :  { %v3307_v19 = vmul.f32 0.7978846, %v3243_v18  ;;  %v3547_v36 = vmul.f32 %v6853_v44, %v6762_v50  ;;  %5080 = vtanh.f32 %v3304_v2  ;;  %v3116_v52 = vmul.f32 %v3052_v42, %v6941_v21  ;;  %v2943_v44 = vpop.f32.mrf.mxu3 }
 0x917   :  { %v3177_v61 = vmul.f32 0.044715, %v3113_v15  ;;  %3990 = vmatmul.bf16.gmra.mxu3 %v3594_v51  ;;  %v3551_v3 = vmul.f32 %v3487_v12, %v6802_v31  ;;  %v3178_v9 = vmul.f32 0.044715, %v3114_v63  ;;  %v3119_v46 = vmul.f32 %v3055_v35, %v6949_v20 }
 0x918   :  { %5082 = vtanh.f32 %v3307_v19  ;;  %v3424_v47 = vadd.f32 1.0, %v6902_v43  ;;  %v3180_v34 = vmul.f32 0.044715, %v3116_v52  ;;  %v6965_v50 = vadd.f32 %v2894_v56, %v6408_v23 }
 0x919   :  { %v5077_v62 = vpop.eup %5076  ;;  %v3241_v10 = vadd.f32 %v3177_v61, %v6929_v4  ;;  %v3595_v37 = vpack.c.bf16 %v3551_v3, %v3547_v36  ;;  %v3242_v8 = vadd.f32 %v3178_v9, %v6935_v14  ;;  %v3183_v31 = vmul.f32 0.044715, %v3119_v46 }
 0x91a   :  { %v5079_v0 = vpop.eup %5078  ;;  %v6969_v25 = vadd.f32 %v2943_v44, %v7207_v22  ;;  %v3428_v5 = vadd.f32 1.0, %v5073_v45  ;;  %v3244_v43 = vadd.f32 %v3180_v34, %v6941_v21  ;;  %v3053_v27 = vmul.f32 %v6965_v50, %v6965_v50 }
 0x91b   :  { %v3305_v16 = vmul.f32 0.7978846, %v3241_v10  ;;  %4039 = vmatmul.bf16.gmra.mxu0 %v3595_v37  ;;  %v3488_v54 = vmul.f32 0.5, %v3424_v47  ;;  %v3306_v29 = vmul.f32 0.7978846, %v3242_v8  ;;  %v3247_v57 = vadd.f32 %v3183_v31, %v6949_v20 }
 0x91c   :  { %v3054_v53 = vmul.f32 %v6969_v25, %v6969_v25  ;;  %v3492_v13 = vmul.f32 0.5, %v3428_v5  ;;  %v5081_v6 = vpop.eup %5080  ;;  %v3308_v12 = vmul.f32 0.7978846, %v3244_v43  ;;  %v3117_v45 = vmul.f32 %v3053_v27, %v6965_v50 }
 0x91d   :  { %5084 = vtanh.f32 %v3305_v16  ;;  %v3552_v28 = vmul.f32 %v3488_v54, %v6834_v30  ;;  %v3425_v2 = vadd.f32 1.0, %v6926_v1  ;;  %v3429_v15 = vadd.f32 1.0, %v5077_v62 }
 0x91e   :  { %v5083_v39 = vpop.eup %5082  ;;  %5086 = vtanh.f32 %v3306_v29  ;;  %v3118_v38 = vmul.f32 %v3054_v53, %v6969_v25  ;;  %v3556_v18 = vmul.f32 %v3492_v13, %v6867_v59  ;;  %v3181_v17 = vmul.f32 0.044715, %v3117_v45 }
 0x91f   :  { %5088 = vtanh.f32 %v3308_v12  ;;  %v3311_v42 = vmul.f32 0.7978846, %v3247_v57  ;;  %v3426_v63 = vadd.f32 1.0, %v6932_v24  ;;  %v3489_v36 = vmul.f32 0.5, %v3425_v2 }
 0x920   :  { %v3182_v51 = vmul.f32 0.044715, %v3118_v38  ;;  %v3596_v19 = vpack.c.bf16 %v3556_v18, %v3552_v28  ;;  %v3245_v35 = vadd.f32 %v3181_v17, %v6965_v50  ;;  %v3493_v61 = vmul.f32 0.5, %v3429_v15 }
 0x921   :  { %v3430_v52 = vadd.f32 1.0, %v5079_v0  ;;  %v3490_v30 = vmul.f32 0.5, %v3426_v63  ;;  %v3427_v59 = vadd.f32 1.0, %v6908_v55  ;;  %v3431_v9 = vadd.f32 1.0, %v6943_v60 }
 0x922   :  { %v3246_v3 = vadd.f32 %v3182_v51, %v6969_v25  ;;  %v3309_v46 = vmul.f32 0.7978846, %v3245_v35  ;;  %v3553_v56 = vmul.f32 %v3489_v36, %v6856_v58  ;;  %v3557_v47 = vmul.f32 %v3493_v61, %v6889_v11 }
 0x923   :  { %3897 = vmatmul.bf16.gmra.mxu1 %v3596_v19  ;;  %v5085_v1 = vpop.eup %5084  ;;  %v3494_v24 = vmul.f32 0.5, %v3430_v52  ;;  %5090 = vtanh.f32 %v3311_v42  ;;  %v3491_v34 = vmul.f32 0.5, %v3427_v59  ;;  %v3495_v37 = vmul.f32 0.5, %v3431_v9 }
 0x924   :  { %v5087_v62 = vpop.eup %5086  ;;  %v3310_v10 = vmul.f32 0.7978846, %v3246_v3  ;;  %5092 = vtanh.f32 %v3309_v46  ;;  %v3597_v0 = vpack.c.bf16 %v3557_v47, %v3553_v56  ;;  %v3554_v8 = vmul.f32 %v3490_v30, %v6859_v33 }
 0x925   :  { %v5089_v44 = vpop.eup %5088  ;;  %v3558_v55 = vmul.f32 %v3494_v24, %v6893_v41  ;;  %v3559_v60 = vmul.f32 %v3495_v37, %v6873_v32  ;;  %v3432_v31 = vadd.f32 1.0, %v5081_v6  ;;  %v3555_v5 = vmul.f32 %v3491_v34, %v6837_v48 }
 0x926   :  { %5094 = vtanh.f32 %v3310_v10  ;;  %v3436_v58 = vadd.f32 1.0, %v5089_v44  ;;  %3946 = vmatmul.bf16.gmra.mxu2 %v3597_v0  ;;  %v3433_v57 = vadd.f32 1.0, %v5085_v1  ;;  %v3434_v13 = vadd.f32 1.0, %v5087_v62 }
 0x927   :  { %v3598_v11 = vpack.c.bf16 %v3558_v55, %v3554_v8  ;;  %v3599_v43 = vpack.c.bf16 %v3559_v60, %v3555_v5  ;;  %v3496_v54 = vmul.f32 0.5, %v3432_v31  ;;  %v3435_v28 = vadd.f32 1.0, %v5083_v39 }
 0x928   :  { %v3500_v16 = vmul.f32 0.5, %v3436_v58  ;;  %v3497_v38 = vmul.f32 0.5, %v3433_v57  ;;  %v3498_v2 = vmul.f32 0.5, %v3434_v13 }
 0x929   :  { %3995 = vmatmul.bf16.gmra.mxu3 %v3598_v11  ;;  %v5091_v27 = vpop.eup %5090  ;;  %v3560_v12 = vmul.f32 %v3496_v54, %v6906_v26  ;;  %v3499_v51 = vmul.f32 0.5, %v3435_v28 }
 0x92a   :  { %v5093_v29 = vpop.eup %5092  ;;  %v3564_v41 = vmul.f32 %v3500_v16, %v6941_v21  ;;  %v3439_v6 = vadd.f32 1.0, %v5091_v27  ;;  %v3561_v42 = vmul.f32 %v3497_v38, %v6929_v4  ;;  %v3562_v63 = vmul.f32 %v3498_v2, %v6935_v14 }
 0x92b   :  { %4044 = vmatmul.bf16.gmra.mxu0 %v3599_v43  ;;  %v3437_v53 = vadd.f32 1.0, %v5093_v29  ;;  %v3563_v39 = vmul.f32 %v3499_v51, %v6912_v7 }
 0x92c   :  { %v5095_v33 = vpop.eup %5094  ;;  %v3600_v18 = vpack.c.bf16 %v3564_v41, %v3560_v12  ;;  %v3503_v15 = vmul.f32 0.5, %v3439_v6 }
 0x92d   :  { %v3438_v32 = vadd.f32 1.0, %v5095_v33  ;;  %v3501_v45 = vmul.f32 0.5, %v3437_v53 }
 0x92e   :  { %v3567_v26 = vmul.f32 %v3503_v15, %v6949_v20 }
 0x92f   :  { %v3502_v48 = vmul.f32 0.5, %v3438_v32  ;;  %v3565_v17 = vmul.f32 %v3501_v45, %v6965_v50 }
 0x930   :  { %v3603_v36 = vpack.c.bf16 %v3567_v26, %v3563_v39 }
 0x931   :  { %v3566_v21 = vmul.f32 %v3502_v48, %v6969_v25  ;;  %v3601_v19 = vpack.c.bf16 %v3565_v17, %v3561_v42 }
 0x933   :  { %3902 = vmatmul.bf16.gmra.mxu1 %v3600_v18  ;;  %v3602_v35 = vpack.c.bf16 %v3566_v21, %v3562_v63 }
 0x936   :  { %3951 = vmatmul.bf16.gmra.mxu2 %v3601_v19 }
 0x939   :  { %4000 = vmatmul.bf16.gmra.mxu3 %v3602_v35 }
 0x93b   :  { %4049 = vmatmul.bf16.gmra.mxu0 %v3603_v36 }
 0x940   :  { %v2848_v50 = vpop.f32.mrf.mxu1 }
 0x941   :  { %v7002_v61 = vadd.f32 %v2848_v50, %v6402_v40  ;;  %v2995_v4 = vpop.f32.mrf.mxu0 }
 0x942   :  { %v7005_v25 = vadd.f32 %v2995_v4, %v6406_v49 }
 0x943   :  { %v3056_v14 = vmul.f32 %v7002_v61, %v7002_v61 }
 0x944   :  { %v3059_v20 = vmul.f32 %v7005_v25, %v7005_v25 }
 0x945   :  { %v3120_v52 = vmul.f32 %v3056_v14, %v7002_v61 }
 0x946   :  { %v3123_v7 = vmul.f32 %v3059_v20, %v7005_v25  ;;  %v2897_v3 = vpop.f32.mrf.mxu2 }
 0x947   :  { %v3184_v30 = vmul.f32 0.044715, %v3120_v52  ;;  %v7014_v59 = vadd.f32 %v2897_v3, %v6408_v23  ;;  %v2946_v9 = vpop.f32.mrf.mxu3 }
 0x948   :  { %v3187_v1 = vmul.f32 0.044715, %v3123_v7  ;;  %v7017_v46 = vadd.f32 %v2946_v9, %v7207_v22  ;;  %v2850_v56 = vpop.f32.mrf.mxu1 }
 0x949   :  { %v3248_v47 = vadd.f32 %v3184_v30, %v7002_v61  ;;  %v3057_v24 = vmul.f32 %v7014_v59, %v7014_v59  ;;  %v7023_v62 = vadd.f32 %v2850_v56, %v6402_v40  ;;  %v2997_v10 = vpop.f32.mrf.mxu0 }
 0x94a   :  { %v3251_v34 = vadd.f32 %v3187_v1, %v7005_v25  ;;  %v3058_v37 = vmul.f32 %v7017_v46, %v7017_v46  ;;  %v7029_v44 = vadd.f32 %v2997_v10, %v6406_v49 }
 0x94b   :  { %v3312_v0 = vmul.f32 0.7978846, %v3248_v47  ;;  %v3121_v8 = vmul.f32 %v3057_v24, %v7014_v59  ;;  %v3060_v55 = vmul.f32 %v7023_v62, %v7023_v62 }
 0x94c   :  { %v3315_v60 = vmul.f32 0.7978846, %v3251_v34  ;;  %v3122_v31 = vmul.f32 %v3058_v37, %v7017_v46  ;;  %v3063_v40 = vmul.f32 %v7029_v44, %v7029_v44 }
 0x94d   :  { %v3185_v58 = vmul.f32 0.044715, %v3121_v8  ;;  %v3124_v11 = vmul.f32 %v3060_v55, %v7023_v62  ;;  %5096 = vtanh.f32 %v3312_v0 }
 0x94e   :  { %v3186_v5 = vmul.f32 0.044715, %v3122_v31  ;;  %v3127_v16 = vmul.f32 %v3063_v40, %v7029_v44  ;;  %v2899_v49 = vpop.f32.mrf.mxu2  ;;  %5098 = vtanh.f32 %v3315_v60 }
 0x94f   :  { %v3249_v43 = vadd.f32 %v3185_v58, %v7014_v59  ;;  %v3188_v27 = vmul.f32 0.044715, %v3124_v11  ;;  %v7041_v54 = vadd.f32 %v2899_v49, %v6408_v23  ;;  %v2948_v29 = vpop.f32.mrf.mxu3 }
 0x950   :  { %v3250_v57 = vadd.f32 %v3186_v5, %v7017_v46  ;;  %v3191_v33 = vmul.f32 0.044715, %v3127_v16  ;;  %v7045_v41 = vadd.f32 %v2948_v29, %v7207_v22  ;;  %v3873_v53 = vpop.f32.mrf.mxu1 }
 0x951   :  { %v3313_v13 = vmul.f32 0.7978846, %v3249_v43  ;;  %v3252_v32 = vadd.f32 %v3188_v27, %v7023_v62  ;;  %v3061_v6 = vmul.f32 %v7041_v54, %v7041_v54  ;;  %v4020_v12 = vpop.f32.mrf.mxu0 }
 0x952   :  { %v3314_v45 = vmul.f32 0.7978846, %v3250_v57  ;;  %v3255_v23 = vadd.f32 %v3191_v33, %v7029_v44  ;;  %v3062_v38 = vmul.f32 %v7045_v41, %v7045_v41 }
 0x953   :  { %5100 = vtanh.f32 %v3313_v13  ;;  %v3316_v48 = vmul.f32 0.7978846, %v3252_v32  ;;  %v3125_v28 = vmul.f32 %v3061_v6, %v7041_v54  ;;  %v5097_v17 = vpop.eup %5096  ;;  %v7209_v13 = vld [vmem:[#allocation15_spill] sm:$0xff] }
 0x954   :  { %5102 = vtanh.f32 %v3314_v45  ;;  %v3319_v22 = vmul.f32 0.7978846, %v3255_v23  ;;  %v3126_v18 = vmul.f32 %v3062_v38, %v7045_v41  ;;  %v5099_v15 = vpop.eup %5098  ;;  %v3440_v39 = vadd.f32 1.0, %v5097_v17 }
 0x955   :  { %5104 = vtanh.f32 %v3316_v48  ;;  %v3189_v2 = vmul.f32 0.044715, %v3125_v28  ;;  %v3443_v20 = vadd.f32 1.0, %v5099_v15 }
 0x956   :  { %5106 = vtanh.f32 %v3319_v22  ;;  %v3190_v42 = vmul.f32 0.044715, %v3126_v18  ;;  %v3922_v21 = vpop.f32.mrf.mxu2  ;;  %v3504_v56 = vmul.f32 0.5, %v3440_v39 }
 0x957   :  { %v3253_v51 = vadd.f32 %v3189_v2, %v7041_v54  ;;  %v3923_v19 = vadd.f32 %v3922_v21, %v3873_v53  ;;  %v3971_v63 = vpop.f32.mrf.mxu3  ;;  %v3507_v24 = vmul.f32 0.5, %v3443_v20 }
 0x958   :  { %v3254_v26 = vadd.f32 %v3190_v42, %v7045_v41  ;;  %v3875_v35 = vpop.f32.mrf.mxu1  ;;  %v3568_v40 = vmul.f32 %v3504_v56, %v7002_v61  ;;  %v7065_v61 = vld [vmem:[%s7150_s3 + $0x9] ss:$0 sm:$0xff] }
 0x959   :  { %v5101_v36 = vpop.eup %5100  ;;  %v3317_v50 = vmul.f32 0.7978846, %v3253_v51  ;;  %v3972_v4 = vadd.f32 %v3971_v63, %v3923_v19  ;;  %v4022_v14 = vpop.f32.mrf.mxu0  ;;  %v3571_v49 = vmul.f32 %v3507_v24, %v7005_v25  ;;  %v7210_v25 = vld [vmem:[#allocation16_spill] sm:$0xff] }
 0x95a   :  { %v5103_v52 = vpop.eup %5102  ;;  %v3318_v7 = vmul.f32 0.7978846, %v3254_v26  ;;  %v3441_v37 = vadd.f32 1.0, %v5101_v36 }
 0x95b   :  { %v5105_v3 = vpop.eup %5104  ;;  %5108 = vtanh.f32 %v3317_v50  ;;  %v4021_v30 = vadd.f32 %v4020_v12, %v3972_v4  ;;  %v3442_v0 = vadd.f32 1.0, %v5103_v52  ;;  %v7211_v50 = vld [vmem:[#allocation17_spill] sm:$0xff]  ;;  %v7212_v52 = vld [vmem:[#allocation18_spill] sm:$0xff] }
 0x95c   :  { %v5107_v9 = vpop.eup %5106  ;;  %5110 = vtanh.f32 %v3318_v7  ;;  %v3444_v1 = vadd.f32 1.0, %v5105_v3  ;;  %v3505_v33 = vmul.f32 0.5, %v3441_v37 }
 0x95d   :  { %v3447_v47 = vadd.f32 1.0, %v5107_v9  ;;  %v3506_v53 = vmul.f32 0.5, %v3442_v0  ;;  %v4060_v32 = vadd.f32 %v4021_v30, %v7209_v13 }
 0x95e   :  { %v3924_v10 = vpop.f32.mrf.mxu2  ;;  %v3508_v34 = vmul.f32 0.5, %v3444_v1  ;;  %v3569_v48 = vmul.f32 %v3505_v33, %v7014_v59 }
 0x95f   :  { %v3925_v8 = vadd.f32 %v3924_v10, %v3875_v35  ;;  %v3973_v55 = vpop.f32.mrf.mxu3  ;;  %v3511_v60 = vmul.f32 0.5, %v3447_v47  ;;  %v3570_v22 = vmul.f32 %v3506_v53, %v7017_v46  ;;  %v7073_v15 = vadd.f32 %v7065_v61, %v4060_v32 }
 0x960   :  { %v3878_v31 = vpop.f32.mrf.mxu1  ;;  %v3572_v58 = vmul.f32 %v3508_v34, %v7023_v62 }
 0x961   :  { %v5109_v11 = vpop.eup %5108  ;;  %v3974_v5 = vadd.f32 %v3973_v55, %v3925_v8  ;;  %v4025_v16 = vpop.f32.mrf.mxu0  ;;  %v3575_v43 = vmul.f32 %v3511_v60, %v7029_v44 }
 0x962   :  { %v5111_v27 = vpop.eup %5110  ;;  %v3604_v29 = vpack.c.bf16 %v3572_v58, %v3568_v40  ;;  %v3445_v57 = vadd.f32 1.0, %v5109_v11 }
 0x963   :  { %v4023_v6 = vadd.f32 %v4022_v14, %v3974_v5  ;;  %v3607_v12 = vpack.c.bf16 %v3575_v43, %v3571_v49  ;;  %v3446_v45 = vadd.f32 1.0, %v5111_v27  ;;  %v7214_v5 = vld [vmem:[#allocation20_spill] sm:$0xff] }
 0x964   :  { %3907 = vmatmul.bf16.gmra.mxu1 %v3604_v29  ;;  %v3509_v62 = vmul.f32 0.5, %v3445_v57 }
 0x965   :  { %v4061_v23 = vadd.f32 %v4023_v6, %v7210_v25  ;;  %4054 = vmatmul.bf16.gmra.mxu0 %v3607_v12  ;;  %v3510_v44 = vmul.f32 0.5, %v3446_v45 }
 0x966   :  { %v3927_v38 = vpop.f32.mrf.mxu2  ;;  %v3573_v28 = vmul.f32 %v3509_v62, %v7041_v54 }
 0x967   :  { %v3928_v18 = vadd.f32 %v3927_v38, %v3878_v31  ;;  %v3976_v17 = vpop.f32.mrf.mxu3  ;;  %v3574_v2 = vmul.f32 %v3510_v44, %v7045_v41  ;;  %v7076_v42 = vadd.f32 %v7065_v61, %v4061_v23  ;;  %v7213_v31 = vld [vmem:[#allocation19_spill] sm:$0xff]  ;;  %v7215_v44 = vld [vmem:[#allocation21_spill] sm:$0xff] }
 0x968   :  { %v3880_v21 = vpop.f32.mrf.mxu1  ;;  %v3605_v51 = vpack.c.bf16 %v3573_v28, %v3569_v48  ;;  %v7216_v28 = vld [vmem:[#allocation22_spill] sm:$0xff] }
 0x969   :  { %v3977_v19 = vadd.f32 %v3976_v17, %v3928_v18  ;;  %v3606_v63 = vpack.c.bf16 %v3574_v2, %v3570_v22  ;;  %v4095_v59 = vpack.c.bf16 %v7076_v42, %v7073_v15  ;;  %v4027_v54 = vpop.f32.mrf.mxu0 }
 0x96a   :  { %3956 = vmatmul.bf16.gmra.mxu2 %v3605_v51 }
 0x96b   :  { %v4026_v46 = vadd.f32 %v4025_v16, %v3977_v19  ;;  %4005 = vmatmul.bf16.gmra.mxu3 %v3606_v63 }
 0x96d   :  { %v4062_v4 = vadd.f32 %v4026_v46, %v7211_v50 }
 0x96e   :  { %v3929_v26 = vpop.f32.mrf.mxu2 }
 0x96f   :  { %v3930_v35 = vadd.f32 %v3929_v26, %v3880_v21  ;;  %v3978_v41 = vpop.f32.mrf.mxu3  ;;  %v7083_v1 = vadd.f32 %v7065_v61, %v4062_v4 }
 0x970   :  { %v3883_v39 = vpop.f32.mrf.mxu1 }
 0x971   :  { %v3979_v36 = vadd.f32 %v3978_v41, %v3930_v35  ;;  %v4030_v20 = vpop.f32.mrf.mxu0 }
 0x973   :  { %v4028_v14 = vadd.f32 %v4027_v54, %v3979_v36 }
 0x975   :  { %v4063_v7 = vadd.f32 %v4028_v14, %v7212_v52  ;;  %v7217_v14 = vld [vmem:[#allocation23_spill] sm:$0xff] }
 0x976   :  { %v3932_v3 = vpop.f32.mrf.mxu2 }
 0x977   :  { %v3933_v30 = vadd.f32 %v3932_v3, %v3883_v39  ;;  %v3981_v9 = vpop.f32.mrf.mxu3  ;;  %v7086_v56 = vadd.f32 %v7065_v61, %v4063_v7  ;;  %v7218_v7 = vld [vmem:[#allocation24_spill] sm:$0xff] }
 0x978   :  { %v3885_v24 = vpop.f32.mrf.mxu1 }
 0x979   :  { %v3982_v47 = vadd.f32 %v3981_v9, %v3933_v30  ;;  %v4096_v10 = vpack.c.bf16 %v7086_v56, %v7083_v1  ;;  %v4032_v37 = vpop.f32.mrf.mxu0 }
 0x97b   :  { %v4031_v34 = vadd.f32 %v4030_v20, %v3982_v47 }
 0x97d   :  { %v4064_v40 = vadd.f32 %v4031_v34, %v7213_v31 }
 0x97e   :  { %v3934_v0 = vpop.f32.mrf.mxu2 }
 0x97f   :  { %v3935_v8 = vadd.f32 %v3934_v0, %v3885_v24  ;;  %v3983_v55 = vpop.f32.mrf.mxu3  ;;  %v7093_v29 = vadd.f32 %v7065_v61, %v4064_v40 }
 0x980   :  { %v3888_v11 = vpop.f32.mrf.mxu1 }
 0x981   :  { %v3984_v60 = vadd.f32 %v3983_v55, %v3935_v8  ;;  %v4035_v33 = vpop.f32.mrf.mxu0 }
 0x983   :  { %v4033_v58 = vadd.f32 %v4032_v37, %v3984_v60 }
 0x985   :  { %v4065_v16 = vadd.f32 %v4033_v58, %v7214_v5 }
 0x986   :  { %v3937_v49 = vpop.f32.mrf.mxu2 }
 0x987   :  { %v3938_v43 = vadd.f32 %v3937_v49, %v3888_v11  ;;  %v3986_v27 = vpop.f32.mrf.mxu3  ;;  %v7096_v57 = vadd.f32 %v7065_v61, %v4065_v16 }
 0x988   :  { %v3890_v6 = vpop.f32.mrf.mxu1 }
 0x989   :  { %v3987_v53 = vadd.f32 %v3986_v27, %v3938_v43  ;;  %v4097_v13 = vpack.c.bf16 %v7096_v57, %v7093_v29  ;;  %v4037_v23 = vpop.f32.mrf.mxu0 }
 0x98b   :  { %v4036_v32 = vadd.f32 %v4035_v33, %v3987_v53 }
 0x98d   :  { %v4066_v38 = vadd.f32 %v4036_v32, %v7215_v44 }
 0x98e   :  { %v3939_v12 = vpop.f32.mrf.mxu2 }
 0x98f   :  { %v3940_v45 = vadd.f32 %v3939_v12, %v3890_v6  ;;  %v3988_v62 = vpop.f32.mrf.mxu3  ;;  %v7103_v17 = vadd.f32 %v7065_v61, %v4066_v38 }
 0x990   :  { %v3893_v18 = vpop.f32.mrf.mxu1 }
 0x991   :  { %v3989_v25 = vadd.f32 %v3988_v62, %v3940_v45 }
 0x993   :  { %v4038_v48 = vadd.f32 %v4037_v23, %v3989_v25 }
 0x995   :  { %v4067_v22 = vadd.f32 %v4038_v48, %v7216_v28 }
 0x996   :  { %v3942_v21 = vpop.f32.mrf.mxu2 }
 0x997   :  { %v7106_v2 = vadd.f32 %v7065_v61, %v4067_v22  ;;  %v3943_v19 = vadd.f32 %v3942_v21, %v3893_v18 }
 0x998   :  { %v4040_v63 = vpop.f32.mrf.mxu0  ;;  %v3895_v26 = vpop.f32.mrf.mxu1 }
 0x999   :  { %v4098_v51 = vpack.c.bf16 %v7106_v2, %v7103_v17 }
 0x99a   :  { %v3991_v54 = vpop.f32.mrf.mxu3 }
 0x99b   :  { %v3992_v46 = vadd.f32 %v3991_v54, %v3943_v19 }
 0x99d   :  { %v4041_v41 = vadd.f32 %v4040_v63, %v3992_v46  ;;  %v7219_v63 = vld [vmem:[#allocation13_spill] sm:$0xff] }
 0x99e   :  { %v3944_v35 = vpop.f32.mrf.mxu2 }
 0x99f   :  { %v3945_v39 = vadd.f32 %v3944_v35, %v3895_v26  ;;  %v4068_v20 = vadd.f32 %v4041_v41, %v7217_v14  ;;  %v7220_v41 = vld [vmem:[#allocation14_spill] sm:$0xff] }
 0x9a0   :  { %v4042_v4 = vpop.f32.mrf.mxu0  ;;  %v3898_v24 = vpop.f32.mrf.mxu1 }
 0x9a1   :  { %v7113_v30 = vadd.f32 %v7065_v61, %v4068_v20 }
 0x9a2   :  { %v3993_v36 = vpop.f32.mrf.mxu3 }
 0x9a3   :  { %v3994_v50 = vadd.f32 %v3993_v36, %v3945_v39 }
 0x9a5   :  { %v4043_v52 = vadd.f32 %v4042_v4, %v3994_v50 }
 0x9a7   :  { %v4069_v3 = vadd.f32 %v4043_v52, %v7218_v7  ;;  %v7221_v52 = vld [vmem:[#allocation12_spill] sm:$0xff] }
 0x9a8   :  { %v4045_v0 = vpop.f32.mrf.mxu0  ;;  %v3900_v8 = vpop.f32.mrf.mxu1 }
 0x9a9   :  { %v4087_v9 = vadd.f32 %v7065_v61, %v4069_v3  ;;  %v3947_v34 = vpop.f32.mrf.mxu2 }
 0x9aa   :  { %v3948_v36 = vadd.f32 %v3947_v34, %v3898_v24  ;;  %v7223_v24 = vld [vmem:[#allocation26_spill] sm:$0xff] }
 0x9ab   :  { %v4099_v47 = vpack.c.bf16 %v4087_v9, %v7113_v30  ;;  %v7222_v9 = vld [vmem:[#allocation11_spill] sm:$0xff] }
 0x9ac   :  { %v3996_v37 = vpop.f32.mrf.mxu3 }
 0x9ad   :  { %v3997_v30 = vadd.f32 %v3996_v37, %v3948_v36 }
 0x9b0   :  { %v4047_v31 = vpop.f32.mrf.mxu0  ;;  %v3903_v40 = vpop.f32.mrf.mxu1 }
 0x9b1   :  { %v3949_v55 = vpop.f32.mrf.mxu2 }
 0x9b2   :  { %v3950_v26 = vadd.f32 %v3949_v55, %v3900_v8  ;;  %v4046_v55 = vadd.f32 %v4045_v0, %v3997_v30  ;;  %v5199_v0 = vmov 0  }
 0x9b3   :  { %4778 = vset.pattern.permute.xlu1 %v5199_v0  ;;  %4779 = vset.pattern.permute.xlu0 %v5199_v0 }
 0x9b4   :  { %v3998_v60 = vpop.f32.mrf.mxu3 }
 0x9b5   :  { %v3999_v20 = vadd.f32 %v3998_v60, %v3950_v26 }
 0x9b8   :  { %v4050_v5 = vpop.f32.mrf.mxu0  ;;  %v3905_v16 = vpop.f32.mrf.mxu1 }
 0x9b9   :  { %v3952_v58 = vpop.f32.mrf.mxu2 }
 0x9ba   :  { %v3953_v44 = vadd.f32 %v3952_v58, %v3903_v40  ;;  %v4048_v58 = vadd.f32 %v4047_v31, %v3999_v20  ;;  %v4103_v31 = vld [vmem:[%s7150_s3 + $0xa] sm:$0x1]  ;;  %s5200_s3 = smov [#allocation7]  }
 0x9bb   :  { %4106 = vperm.xlu1 %4778, %v4103_v31   ;;  %s4128_s14 = sshll.u32 %s5200_s3, 4  ;;  %s4129_s14 = int_to_ptr.vmem [resolvable:$true] %s4128_s14 }
 0x9bc   :  { %v4001_v11 = vpop.f32.mrf.mxu3  ;;  %v4071_v34 = vadd.f32 %v4048_v58, %v7223_v24 }
 0x9bd   :  { %v4002_v19 = vadd.f32 %v4001_v11, %v3953_v44 }
 0x9be   :  { %v4089_v60 = vadd.f32 %v7065_v61, %v4071_v34 }
 0x9bf   :  { %v4051_v50 = vadd.f32 %v4050_v5, %v4002_v19 }
 0x9c0   :  { %v4052_v27 = vpop.f32.mrf.mxu0 }
 0x9c1   :  { %v3954_v49 = vpop.f32.mrf.mxu2  ;;  %v4072_v40 = vadd.f32 %v4051_v50, %v7222_v9 }
 0x9c2   :  { %v3955_v62 = vadd.f32 %v3954_v49, %v3905_v16  ;;  %v7224_v16 = vld [vmem:[#allocation25_spill] sm:$0xff] }
 0x9c3   :  { %v4090_v11 = vadd.f32 %v7065_v61, %v4072_v40  ;;  %v4070_v49 = vadd.f32 %v4046_v55, %v7224_v16 }
 0x9c4   :  { %v4003_v43 = vpop.f32.mrf.mxu3 }
 0x9c5   :  { %v4004_v22 = vadd.f32 %v4003_v43, %v3955_v62  ;;  %v4088_v43 = vadd.f32 %v7065_v61, %v4070_v49 }
 0x9c7   :  { %v4053_v35 = vadd.f32 %v4052_v27, %v4004_v22  ;;  %v4100_v37 = vpack.c.bf16 %v4089_v60, %v4088_v43 }
 0x9c9   :  { %v4073_v7 = vadd.f32 %v4053_v35, %v7221_v52 }
 0x9cb   :  { %v4091_v8 = vadd.f32 %v7065_v61, %v4073_v7 }
 0x9cd   :  { %v4101_v5 = vpack.c.bf16 %v4091_v8, %v4090_v11 }
 0x9e1   :  { %v3908_v33 = vpop.f32.mrf.mxu1 }
 0x9e2   :  { %v4055_v12 = vpop.f32.mrf.mxu0 }
 0x9e9   :  { %v3910_v25 = vpop.f32.mrf.mxu1 }
 0x9ea   :  { %v4057_v21 = vpop.f32.mrf.mxu0 }
 0x9ed   :  { %v3957_v53 = vpop.f32.mrf.mxu2 }
 0x9ee   :  { %v3958_v32 = vadd.f32 %v3957_v53, %v3908_v33  ;;  %v4006_v6 = vpop.f32.mrf.mxu3 }
 0x9f0   :  { %v4007_v45 = vadd.f32 %v4006_v6, %v3958_v32 }
 0x9f2   :  { %v4056_v38 = vadd.f32 %v4055_v12, %v4007_v45 }
 0x9f4   :  { %v4074_v54 = vadd.f32 %v4056_v38, %v7219_v63 }
 0x9f5   :  { %v3959_v23 = vpop.f32.mrf.mxu2 }
 0x9f6   :  { %v3960_v48 = vadd.f32 %v3959_v23, %v3910_v25  ;;  %v4008_v28 = vpop.f32.mrf.mxu3  ;;  %v4092_v4 = vadd.f32 %v7065_v61, %v4074_v54 }
 0x9f8   :  { %v4009_v18 = vadd.f32 %v4008_v28, %v3960_v48 }
 0x9fa   :  { %v4058_v46 = vadd.f32 %v4057_v21, %v4009_v18 }
 0x9fc   :  { %v4075_v39 = vadd.f32 %v4058_v46, %v7220_v41 }
 0x9fe   :  { %v4093_v14 = vadd.f32 %v7065_v61, %v4075_v39  ;;  %v4094_v61 = vld [vmem:[#allocation2 + $0x220] sm:$0x1] }
 0xa00   :  { %v4102_v3 = vpack.c.bf16 %v4093_v14, %v4092_v4 }
 0xa02   :  { %4109 = vmatpush.bf16.xpose.msrb.mxu1 %v4102_v3 }
 0xa0a   :  { %4110 = vmatpush.bf16.xpose.msrb.mxu1 %v4101_v5 }
 0xa12   :  { %4111 = vmatpush.bf16.xpose.msrb.mxu1 %v4100_v37 }
 0xa1a   :  { %4112 = vmatpush.bf16.xpose.msrb.mxu1 %v4099_v47 }
 0xa22   :  { %4113 = vmatpush.bf16.xpose.msrb.mxu1 %v4098_v51 }
 0xa2a   :  { %4114 = vmatpush.bf16.xpose.msrb.mxu1 %v4097_v13 }
 0xa2d   :  { %v4107_v17 = vpop.permute.xlu1 %4106 }
 0xa32   :  { %4115 = vmatpush.bf16.xpose.msrb.mxu1 %v4096_v10 }
 0xa3a   :  { %4116 = vmatpush.bf16.xpose.msrb.mxu1 %v4095_v59 }
 0xa41   :  { %4117 = vmatmul.bf16.vlgmr.msrb.gmra.mxu1 %v4094_v61 }
 0xabe   :  { %v4118_v2 = vpop.f32.mrf.mxu1 }
 0xabf   :  { %v4119_v29 = vadd.f32 %v4118_v2, %v4107_v17 }
 0xac1   :  { %4122 = vst [vmem:[#allocation7] sm:$0x1] %v4119_v29 }
 0xac2   :  { %4133 = dma.vmem_to_hbm [thread:$0]  %s4129_s14, 16, %s4131_s17, [#allocation4]  }
 0xac6   :  { %v4120_v1 = vpop.f32.mrf.mxu1 }
 0xac7   :  { %5190 = dma.done.wait [#allocation4], 16  }
 0xac8   :  { %5191 = vsyncadd [#allocation4], 4294967280 }
 0xac9   :  { %4138 = vsyncpa [#allocation3], 1 }
 0xaca   :  { %4139 = vsyncpa [#allocation6], 1 }
 0xacb   :  { %4140 = vsyncpa [#allocation4], 1 }

</bundles_post_ra>
